<compile_context>
chip_gen: v7x
topology: tpu7x:2x2x1
jax: 0.10.0
libtpu: 0.0.40
codegen_flags: <defaults>
</compile_context>

<pallas_src>
import jax
import jax.numpy as jnp
from jax.experimental import pallas as pl
from jax.experimental.pallas import tpu as pltpu


def dense_mlp_kernel(x_ref, wg_ref, wu_ref, wd_ref, o_ref, acc_ref):
    # x_ref:   (tm, H)   input tile (bf16 or f32), resident across the k axis
    # wg_ref:  (H, ti)   gate-weight column tile (cols [k*ti, (k+1)*ti))
    # wu_ref:  (H, ti)   up-weight column tile   (cols [I + k*ti, I + (k+1)*ti))
    # wd_ref:  (ti, H)   down-weight row tile
    # o_ref:   (tm, H)   output tile, resident across the k axis
    # acc_ref: (tm, H)   f32 VMEM accumulator (scratch, resident across k)
    k = pl.program_id(1)

    x = x_ref[...]
    # Two MXU dots, f32 accumulation.
    g = jnp.dot(x, wg_ref[...], preferred_element_type=jnp.float32)   # (tm, ti)
    u = jnp.dot(x, wu_ref[...], preferred_element_type=jnp.float32)   # (tm, ti)
    # SwiGLU in f32 (VPU/EUP work overlaps with the MXU).
    act = (g * jax.nn.sigmoid(g)) * u
    # Partial down-projection for this slice of I.
    partial = jnp.dot(act.astype(wd_ref.dtype), wd_ref[...],
                      preferred_element_type=jnp.float32)             # (tm, H)

    @pl.when(k == 0)
    def _():
        # First partial written directly: saves a (tm, H) f32 zero + add pass.
        acc_ref[...] = partial

    @pl.when(k > 0)
    def _():
        acc_ref[...] += partial

    @pl.when(k == pl.num_programs(1) - 1)
    def _():
        o_ref[...] = acc_ref[...].astype(o_ref.dtype)


def _pick_tile(total, cap, align):
    """Largest multiple of `align` that divides `total` and is <= cap
    (falls back to the full extent)."""
    if total <= cap:
        return total
    t = (cap // align) * align
    while t >= align:
        if total % t == 0:
            return t
        t -= align
    return total


def _vmem_footprint(tm, ti, H, x_bytes, w_bytes):
    """Peak VMEM of the auto-pipelined tiles.

    x + out tiles double-buffered, f32 accumulator scratch, and three weight
    tiles (gate cols, up cols, down rows) double-buffered.
    """
    io_and_acc = tm * H * (4 * x_bytes + 4)        # 2*x + 2*out + f32 acc
    weights = 6 * H * ti * w_bytes                 # 3 weight tiles x 2 buffers
    return io_and_acc + weights


def _vmem_capacity_bytes():
    try:
        return int(pltpu.get_tpu_info().vmem_capacity_bytes)
    except Exception:
        return 128 << 20   # conservative default (v5e/v6e physical VMEM)


def _select_tiles(T, H, I, x_bytes, w_bytes, vmem_budget):
    """Generation-aware (tm, ti) selection from the VMEM budget."""
    big_vmem = vmem_budget >= (80 << 20)           # v5e/v6e (128 MiB) vs v7x (64 MiB/TC)

    # Decode / small batch: x/out/acc tiles are tiny, so widen ti to cut the
    # number of grid steps (per-step overhead + DMA descriptors).
    if T <= 64:
        ti_cap = 1024 if big_vmem else 512
    else:
        ti_cap = 512

    # Token-tile cap: v5e/v6e roofline wants ~512-768 rows; v7x (64 MiB) ~512.
    tm_cap = 768 if big_vmem else 512

    # Megacore: keep at least two blocks on the parallel token axis so both
    # v7x TensorCores get work (harmless elsewhere).
    if T > 128 and T <= 2 * tm_cap:
        tm_cap = max(128, T // 2)

    ti = _pick_tile(I, ti_cap, 128)
    tm = _pick_tile(T, tm_cap, 16)

    # Shrink until the tile footprint fits the VMEM budget (prefer halving ti
    # first — it only costs more grid steps, not MXU row occupancy).
    while _vmem_footprint(tm, ti, H, x_bytes, w_bytes) > vmem_budget:
        if ti > 128 and ti % 2 == 0 and I % (ti // 2) == 0:
            ti //= 2
        elif tm > 16 and tm % 2 == 0 and T % (tm // 2) == 0:
            tm //= 2
        else:
            break
    return tm, ti


def dense_mlp(x, w_gate_up, w_down, *, tm=None, ti=None, vmem_limit_bytes=None):
    T, H = x.shape
    H2, two_I = w_gate_up.shape
    assert H2 == H
    I = two_I // 2
    assert two_I == 2 * I
    assert w_down.shape == (I, H)
    # Note: H should be a multiple of 128 for dense lane stores; non-multiples
    # are legal (full-dim block) but produce masked stores and poorer layout.

    x_bytes = jnp.dtype(x.dtype).itemsize
    w_bytes = jnp.dtype(w_gate_up.dtype).itemsize

    vmem_capacity = _vmem_capacity_bytes()
    # Keep ~12.5% headroom, cap around 100 MiB (so the same tiling fits
    # 128-MiB chips comfortably and stays <= ~56 MiB on v7x's 64 MiB/TC).
    vmem_budget = min(int(vmem_capacity * 0.875), 100 << 20)

    auto_tm, auto_ti = _select_tiles(T, H, I, x_bytes, w_bytes, vmem_budget)
    if tm is None:
        tm = auto_tm
    if ti is None:
        ti = auto_ti
    assert T % tm == 0 and I % ti == 0
    # TODO(synk): no remainder-tile handling; T and I must divide by tm/ti.

    num_k = I // ti
    num_token_blocks = T // tm

    footprint = _vmem_footprint(tm, ti, H, x_bytes, w_bytes)
    if vmem_limit_bytes is None:
        # Actual footprint + compiler scratch headroom, clamped to the chip.
        vmem_limit_bytes = max(footprint + (16 << 20), 32 << 20)
        vmem_limit_bytes = min(vmem_limit_bytes, vmem_capacity - (4 << 20))

    # Weights are re-streamed once per token block; x / out move once.
    cost = pl.CostEstimate(
        flops=6 * T * H * I,                   # 2*T*H*2I (gate+up) + 2*T*I*H (down)
        transcendentals=T * I,                 # sigmoid
        bytes_accessed=(T * H * x_bytes                                  # x
                        + (H * 2 * I + I * H) * w_bytes * num_token_blocks
                        + T * H * x_bytes))                              # out

    return pl.pallas_call(
        dense_mlp_kernel,
        out_shape=jax.ShapeDtypeStruct((T, H), x.dtype),
        grid_spec=pltpu.PrefetchScalarGridSpec(
            num_scalar_prefetch=0,
            grid=(num_token_blocks, num_k),
            in_specs=[
                # x tile: varies with the token block only (resident over k).
                pl.BlockSpec((tm, H), lambda i, k: (i, 0)),
                # gate columns of the merged weight: block k.
                pl.BlockSpec((H, ti), lambda i, k: (0, k)),
                # up columns of the merged weight: block I//ti + k.
                pl.BlockSpec((H, ti), lambda i, k, _nk=num_k: (0, _nk + k)),
                # down-projection rows: block k.
                pl.BlockSpec((ti, H), lambda i, k: (k, 0)),
            ],
            out_specs=pl.BlockSpec((tm, H), lambda i, k: (i, 0)),
            scratch_shapes=[pltpu.VMEM((tm, H), jnp.float32)],
        ),
        compiler_params=pltpu.CompilerParams(
            dimension_semantics=("parallel", "arbitrary"),
            vmem_limit_bytes=int(vmem_limit_bytes)),
        cost_estimate=cost,
    )(x, w_gate_up, w_gate_up, w_down)


def dense_mlp_reference(x, w_gate_up, w_down):
    h = x @ w_gate_up
    I = w_down.shape[0]
    h0, h1 = h[:, :I], h[:, I:]
    return (jax.nn.silu(h0) * h1) @ w_down


if __name__ == "__main__":
    # Small but tile-exercising shapes: tokens=512, hidden=256, intermediate=1024
    # -> at least 2 token blocks (megacore) x 2 reduction blocks.
    T, H, I = 512, 256, 1024

    key = jax.random.PRNGKey(0)
    kx, kg, kd = jax.random.split(key, 3)
    x = jax.random.normal(kx, (T, H), dtype=jnp.float32).astype(jnp.bfloat16)
    w_gate_up = (jax.random.normal(kg, (H, 2 * I), dtype=jnp.float32)
                 * 0.02).astype(jnp.bfloat16)
    w_down = (jax.random.normal(kd, (I, H), dtype=jnp.float32)
              * 0.02).astype(jnp.bfloat16)

    out = dense_mlp(x, w_gate_up, w_down)
    out = jax.block_until_ready(out)

    ref = dense_mlp_reference(x.astype(jnp.float32),
                              w_gate_up.astype(jnp.float32),
                              w_down.astype(jnp.float32))
    assert out.shape == (T, H)
    max_err = float(jnp.max(jnp.abs(out.astype(jnp.float32) - ref)))
    # bf16 MXU inputs + bf16 output quantization vs. fp32 reference.
    assert max_err < 2e-2, f"mismatch vs reference: max abs err = {max_err}"

    # Also exercise the decode (small-T) tile-selection path.
    x_dec = x[:16]
    out_dec = jax.block_until_ready(dense_mlp(x_dec, w_gate_up, w_down))
    ref_dec = dense_mlp_reference(x_dec.astype(jnp.float32),
                                  w_gate_up.astype(jnp.float32),
                                  w_down.astype(jnp.float32))
    max_err_dec = float(jnp.max(jnp.abs(out_dec.astype(jnp.float32) - ref_dec)))
    assert max_err_dec < 2e-2, f"decode mismatch: max abs err = {max_err_dec}"

    print("KERNEL_OK")
</pallas_src>

<mosaic_0001>
module attributes {stable_mosaic.version = 11 : i64} {
  func.func @dense_mlp_kernel(%arg0: i32, %arg1: i32, %arg2: memref<256x256xbf16, #tpu.memory_space<vmem>>, %arg3: memref<256x512xbf16, #tpu.memory_space<vmem>>, %arg4: memref<256x512xbf16, #tpu.memory_space<vmem>>, %arg5: memref<512x256xbf16, #tpu.memory_space<vmem>>, %arg6: memref<256x256xbf16, #tpu.memory_space<vmem>>, %arg7: memref<256x256xf32, #tpu.memory_space<vmem>>) attributes {dimension_semantics = [#tpu.dimension_semantics<parallel>, #tpu.dimension_semantics<arbitrary>], iteration_bounds = array<i64: 2, 2>, scalar_prefetch = 0 : i64, scratch_operands = 1 : i64, tpu.core_type = #tpu.core_type<tc>, window_params = [{transform_indices = @transform_0, window_bounds = array<i64: 256, 256>}, {transform_indices = @transform_1, window_bounds = array<i64: 256, 512>}, {transform_indices = @transform_2, window_bounds = array<i64: 256, 512>}, {transform_indices = @transform_3, window_bounds = array<i64: 512, 256>}, {transform_indices = @transform_4, window_bounds = array<i64: 256, 256>}]} {
    %c0 = arith.constant 0 : index
    %c0_0 = arith.constant 0 : index
    %0 = vector.load %arg2[%c0, %c0_0] : memref<256x256xbf16, #tpu.memory_space<vmem>>, vector<256x256xbf16>
    %c0_1 = arith.constant 0 : index
    %c0_2 = arith.constant 0 : index
    %1 = vector.load %arg3[%c0_1, %c0_2] : memref<256x512xbf16, #tpu.memory_space<vmem>>, vector<256x512xbf16>
    %cst = arith.constant dense<0.000000e+00> : vector<256x512xf32>
    %2 = tpu.matmul %0, %1, %cst {dimension_numbers = #tpu.dot_dimension_numbers<[1], [0], [0], [1], [0, 0, 1, 1], [], []>} : vector<256x256xbf16>, vector<256x512xbf16>, vector<256x512xf32> -> vector<256x512xf32>
    %c0_3 = arith.constant 0 : index
    %c0_4 = arith.constant 0 : index
    %3 = vector.load %arg4[%c0_3, %c0_4] : memref<256x512xbf16, #tpu.memory_space<vmem>>, vector<256x512xbf16>
    %cst_5 = arith.constant dense<0.000000e+00> : vector<256x512xf32>
    %4 = tpu.matmul %0, %3, %cst_5 {dimension_numbers = #tpu.dot_dimension_numbers<[1], [0], [0], [1], [0, 0, 1, 1], [], []>} : vector<256x256xbf16>, vector<256x512xbf16>, vector<256x512xf32> -> vector<256x512xf32>
    %5 = arith.negf %2 : vector<256x512xf32>
    %6 = math.exp %5 : vector<256x512xf32>
    %cst_6 = arith.constant 1.000000e+00 : f32
    %7 = vector.broadcast %cst_6 : f32 to vector<256x512xf32>
    %8 = arith.addf %7, %6 : vector<256x512xf32>
    %9 = arith.divf %7, %8 : vector<256x512xf32>
    %10 = arith.mulf %2, %9 : vector<256x512xf32>
    %11 = arith.mulf %10, %4 : vector<256x512xf32>
    %12 = arith.truncf %11 : vector<256x512xf32> to vector<256x512xbf16>
    %c0_7 = arith.constant 0 : index
    %c0_8 = arith.constant 0 : index
    %13 = vector.load %arg5[%c0_7, %c0_8] : memref<512x256xbf16, #tpu.memory_space<vmem>>, vector<512x256xbf16>
    %cst_9 = arith.constant dense<0.000000e+00> : vector<256x256xf32>
    %14 = tpu.matmul %12, %13, %cst_9 {dimension_numbers = #tpu.dot_dimension_numbers<[1], [0], [0], [1], [0, 0, 1, 1], [], []>} : vector<256x512xbf16>, vector<512x256xbf16>, vector<256x256xf32> -> vector<256x256xf32>
    %c0_i32 = arith.constant 0 : i32
    %15 = arith.cmpi eq, %arg1, %c0_i32 : i32
    %16 = arith.extui %15 : i1 to i32
    %c0_i32_10 = arith.constant 0 : i32
    %17 = arith.cmpi ne, %16, %c0_i32_10 : i32
    scf.if %17 {
      %c0_14 = arith.constant 0 : index
      %c0_15 = arith.constant 0 : index
      %24 = vector.load %arg7[%c0_14, %c0_15] : memref<256x256xf32, #tpu.memory_space<vmem>>, vector<256x256xf32>
      tpu.vector_store %arg7[%c0_14, %c0_15], %14 {strides = array<i32>} : memref<256x256xf32, #tpu.memory_space<vmem>>, vector<256x256xf32>,
    } else {
    }
    %c0_i32_11 = arith.constant 0 : i32
    %18 = arith.cmpi sgt, %arg1, %c0_i32_11 : i32
    %19 = arith.extui %18 : i1 to i32
    %c0_i32_12 = arith.constant 0 : i32
    %20 = arith.cmpi ne, %19, %c0_i32_12 : i32
    scf.if %20 {
      %c0_14 = arith.constant 0 : index
      %c0_15 = arith.constant 0 : index
      %24 = vector.load %arg7[%c0_14, %c0_15] : memref<256x256xf32, #tpu.memory_space<vmem>>, vector<256x256xf32>
      %25 = arith.addf %24, %14 : vector<256x256xf32>
      %c0_16 = arith.constant 0 : index
      %c0_17 = arith.constant 0 : index
      %26 = vector.load %arg7[%c0_16, %c0_17] : memref<256x256xf32, #tpu.memory_space<vmem>>, vector<256x256xf32>
      tpu.vector_store %arg7[%c0_16, %c0_17], %25 {strides = array<i32>} : memref<256x256xf32, #tpu.memory_space<vmem>>, vector<256x256xf32>,
    } else {
    }
    %c1_i32 = arith.constant 1 : i32
    %21 = arith.cmpi eq, %arg1, %c1_i32 : i32
    %22 = arith.extui %21 : i1 to i32
    %c0_i32_13 = arith.constant 0 : i32
    %23 = arith.cmpi ne, %22, %c0_i32_13 : i32
    scf.if %23 {
      %c0_14 = arith.constant 0 : index
      %c0_15 = arith.constant 0 : index
      %24 = vector.load %arg7[%c0_14, %c0_15] : memref<256x256xf32, #tpu.memory_space<vmem>>, vector<256x256xf32>
      %25 = arith.truncf %24 : vector<256x256xf32> to vector<256x256xbf16>
      %c0_16 = arith.constant 0 : index
      %c0_17 = arith.constant 0 : index
      %26 = vector.load %arg6[%c0_16, %c0_17] : memref<256x256xbf16, #tpu.memory_space<vmem>>, vector<256x256xbf16>
      tpu.vector_store %arg6[%c0_16, %c0_17], %25 {strides = array<i32>} : memref<256x256xbf16, #tpu.memory_space<vmem>>, vector<256x256xbf16>,
    } else {
    }
    return
  }
  func.func @transform_0(%arg0: i32, %arg1: i32) -> (i32, i32) {
    %c0_i32 = arith.constant 0 : i32
    %c0_i32_0 = arith.constant 0 : i32
    return %arg0, %c0_i32 : i32, i32
  }
  func.func @transform_1(%arg0: i32, %arg1: i32) -> (i32, i32) {
    %c0_i32 = arith.constant 0 : i32
    %c0_i32_0 = arith.constant 0 : i32
    return %c0_i32, %arg1 : i32, i32
  }
  func.func @transform_2(%arg0: i32, %arg1: i32) -> (i32, i32) {
    %c2_i32 = arith.constant 2 : i32
    %0 = arith.addi %c2_i32, %arg1 : i32
    %c0_i32 = arith.constant 0 : i32
    %c0_i32_0 = arith.constant 0 : i32
    return %c0_i32, %0 : i32, i32
  }
  func.func @transform_3(%arg0: i32, %arg1: i32) -> (i32, i32) {
    %c0_i32 = arith.constant 0 : i32
    %c0_i32_0 = arith.constant 0 : i32
    return %arg1, %c0_i32 : i32, i32
  }
  func.func @transform_4(%arg0: i32, %arg1: i32) -> (i32, i32) {
    %c0_i32 = arith.constant 0 : i32
    %c0_i32_0 = arith.constant 0 : i32
    return %arg0, %c0_i32 : i32, i32
  }
}

</mosaic_0001>

<bundles_post_ra>
// kernel: tpu_custom_call.1
= control target key start
LH: loop header
LB: loop body
LE: loop exit
PB: predicated region body
PF: predicated region fallthrough
CT: control target
= control target key end

     0   :  { %s8451_s0 = inlined_call_operand.hbm [shape: bf16[512,256], index: 0, kind: input, shape index: {}]   ;;  %s8452_s1 = inlined_call_operand.hbm [shape: bf16[256,2048], index: 1, kind: input, shape index: {}]   ;;  %s8453_s2 = inlined_call_operand.hbm [shape: bf16[256,2048], index: 2, kind: input, shape index: {}]   ;;  %s8454_s3 = inlined_call_operand.hbm [shape: bf16[1024,256], index: 3, kind: input, shape index: {}]   ;;  %s8455_s4 = inlined_call_operand.hbm [shape: bf16[512,256], index: 4, kind: output, shape index: {}]  }
   0x1   :  { %8522 = sst [smem:[#allocation55_spill]] %s8451_s0 }
   0x2   :  { %8523 = sst [smem:[#allocation56_spill]] %s8452_s1 }
   0x3   :  { %8524 = sst [smem:[#allocation57_spill]] %s8453_s2 }
   0x4   :  { %8525 = sst [smem:[#allocation58_spill]] %s8454_s3 }
   0x5   :  { %8526 = sst [smem:[#allocation59_spill]] %s8455_s4 }
   0x6   :  { %9 = vsyncpa [#allocation4], 0 }
   0x7   :  { %11 = vsyncpa [#allocation4 + $0x1], 0 }
   0x8   :  { %12 = vsyncpa [#allocation7], 0 }
   0x9   :  { %14 = vsyncpa [#allocation7 + $0x1], 0 }
   0xa   :  { %15 = vsyncpa [#allocation10], 0 }
   0xb   :  { %17 = vsyncpa [#allocation10 + $0x1], 0 }
   0xc   :  { %18 = vsyncpa [#allocation5], 0 }
   0xd   :  { %20 = vsyncpa [#allocation5 + $0x1], 0  ;;  %s6533_s15 = smov 0   ;;  %s6535_s16 = smov 0  }
   0xe   :  { %s6537_s17 = smov 0   ;;  %s6539_s18 = smov 0  }
   0xf   :  { %s6541_s19 = smov 0   ;;  %s6543_s20 = smov 0  }
  0x10   :  { %s6545_s21 = smov 0   ;;  %s6547_s22 = smov 0  }
  0x11   :  { %s6549_s23 = smov 0   ;;  %s6551_s24 = smov 0  }
  0x12   :  { %s6553_s25 = smov 0   ;;  %s6555_s26 = smov 0  }
  0x13   :  { %s6557_s27 = smov 0   ;;  %s6559_s28 = smov 0  }
  0x14 LB: > { %8527 = sst [smem:[#allocation17_spill]] %s6450_s17  ;;  %p8471_p0 = scmp.eq.s32.totalorder %s6494_s28, 0  ;;  %s6494_s28 = sphi %s6559_s28, %s26_s28   ;;  %s6490_s27 = sphi %s6557_s27, %s8684_s27   ;;  %s6486_s26 = sphi %s6555_s26, %s8683_s26   ;;  %s6482_s25 = sphi %s6553_s25, %s8672_s25   ;;  %s6478_s24 = sphi %s6551_s24, %s8682_s24   ;;  %s6474_s23 = sphi %s6549_s23, %s8671_s23   ;;  %s6470_s22 = sphi %s6547_s22, %s8681_s22   ;;  %s6466_s21 = sphi %s6545_s21, %s8680_s21   ;;  %s6462_s20 = sphi %s6543_s20, %s8679_s20   ;;  %s6458_s19 = sphi %s6541_s19, %s8678_s19   ;;  %s6454_s18 = sphi %s6539_s18, %s8677_s18   ;;  %s6450_s17 = sphi %s6537_s17, %s8668_s17   ;;  %s6446_s16 = sphi %s6535_s16, %s8676_s16   ;;  %s6442_s15 = sphi %s6533_s15, %s8675_s15  }
  0x15   : > { %8528 = sst [smem:[#allocation18_spill]] %s6474_s23  ;;  %p78_p1 = scmp.ne.s32.totalorder %s6462_s20, %s6458_s19 }
  0x16   : > { %8529 = sst [smem:[#allocation19_spill]] %s6478_s24  ;;  %p8458_p4 = scmp.lt.s32.totalorder %s6494_s28, 4 }
  0x17   : > { %8530 = sst [smem:[#allocation20_spill]] %s6482_s25  ;;  %p80_p3 = por %p78_p1, %p8471_p0 }
  0x18   : > { %8531 = sst [smem:[#allocation21_spill]] %s6490_s27  ;;  %s210_s5 = sand.u32 1, %s6494_s28  }
  0x19   : > { %s8456_s6 = sand.u32 1, %s6462_s20   ;;  %s8457_s8 = sshll.u32 %s6486_s26, 8 }
  0x1a   : > { %s6617_s7 = sshll.u32 %s8456_s6, 9  ;;  %s8533_s1 = sld [smem:[#allocation56_spill]] }
  0x1b   : > { %8532 = sst [smem:[#allocation22_spill]] %s6617_s7  ;;  %s214_s12 = scalar_lea.vmem [#allocation6], %s6617_s7 }
  0x1c   : > { %s221_s13 = sshll.u32 %s214_s12, 4  ;;  %p6632_p5 = pnand %p8458_p4, %p80_p3  ;;  %s6628_s13 = int_to_ptr.vmem [resolvable:$true] %s221_s13 }
  0x1d   : > { %s6636_s6 = scalar_lea.sflag [#allocation7], %s210_s5 }
  0x1e   : > { %s8534_s14 = scalar_select %p6632_p5, 1, 0 }
  0x1f   : > { %8536 = sst [smem:[#allocation24_spill]] %s6636_s6  ;;  %p8470_p7 = pneg %p6632_p5 }
  0x20   : > { %s6625_s11 = scalar_lea.hbm %s8533_s1, %s8457_s8  ;;  %8535 = sst [smem:[#allocation23_spill]] %s8534_s14 }
  0x21   : > { %s6215_s9 = scalar_lea.hbm %s6625_s11, 8192  ;;  %s6220_s29 = scalar_lea.hbm %s8533_s1, 32768 }
  0x22   : > { %p6216_p6 = scmp.ne.s32.totalorder %s6625_s11, %s6215_s9  ;;  %p6221_p10 = scmp.lt.u32.totalorder %s6625_s11, %s8533_s1 }
  0x23   : > { %p6222_p11 = scmp.lt.u32.totalorder %s6220_s29, %s6215_s9  ;;  %p6224_p13 = scmp.lt.u32.totalorder %s6215_s9, %s6625_s11 }
  0x24   : > { %p6218_p8 = pnand %p8470_p7, %p6216_p6 }
  0x25   : > { %p6223_p12 = por %p6222_p11, %p6221_p10 }
  0x26   : > { %p6219_p9 = pneg %p6218_p8 }
  0x27   : > { %p6225_p1 = por %p6224_p13, %p6223_p12 }
  0x29   : > { %p6226_p3 = pnand %p6225_p1, %p6219_p9 }
  0x2b   : > { %6229 = shalt.err (!%p6226_p3)
}
  0x2c   : > { %s6230_s5 = scalar_lea.vmem %s6628_s13, 8192  ;;  %s6496_s10 = smov [#allocation6]  }
  0x2d   : > { %p6231_p6 = scmp.ne.s32.totalorder %s6628_s13, %s6230_s5  ;;  %s6235_s12 = sshll.u32 %s6496_s10, 4  ;;  %s6236_s12 = int_to_ptr.vmem [resolvable:$false] %s6235_s12 }
  0x2e   : > { %s6237_s30 = scalar_lea.vmem %s6236_s12, 16384  ;;  %p6238_p2 = scmp.lt.s32.totalorder %s6628_s13, %s6236_s12 }
  0x2f   : > { %p6233_p8 = pnand %p6231_p6, %p8470_p7  ;;  %p6239_p10 = scmp.lt.s32.totalorder %s6237_s30, %s6230_s5 }
  0x31   : > { %p6234_p4 = pneg %p6233_p8  ;;  %p6240_p11 = por %p6239_p10, %p6238_p2 }
  0x33   : > { %p6241_p12 = pnand %p6240_p11, %p6234_p4 }
  0x35   : > { %6244 = shalt.err (!%p6241_p12)
}
  0x36   : > { %s8460_s29 = smov 1024   ;;  %s8461_s8 = smov 256  }
  0x37   : > { %s8462_s9 = smov 16   ;;  %s8537_s5 = sshll.u32 %s6486_s26, 8 }
  0x38   : > { %5203 = dma.hbm_to_vmem [thread:$0]  (!%p6632_p5), %s6625_s11, 8192, %s6628_s13, %s6636_s6, %s8460_s29, %s8461_s8, %s8462_s9  }
  0x39   : > { %s8538_s2 = sld [smem:[#allocation57_spill]]  ;;  %p4685_p2 = scmp.ge.s32.totalorder %s6494_s28, 1 }
  0x3a   : > { %p273_p4 = scmp.lt.s32.totalorder %s6494_s28, 5  ;;  %s6684_s25 = sadd.s32 4294967295, %s6494_s28  }
  0x3b   : > { %s4669_s11 = sadd.s32 4294967294, %s6494_s28   ;;  %s35_s13 = sadd.s32 1, %s6486_s26 }
  0x3c   : > { %p6679_p9 = pnand %p4685_p2, %p273_p4  ;;  %p36_p13 = scmp.ge.s32.totalorder %s35_s13, 2 }
  0x3d   : > { %s45_s10 = sadd.s32 1, %s6474_s23  ;;  %p52_p1 = scmp.ne.s32.totalorder %s6474_s23, %s6470_s22 }
  0x3e   : > { %s8539_s4 = scalar_select %p6679_p9, 1, 0 }
  0x3f   : > { %s6672_s30 = scalar_lea.hbm %s8538_s2, %s8537_s5  ;;  %s38_s5 = sadd.s32 1, %s6490_s27 }
  0x40   : > { %s6676_s1 = scalar_lea.hbm %s6672_s30, 512  ;;  %8540 = sst [smem:[#allocation25_spill]] %s8539_s4 }
  0x41   : > { %s8686_s13 = smov (%p36_p13, %s35_s13), 0  ;;  %s8688_s5 = smov (!%p36_p13, %s38_s5), %s6490_s27 }
  0x42   : > { %8541 = sst [smem:[#allocation26_spill]] %s8686_s13  ;;  %p6700_p3 = por %p8471_p0, %p52_p1 }
  0x43   : > { %p58_p6 = scmp.ne.s32.totalorder %s6470_s22, %s6466_s21  ;;  %p40_p8 = scmp.ge.s32.totalorder %s8688_s5, 2 }
  0x44   : > { %p8472_p10 = scmp.eq.s32.totalorder %s6684_s25, 0  ;;  %s68_s29 = ssub.s32 %s6486_s26, %s8686_s13 }
  0x45   : > { %s95_s8 = sadd.s32 2, %s8686_s13  ;;  %s8690_s5 = smov (%p40_p8, %s8688_s5), 0 }
  0x46   : > { %8543 = sst [smem:[#allocation27_spill]] %s8690_s5  ;;  %p6717_p11 = por %p8472_p10, %p58_p6 }
  0x47   : > { %p69_p12 = scmp.eq.s32.totalorder %s68_s29, 0  ;;  %s42_s24 = ssub.s32 %s6490_s27, %s8690_s5 }
  0x48   : > { %s8544_s9 = scalar_select %p6717_p11, 1, 0 }
  0x49   : > { %p8545_p2 = scmp.ne.s32.totalorder %s6458_s19, %s6454_s18  ;;  %p43_p13 = scmp.eq.s32.totalorder %s42_s24, 0 }
  0x4a   : > { %s8547_s13 = sadd.s32 2, %s6486_s26  ;;  %s8548_s14 = sadd.s32 1, %s6462_s20 }
  0x4b   : > { %p6728_p4 = por %p8545_p2, %p8472_p10  ;;  %s6734_s3 = ssub.s32 %s8547_s13, %s95_s8 }
  0x4c   : > { %s6739_s7 = scalar_select %p69_p12, %s6462_s20, %s8548_s14  }
  0x4d   : > { %s8546_s4 = scalar_select %p6728_p4, 1, 0 }
  0x4e   : > { %8549 = sst [smem:[#allocation28_spill]] %s6739_s7  ;;  %p162_p7 = scmp.eq.s32.totalorder %s6684_s25, 3 }
  0x4f   : > { %s6742_s6 = scalar_select %p43_p13, %s6474_s23, %s45_s10  }
  0x50   : > { %p168_p0 = scmp.eq.s32.totalorder %s4669_s11, 3  ;;  %s188_s18 = sand.u32 1, %s6474_s23  }
  0x51   : > { %8550 = sst [smem:[#allocation29_spill]] %s6742_s6  ;;  %p6750_p2 = por %p162_p7, %p52_p1 }
  0x52   : > { %p6757_p10 = por %p168_p0, %p58_p6  ;;  %s4672_s8 = sshll.u32 %s188_s18, 8 }
  0x53   : > { %s8551_s29 = scalar_select %p6750_p2, 1, 0 }
  0x54   : > { %s8552_s24 = scalar_select %p6757_p10, 1, 0 }
  0x55   : > { %s5085_s13 = sshll.u32 %s6490_s27, 12  ;;  %s8553_s0 = sld [smem:[#allocation55_spill]] }
  0x56   : > { %s192_s11 = scalar_lea.vmem [#allocation3], %s4672_s8  ;;  %p8554_p0 = scmp.lt.s32.totalorder %s6494_s28, 4 }
  0x57   : > { %s200_s6 = sshll.u32 %s192_s11, 4  ;;  %s6777_s27 = scalar_lea.sflag [#allocation4], %s188_s18  ;;  %s6767_s6 = int_to_ptr.vmem [resolvable:$true] %s200_s6 }
  0x58   : > { %p6773_p7 = pnand %p8554_p0, %p6700_p3 }
  0x5a   : > { %p6247_p6 = pneg %p6773_p7 }
  0x5b   : > { %s6765_s10 = scalar_lea.hbm %s8553_s0, %s5085_s13  ;;  %s6250_s12 = scalar_lea.hbm %s8553_s0, 8192 }
  0x5c   : > { %s6245_s5 = scalar_lea.hbm %s6765_s10, 4096  ;;  %p6251_p3 = scmp.lt.u32.totalorder %s6765_s10, %s8553_s0 }
  0x5d   : > { %p6246_p1 = scmp.ne.s32.totalorder %s6765_s10, %s6245_s5  ;;  %p6252_p0 = scmp.lt.u32.totalorder %s6250_s12, %s6245_s5 }
  0x5e   : > { %p6254_p10 = scmp.lt.u32.totalorder %s6245_s5, %s6765_s10 }
  0x5f   : > { %p6248_p12 = pnand %p6247_p6, %p6246_p1  ;;  %p6253_p8 = por %p6252_p0, %p6251_p3 }
  0x61   : > { %p6249_p13 = pneg %p6248_p12  ;;  %p6255_p2 = por %p6254_p10, %p6253_p8 }
  0x63   : > { %p6256_p4 = pnand %p6255_p2, %p6249_p13 }
  0x65   : > { %6259 = shalt.err (!%p6256_p4)
}
  0x66   : > { %s6260_s18 = scalar_lea.vmem %s6767_s6, 4096  ;;  %s6500_s8 = smov [#allocation3]  }
  0x67   : > { %p6261_p1 = scmp.ne.s32.totalorder %s6767_s6, %s6260_s18  ;;  %s6265_s13 = sshll.u32 %s6500_s8, 4  ;;  %s6266_s13 = int_to_ptr.vmem [resolvable:$false] %s6265_s13 }
  0x68   : > { %s6267_s14 = scalar_lea.vmem %s6266_s13, 8192  ;;  %p6268_p9 = scmp.lt.s32.totalorder %s6767_s6, %s6266_s13 }
  0x69   : > { %p6263_p12 = pnand %p6261_p1, %p6247_p6  ;;  %p6269_p3 = scmp.lt.s32.totalorder %s6267_s14, %s6260_s18 }
  0x6b   : > { %p6264_p11 = pneg %p6263_p12  ;;  %p6270_p0 = por %p6269_p3, %p6268_p9 }
  0x6d   : > { %p6271_p10 = pnand %p6270_p0, %p6264_p11 }
  0x6f   : > { %6274 = shalt.err (!%p6271_p10)
}
  0x70   : > { %s8479_s5 = smov 128   ;;  %s8480_s12 = smov 8  }
  0x71   : > { %5200 = dma.hbm_to_vmem [thread:$0]  (!%p6773_p7), %s6765_s10, 4096, %s6767_s6, %s6777_s27, %s8479_s5, %s8479_s5, %s8480_s12  }
  0x72   : > { %s99_s11 = sadd.s32 1, %s6450_s17  ;;  %p8556_p9 = scmp.eq.s32.totalorder %s6734_s3, 0 }
  0x73   : > { %p106_p11 = scmp.ne.s32.totalorder %s6450_s17, %s6446_s16  ;;  %p112_p4 = scmp.ne.s32.totalorder %s6446_s16, %s6442_s15 }
  0x74   : > { %s6812_s18 = scalar_select %p8556_p9, %s6450_s17, %s99_s11  }
  0x75   : > { %s233_s8 = sand.u32 1, %s6450_s17   ;;  %p8558_p8 = scmp.eq.s32.totalorder %s6494_s28, 0 }
  0x76   : > { %8557 = sst [smem:[#allocation30_spill]] %s6812_s18  ;;  %p8559_p6 = scmp.eq.s32.totalorder %s6684_s25, 0 }
  0x77   : > { %p108_p2 = por %p106_p11, %p8558_p8  ;;  %s4679_s23 = sshll.u32 %s233_s8, 9 }
  0x78   : > { %p6823_p13 = por %p112_p4, %p8559_p6  ;;  %p8561_p1 = scmp.lt.s32.totalorder %s6494_s28, 4 }
  0x79   : > { %s235_s3 = scalar_lea.vmem [#allocation8], %s4679_s23  ;;  %s6305_s10 = scalar_lea.hbm %s6672_s30, 8704 }
  0x7a   : > { %s8560_s13 = scalar_select %p6823_p13, 1, 0 }
  0x7b   : > { %p6829_p12 = pnand %p8561_p1, %p108_p2  ;;  %s243_s15 = sshll.u32 %s235_s3, 4  ;;  %s6834_s15 = int_to_ptr.vmem [resolvable:$true] %s243_s15 }
  0x7c   : > { %p6276_p7 = scmp.ne.s32.totalorder %s6676_s1, %s6305_s10  ;;  %s6280_s8 = scalar_lea.hbm %s8538_s2, 32768 }
  0x7d   : > { %p6277_p3 = pneg %p6829_p12  ;;  %p6281_p9 = scmp.lt.u32.totalorder %s6676_s1, %s8538_s2 }
  0x7e   : > { %p6282_p11 = scmp.lt.u32.totalorder %s6280_s8, %s6305_s10  ;;  %p6284_p8 = scmp.lt.u32.totalorder %s6305_s10, %s6676_s1 }
  0x7f   : > { %p6278_p0 = pnand %p6277_p3, %p6276_p7 }
  0x80   : > { %p6283_p4 = por %p6282_p11, %p6281_p9 }
  0x81   : > { %p6279_p10 = pneg %p6278_p0 }
  0x82   : > { %p6285_p2 = por %p6284_p8, %p6283_p4 }
  0x84   : > { %p6286_p6 = pnand %p6285_p2, %p6279_p10 }
  0x86   : > { %6289 = shalt.err (!%p6286_p6)
}
  0x87   : > { %s6290_s30 = scalar_lea.vmem %s6834_s15, 8192  ;;  %s6503_s23 = smov [#allocation8]  }
  0x88   : > { %p6291_p1 = scmp.ne.s32.totalorder %s6834_s15, %s6290_s30  ;;  %s6295_s3 = sshll.u32 %s6503_s23, 4  ;;  %s6296_s3 = int_to_ptr.vmem [resolvable:$false] %s6295_s3 }
  0x89   : > { %s6297_s5 = scalar_lea.vmem %s6296_s3, 16384  ;;  %p6298_p13 = scmp.lt.s32.totalorder %s6834_s15, %s6296_s3 }
  0x8a   : > { %p6293_p7 = pnand %p6291_p1, %p6277_p3  ;;  %p6299_p9 = scmp.lt.s32.totalorder %s6297_s5, %s6290_s30 }
  0x8c   : > { %p6294_p0 = pneg %p6293_p7  ;;  %p6300_p11 = por %p6299_p9, %p6298_p13 }
  0x8e   : > { %p6301_p4 = pnand %p6300_p11, %p6294_p0 }
  0x90   : > { %6304 = shalt.err (!%p6301_p4)
}
  0x91   : > { %s8563_s12 = smov 16   ;;  %s8564_s10 = smov 256  }
  0x92   : > { %s8565_s14 = smov 1024   ;;  %s8566_s11 = sld [smem:[#allocation24_spill]] }
  0x93   : > { %s8567_s8 = sld [smem:[#allocation22_spill]]  ;;  %s8569_s23 = sshll.u32 %s6486_s26, 13 }
  0x94   : > { %s8570_s30 = sld [smem:[#allocation58_spill]]  ;;  %s8571_s7 = sand.u32 1, %s6462_s20  }
  0x95   : > { %s6877_s18 = scalar_lea.sflag [#allocation10], %s8571_s7 }
  0x98   : > { %5206 = dma.hbm_to_vmem [thread:$0]  (!%p6829_p12), %s6676_s1, 8192, %s6834_s15, %s8566_s11, %s8565_s14, %s8564_s10, %s8563_s12  }
  0x99   : > { %s257_s27 = scalar_lea.vmem [#allocation9], %s8567_s8  ;;  %p8572_p12 = pneg %p6632_p5 }
  0x9a   : > { %s6870_s5 = scalar_lea.hbm %s8570_s30, %s8569_s23  ;;  %s265_s2 = sshll.u32 %s257_s27, 4  ;;  %s6873_s2 = int_to_ptr.vmem [resolvable:$true] %s265_s2 }
  0x9b   : > { %s6306_s17 = scalar_lea.hbm %s6870_s5, 8192  ;;  %s6311_s15 = scalar_lea.hbm %s8570_s30, 16384 }
  0x9c   : > { %p6307_p13 = scmp.ne.s32.totalorder %s6870_s5, %s6306_s17  ;;  %p6312_p8 = scmp.lt.u32.totalorder %s6870_s5, %s8570_s30 }
  0x9d   : > { %p6313_p2 = scmp.lt.u32.totalorder %s6311_s15, %s6306_s17  ;;  %p6315_p1 = scmp.lt.u32.totalorder %s6306_s17, %s6870_s5 }
  0x9e   : > { %p6309_p3 = pnand %p6307_p13, %p8572_p12 }
  0x9f   : > { %p6314_p6 = por %p6313_p2, %p6312_p8 }
  0xa0   : > { %p6310_p10 = pneg %p6309_p3 }
  0xa1   : > { %p6316_p7 = por %p6315_p1, %p6314_p6 }
  0xa3   : > { %p6317_p0 = pnand %p6316_p7, %p6310_p10 }
  0xa5   : > { %6320 = shalt.err (!%p6317_p0)
}
  0xa6   : > { %s6321_s7 = scalar_lea.vmem %s6873_s2, 8192  ;;  %p8573_p11 = pmov %p8572_p12 }
  0xa7   : > { %p6322_p9 = scmp.ne.s32.totalorder %s6873_s2, %s6321_s7  ;;  %s6504_s14 = smov [#allocation9]  }
  0xa8   : > { %s6326_s11 = sshll.u32 %s6504_s14, 4  ;;  %s6327_s11 = int_to_ptr.vmem [resolvable:$false] %s6326_s11 }
  0xa9   : > { %p6324_p4 = pnand %p6322_p9, %p8573_p11  ;;  %s6328_s8 = scalar_lea.vmem %s6327_s11, 16384 }
  0xaa   : > { %p6329_p12 = scmp.lt.s32.totalorder %s6873_s2, %s6327_s11  ;;  %p6330_p3 = scmp.lt.s32.totalorder %s6328_s8, %s6321_s7 }
  0xab   : > { %p6325_p13 = pneg %p6324_p4 }
  0xac   : > { %p6331_p8 = por %p6330_p3, %p6329_p12 }
  0xae   : > { %p6332_p2 = pnand %p6331_p8, %p6325_p13 }
  0xb0   : > { %6335 = shalt.err (!%p6332_p2)
}
  0xb1   : > { %s8574_s17 = smov 8   ;;  %s8575_s23 = smov 128  }
  0xb2   : > { %5209 = dma.hbm_to_vmem [thread:$0]  (!%p6632_p5), %s6870_s5, 8192, %s6873_s2, %s6877_s18, %s8575_s23, %s8575_s23, %s8574_s17  }
  0xb3   : > { %s8576_s3 = sld [smem:[#allocation25_spill]] }
  0xb9   : > { %p8577_p10 = scmp.ne.s32.totalorder %s8576_s3, 0 }
  0xbb   : > { %277 = sbr.rel (%p8577_p10) target bundleno = 1194 (0x4aa), region = 36 }
  0xc2   : > { %s6909_s27 = sand.u32 1, %s6470_s22   ;;  %p8578_p6 = scmp.ne.s32.totalorder %s8544_s9, 0 }
  0xc3   : > { %s4686_s0 = sshll.u32 %s6909_s27, 8  ;;  %s280_s1 = scalar_lea.sflag [#allocation4], %s6909_s27 }
  0xc4   : > { %s6915_s6 = scalar_lea.vmem [#allocation3], %s4686_s0 }
  0xc5   : > { %6421 = dma.done.wait (%p8578_p6), %s280_s1, 4096  }
  0xc6   : > { %6423 = vsyncadd (%p8578_p6), %s280_s1, 4294963200  ;;  %s288_s2 = sand.u32 1, %s6684_s25   ;;  %s290_s18 = sand.u32 1, %s6458_s19  }
  0xc7   : > { %s4687_s5 = sshll.u32 %s290_s18, 9  ;;  %s289_s15 = scalar_lea.sflag [#allocation7], %s288_s2 }
  0xc8   : > { %s6923_s12 = scalar_lea.vmem [#allocation6], %s4687_s5  ;;  %p8579_p5 = scmp.ne.s32.totalorder %s8546_s4, 0 }
  0xca   : > { %6425 = dma.done.wait (%p8579_p5), %s289_s15, 8192  }
  0xcb   : > { %6427 = vsyncadd (%p8579_p5), %s289_s15, 4294959104  ;;  %s299_s10 = sand.u32 1, %s6446_s16   ;;  %p8580_p1 = scmp.ne.s32.totalorder %s8560_s13, 0 }
  0xcc   : > { %s4688_s7 = sshll.u32 %s299_s10, 9 }
  0xcd   : > { %s6930_s9 = scalar_lea.vmem [#allocation8], %s4688_s7 }
  0xce   : > { %6429 = dma.done.wait (%p8580_p1), %s289_s15, 8192  }
  0xcf   : > { %6431 = vsyncadd (%p8580_p1), %s289_s15, 4294959104  ;;  %s307_s25 = scalar_lea.sflag [#allocation10], %s290_s18  ;;  %s6936_s14 = scalar_lea.vmem [#allocation9], %s4687_s5 }
  0xd0   : > { %6433 = dma.done.wait (%p8579_p5), %s307_s25, 8192  }
  0xd1   : > { %6435 = vsyncadd (%p8579_p5), %s307_s25, 4294959104  ;;  %v5335_v0 = vld [vmem:[%s6923_s12 + $0x4] ss:$16 sps:$4 sm:$0xff]   ;;  %v5337_v1 = vld [vmem:[%s6923_s12] ss:$16 sps:$4 sm:$0xff]   ;;  %s8201_s4 = scalar_lea.vmem [#allocation11], %s4686_s0 }
  0xd2   : > { %932 = vmatprep.subr.bf16.mxu1 %v5335_v0  ;;  %v5338_v2 = vld [vmem:[%s6923_s12 + $0x24] ss:$16 sps:$4 sm:$0xff]   ;;  %v5340_v3 = vld [vmem:[%s6923_s12 + $0x20] ss:$16 sps:$4 sm:$0xff]   ;;  %v5415_v60 = vld [vmem:[%s6923_s12 + $0xc] ss:$16 sps:$4 sm:$0xff]  }
  0xd3   : > { %933 = vmatpush1.bf16.msra.mxu1 %v5337_v1  ;;  %v5341_v4 = vld [vmem:[%s6923_s12 + $0x44] ss:$16 sps:$4 sm:$0xff]   ;;  %v5343_v5 = vld [vmem:[%s6923_s12 + $0x40] ss:$16 sps:$4 sm:$0xff]   ;;  %v5413_v62 = vld [vmem:[%s6923_s12 + $0x8] ss:$16 sps:$4 sm:$0xff]  }
  0xd4   : > { %934 = vmatprep.subr.bf16.mxu1 %v5338_v2  ;;  %v5344_v6 = vld [vmem:[%s6923_s12 + $0x64] ss:$16 sps:$4 sm:$0xff]   ;;  %v5346_v7 = vld [vmem:[%s6923_s12 + $0x60] ss:$16 sps:$4 sm:$0xff]   ;;  %v5427_v1 = vld [vmem:[%s6923_s12 + $0x2c] ss:$16 sps:$4 sm:$0xff]  }
  0xd5   : > { %v5358_v8 = vld [vmem:[%s6930_s9 + $0x4] ss:$16 sps:$4 sm:$0xff]   ;;  %v5361_v9 = vld [vmem:[%s6930_s9] ss:$16 sps:$4 sm:$0xff]   ;;  %s8644_s13 = sld [smem:[#allocation19_spill]] }
  0xd6   : > { %v5347_v10 = vld [vmem:[%s6923_s12 + $0x84] ss:$16 sps:$4 sm:$0xff]   ;;  %1702 = vmatprep.subr.bf16.mxu0 %v5358_v8  ;;  %v5367_v12 = vld [vmem:[%s6930_s9 + $0x20] ss:$16 sps:$4 sm:$0xff]  }
  0xd7   : > { %935 = vmatpush1.bf16.msra.mxu1 %v5340_v3  ;;  %v5364_v11 = vld [vmem:[%s6930_s9 + $0x24] ss:$16 sps:$4 sm:$0xff]   ;;  %1703 = vmatpush1.bf16.msra.mxu0 %v5361_v9  ;;  %v5349_v13 = vld [vmem:[%s6923_s12 + $0x80] ss:$16 sps:$4 sm:$0xff]  }
  0xd8   : > { %936 = vmatprep.subr.bf16.mxu1 %v5341_v4  ;;  %1704 = vmatprep.subr.bf16.mxu0 %v5364_v11  ;;  %v5350_v14 = vld [vmem:[%s6923_s12 + $0xa4] ss:$16 sps:$4 sm:$0xff]   ;;  %v5373_v16 = vld [vmem:[%s6930_s9 + $0x40] ss:$16 sps:$4 sm:$0xff]   ;;  %v5425_v4 = vld [vmem:[%s6923_s12 + $0x28] ss:$16 sps:$4 sm:$0xff]  }
  0xd9   : > { %v5370_v15 = vld [vmem:[%s6930_s9 + $0x44] ss:$16 sps:$4 sm:$0xff]   ;;  %v5352_v17 = vld [vmem:[%s6923_s12 + $0xa0] ss:$16 sps:$4 sm:$0xff]   ;;  %v5451_v11 = vld [vmem:[%s6923_s12 + $0x6c] ss:$16 sps:$4 sm:$0xff]  }
  0xda   : > { %v5376_v18 = vld [vmem:[%s6930_s9 + $0x64] ss:$16 sps:$4 sm:$0xff]   ;;  %v5355_v20 = vld [vmem:[%s6923_s12 + $0xc0] ss:$16 sps:$4 sm:$0xff]  }
  0xdb   : > { %937 = vmatpush1.bf16.msra.mxu1 %v5343_v5  ;;  %1705 = vmatpush1.bf16.msra.mxu0 %v5367_v12  ;;  %v5353_v19 = vld [vmem:[%s6923_s12 + $0xc4] ss:$16 sps:$4 sm:$0xff]   ;;  %v5379_v21 = vld [vmem:[%s6930_s9 + $0x60] ss:$16 sps:$4 sm:$0xff]   ;;  %v5449_v12 = vld [vmem:[%s6923_s12 + $0x68] ss:$16 sps:$4 sm:$0xff]  }
  0xdc   : > { %938 = vmatprep.subr.bf16.mxu1 %v5344_v6  ;;  %1706 = vmatprep.subr.bf16.mxu0 %v5370_v15  ;;  %v5382_v22 = vld [vmem:[%s6930_s9 + $0x84] ss:$16 sps:$4 sm:$0xff]   ;;  %v5385_v24 = vld [vmem:[%s6930_s9 + $0x80] ss:$16 sps:$4 sm:$0xff]   ;;  %v5439_v6 = vld [vmem:[%s6923_s12 + $0x4c] ss:$16 sps:$4 sm:$0xff]  }
  0xdd   : > { %v5356_v23 = vld [vmem:[%s6923_s12 + $0xe4] ss:$16 sps:$4 sm:$0xff]   ;;  %v5360_v25 = vld [vmem:[%s6923_s12 + $0xe0] ss:$16 sps:$4 sm:$0xff]   ;;  %p5043_p7 = scmp.ne.s32.totalorder %s8644_s13, 0 }
  0xde   : > { %v5388_v26 = vld [vmem:[%s6930_s9 + $0xa4] ss:$16 sps:$4 sm:$0xff]   ;;  %v5366_v28 = vld [vmem:[%s6923_s12 + $0x100] ss:$16 sps:$4 sm:$0xff]  }
  0xdf   : > { %939 = vmatpush1.bf16.msra.mxu1 %v5346_v7  ;;  %1707 = vmatpush1.bf16.msra.mxu0 %v5373_v16  ;;  %v5362_v27 = vld [vmem:[%s6923_s12 + $0x104] ss:$16 sps:$4 sm:$0xff]   ;;  %v5391_v29 = vld [vmem:[%s6930_s9 + $0xa0] ss:$16 sps:$4 sm:$0xff]   ;;  %v5458_v16 = vld [vmem:[%s6923_s12 + $0x88] ss:$16 sps:$4 sm:$0xff]  }
  0xe0   : > { %940 = vmatprep.subr.bf16.mxu1 %v5347_v10  ;;  %1708 = vmatprep.subr.bf16.mxu0 %v5376_v18  ;;  %v5394_v30 = vld [vmem:[%s6930_s9 + $0xc4] ss:$16 sps:$4 sm:$0xff]   ;;  %v5397_v32 = vld [vmem:[%s6930_s9 + $0xc0] ss:$16 sps:$4 sm:$0xff]   ;;  %v5437_v10 = vld [vmem:[%s6923_s12 + $0x48] ss:$16 sps:$4 sm:$0xff]  }
  0xe1   : > { %v5368_v31 = vld [vmem:[%s6923_s12 + $0x124] ss:$16 sps:$4 sm:$0xff]   ;;  %v5372_v34 = vld [vmem:[%s6923_s12 + $0x120] ss:$16 sps:$4 sm:$0xff]   ;;  %v5464_v18 = vld [vmem:[%s6923_s12 + $0xa8] ss:$16 sps:$4 sm:$0xff]  }
  0xe2   : > { %v6976_v33 = vld [vmem:[%s6915_s6 + $0x4] ss:$8 sps:$4 sm:$0xff]   ;;  %v5403_v37 = vld [vmem:[%s6930_s9 + $0xe0] ss:$16 sps:$4 sm:$0xff]   ;;  %v7013_v0 = vld [vmem:[%s6915_s6 + $0x14] ss:$8 sps:$4 sm:$0xff]  }
  0xe3   : > { %941 = vmatpush1.bf16.msra.mxu1 %v5349_v13  ;;  %1709 = vmatpush1.bf16.msra.mxu0 %v5379_v21  ;;  %v5400_v35 = vld [vmem:[%s6930_s9 + $0xe4] ss:$16 sps:$4 sm:$0xff]   ;;  %v5378_v38 = vld [vmem:[%s6923_s12 + $0x140] ss:$16 sps:$4 sm:$0xff]   ;;  %v5460_v13 = vld [vmem:[%s6923_s12 + $0x8c] ss:$16 sps:$4 sm:$0xff]  }
  0xe4   : > { %942 = vmatprep.subr.bf16.mxu1 %v5350_v14  ;;  %1710 = vmatprep.subr.bf16.mxu0 %v5382_v22  ;;  %v5374_v36 = vld [vmem:[%s6923_s12 + $0x144] ss:$16 sps:$4 sm:$0xff]   ;;  %v5409_v41 = vld [vmem:[%s6930_s9 + $0x100] ss:$16 sps:$4 sm:$0xff]   ;;  %v5470_v22 = vld [vmem:[%s6923_s12 + $0xc8] ss:$16 sps:$4 sm:$0xff]  }
  0xe5   : > { %964 = vmatprep.mubr.bf16.mxu1 %v6976_v33  ;;  %1734 = vmatprep.mubr.bf16.mxu0 %v6976_v33  ;;  %v5406_v39 = vld [vmem:[%s6930_s9 + $0x104] ss:$16 sps:$4 sm:$0xff]   ;;  %v5384_v42 = vld [vmem:[%s6923_s12 + $0x160] ss:$16 sps:$4 sm:$0xff]  }
  0xe6   : > { %v5380_v40 = vld [vmem:[%s6923_s12 + $0x164] ss:$16 sps:$4 sm:$0xff]   ;;  %v5418_v45 = vld [vmem:[%s6930_s9 + $0x120] ss:$16 sps:$4 sm:$0xff]  }
  0xe7   : > { %943 = vmatpush1.bf16.msra.mxu1 %v5352_v17  ;;  %1711 = vmatpush1.bf16.msra.mxu0 %v5385_v24  ;;  %v5416_v43 = vld [vmem:[%s6930_s9 + $0x124] ss:$16 sps:$4 sm:$0xff]   ;;  %v5390_v46 = vld [vmem:[%s6923_s12 + $0x180] ss:$16 sps:$4 sm:$0xff]   ;;  %v5466_v17 = vld [vmem:[%s6923_s12 + $0xac] ss:$16 sps:$4 sm:$0xff]  }
  0xe8   : > { %944 = vmatprep.subr.bf16.mxu1 %v5353_v19  ;;  %1712 = vmatprep.subr.bf16.mxu0 %v5388_v26  ;;  %v5386_v44 = vld [vmem:[%s6923_s12 + $0x184] ss:$16 sps:$4 sm:$0xff]   ;;  %v5421_v49 = vld [vmem:[%s6930_s9 + $0x140] ss:$16 sps:$4 sm:$0xff]   ;;  %v5472_v19 = vld [vmem:[%s6923_s12 + $0xcc] ss:$16 sps:$4 sm:$0xff]  }
  0xe9   : > { %v5419_v47 = vld [vmem:[%s6930_s9 + $0x144] ss:$16 sps:$4 sm:$0xff]   ;;  %v5396_v50 = vld [vmem:[%s6923_s12 + $0x1a0] ss:$16 sps:$4 sm:$0xff]   ;;  %v5476_v24 = vld [vmem:[%s6923_s12 + $0xe8] ss:$16 sps:$4 sm:$0xff]  }
  0xea   : > { %v5392_v48 = vld [vmem:[%s6923_s12 + $0x1a4] ss:$16 sps:$4 sm:$0xff]   ;;  %v5430_v53 = vld [vmem:[%s6930_s9 + $0x160] ss:$16 sps:$4 sm:$0xff]  }
  0xeb   : > { %945 = vmatpush1.bf16.msra.mxu1 %v5355_v20  ;;  %1713 = vmatpush1.bf16.msra.mxu0 %v5391_v29  ;;  %v5428_v51 = vld [vmem:[%s6930_s9 + $0x164] ss:$16 sps:$4 sm:$0xff]   ;;  %v5402_v54 = vld [vmem:[%s6923_s12 + $0x1c0] ss:$16 sps:$4 sm:$0xff]   ;;  %v5490_v29 = vld [vmem:[%s6923_s12 + $0x12c] ss:$16 sps:$4 sm:$0xff]  }
  0xec   : > { %946 = vmatprep.subr.bf16.mxu1 %v5356_v23  ;;  %1714 = vmatprep.subr.bf16.mxu0 %v5394_v30  ;;  %v5398_v52 = vld [vmem:[%s6923_s12 + $0x1c4] ss:$16 sps:$4 sm:$0xff]   ;;  %v5433_v57 = vld [vmem:[%s6930_s9 + $0x180] ss:$16 sps:$4 sm:$0xff]   ;;  %v5478_v23 = vld [vmem:[%s6923_s12 + $0xec] ss:$16 sps:$4 sm:$0xff]  }
  0xed   : > { %v5431_v55 = vld [vmem:[%s6930_s9 + $0x184] ss:$16 sps:$4 sm:$0xff]   ;;  %v5408_v58 = vld [vmem:[%s6923_s12 + $0x1e0] ss:$16 sps:$4 sm:$0xff]   ;;  %v5488_v30 = vld [vmem:[%s6923_s12 + $0x128] ss:$16 sps:$4 sm:$0xff]  }
  0xee   : > { %v5404_v56 = vld [vmem:[%s6923_s12 + $0x1e4] ss:$16 sps:$4 sm:$0xff]   ;;  %v7008_v61 = vld [vmem:[%s6915_s6] ss:$8 sps:$4 sm:$0xff]   ;;  %v7024_v7 = vld [vmem:[%s6915_s6 + $0x10] ss:$8 sps:$4 sm:$0xff]  }
  0xef   : > { %947 = vmatpush1.bf16.msra.mxu1 %v5360_v25  ;;  %1715 = vmatpush1.bf16.msra.mxu0 %v5397_v32  ;;  %v5440_v59 = vld [vmem:[%s6930_s9 + $0x1a4] ss:$16 sps:$4 sm:$0xff]   ;;  %v5442_v63 = vld [vmem:[%s6930_s9 + $0x1a0] ss:$16 sps:$4 sm:$0xff]   ;;  %v5484_v25 = vld [vmem:[%s6923_s12 + $0x10c] ss:$16 sps:$4 sm:$0xff]  }
  0xf0   : > { %948 = vmatprep.subr.bf16.mxu1 %v5362_v27  ;;  %1716 = vmatprep.subr.bf16.mxu0 %v5400_v35  ;;  %v5443_v2 = vld [vmem:[%s6930_s9 + $0x1c4] ss:$16 sps:$4 sm:$0xff]   ;;  %v5445_v3 = vld [vmem:[%s6930_s9 + $0x1c0] ss:$16 sps:$4 sm:$0xff]   ;;  %v5494_v35 = vld [vmem:[%s6923_s12 + $0x148] ss:$16 sps:$4 sm:$0xff]  }
  0xf1   : > { %v5452_v5 = vld [vmem:[%s6930_s9 + $0x1e4] ss:$16 sps:$4 sm:$0xff]   ;;  %v5454_v8 = vld [vmem:[%s6930_s9 + $0x1e0] ss:$16 sps:$4 sm:$0xff]  }
  0xf2   : > { %v7028_v9 = vld [vmem:[%s6915_s6 + $0x24] ss:$8 sps:$4 sm:$0xff]   ;;  %v7038_v14 = vld [vmem:[%s6915_s6 + $0x20] ss:$8 sps:$4 sm:$0xff]   ;;  %v7042_v15 = vld [vmem:[%s6915_s6 + $0x34] ss:$8 sps:$4 sm:$0xff]  }
  0xf3   : > { %949 = vmatpush1.bf16.msra.mxu1 %v5366_v28  ;;  %1717 = vmatpush1.bf16.msra.mxu0 %v5403_v37  ;;  %v7052_v20 = vld [vmem:[%s6915_s6 + $0x30] ss:$8 sps:$4 sm:$0xff]   ;;  %v7056_v21 = vld [vmem:[%s6915_s6 + $0x44] ss:$8 sps:$4 sm:$0xff]   ;;  %v7065_v26 = vld [vmem:[%s6915_s6 + $0x40] ss:$8 sps:$4 sm:$0xff]  }
  0xf4   : > { %950 = vmatprep.subr.bf16.mxu1 %v5368_v31  ;;  %1718 = vmatprep.subr.bf16.mxu0 %v5406_v39  ;;  %v7068_v27 = vld [vmem:[%s6915_s6 + $0x54] ss:$8 sps:$4 sm:$0xff]   ;;  %v5482_v28 = vld [vmem:[%s6923_s12 + $0x108] ss:$16 sps:$4 sm:$0xff]  }
  0xf5   : > { %v5496_v31 = vld [vmem:[%s6923_s12 + $0x14c] ss:$16 sps:$4 sm:$0xff]   ;;  %v7079_v32 = vld [vmem:[%s6915_s6 + $0x50] ss:$8 sps:$4 sm:$0xff]   ;;  %v7093_v39 = vld [vmem:[%s6915_s6 + $0x60] ss:$8 sps:$4 sm:$0xff]  }
  0xf6   : > { %v5500_v37 = vld [vmem:[%s6923_s12 + $0x168] ss:$16 sps:$4 sm:$0xff]  }
  0xf7   : > { %951 = vmatpush1.bf16.msra.mxu1 %v5372_v34  ;;  %1719 = vmatpush1.bf16.msra.mxu0 %v5409_v41  ;;  %v7082_v34 = vld [vmem:[%s6915_s6 + $0x64] ss:$8 sps:$4 sm:$0xff]   ;;  %v5506_v41 = vld [vmem:[%s6923_s12 + $0x188] ss:$16 sps:$4 sm:$0xff]  }
  0xf8   : > { %952 = vmatprep.subr.bf16.mxu1 %v5374_v36  ;;  %1720 = vmatprep.subr.bf16.mxu0 %v5416_v43  ;;  %v5502_v36 = vld [vmem:[%s6923_s12 + $0x16c] ss:$16 sps:$4 sm:$0xff]   ;;  %v5512_v43 = vld [vmem:[%s6923_s12 + $0x1a8] ss:$16 sps:$4 sm:$0xff]  }
  0xfb   : > { %953 = vmatpush1.bf16.msra.mxu1 %v5378_v38  ;;  %1721 = vmatpush1.bf16.msra.mxu0 %v5418_v45  ;;  %v5508_v38 = vld [vmem:[%s6923_s12 + $0x18c] ss:$16 sps:$4 sm:$0xff]   ;;  %v7107_v45 = vld [vmem:[%s6915_s6 + $0x70] ss:$8 sps:$4 sm:$0xff]  }
  0xfc   : > { %954 = vmatprep.subr.bf16.mxu1 %v5380_v40  ;;  %1722 = vmatprep.subr.bf16.mxu0 %v5419_v47  ;;  %v7096_v40 = vld [vmem:[%s6915_s6 + $0x74] ss:$8 sps:$4 sm:$0xff]   ;;  %v5518_v47 = vld [vmem:[%s6923_s12 + $0x1c8] ss:$16 sps:$4 sm:$0xff]  }
  0xff   : > { %955 = vmatpush1.bf16.msra.mxu1 %v5384_v42  ;;  %1723 = vmatpush1.bf16.msra.mxu0 %v5421_v49  ;;  %v5514_v42 = vld [vmem:[%s6923_s12 + $0x1ac] ss:$16 sps:$4 sm:$0xff]  }
 0x100   : > { %956 = vmatprep.subr.bf16.mxu1 %v5386_v44  ;;  %1724 = vmatprep.subr.bf16.mxu0 %v5428_v51  ;;  %v5520_v44 = vld [vmem:[%s6923_s12 + $0x1cc] ss:$16 sps:$4 sm:$0xff]   ;;  %v5524_v51 = vld [vmem:[%s6923_s12 + $0x1e8] ss:$16 sps:$4 sm:$0xff]  }
 0x101   : > { %v5553_v49 = vld [vmem:[%s6936_s14 + $0x4] ss:$8 sps:$4 sm:$0xff]  }
 0x103   : > { %957 = vmatpush1.bf16.msra.mxu1 %v5390_v46  ;;  %1725 = vmatpush1.bf16.msra.mxu0 %v5430_v53  ;;  %v7110_v46 = vld [vmem:[%s6915_s6 + $0x84] ss:$8 sps:$4 sm:$0xff]  }
 0x104   : > { %958 = vmatprep.subr.bf16.mxu1 %v5392_v48  ;;  %1726 = vmatprep.subr.bf16.mxu0 %v5431_v55  ;;  %v5526_v48 = vld [vmem:[%s6923_s12 + $0x1ec] ss:$16 sps:$4 sm:$0xff]   ;;  %v7126_v55 = vld [vmem:[%s6915_s6 + $0x80] ss:$8 sps:$4 sm:$0xff]  }
 0x105   : > { %v5529_v53 = vld [vmem:[%s6930_s9 + $0xc] ss:$16 sps:$4 sm:$0xff]  }
 0x107   : > { %959 = vmatpush1.bf16.msra.mxu1 %v5396_v50  ;;  %1727 = vmatpush1.bf16.msra.mxu0 %v5433_v57  ;;  %v5551_v50 = vld [vmem:[%s6936_s14] ss:$8 sps:$4 sm:$0xff]   ;;  %v5562_v57 = vld [vmem:[%s6936_s14 + $0x24] ss:$8 sps:$4 sm:$0xff]  }
 0x108   : > { %960 = vmatprep.subr.bf16.mxu1 %v5398_v52  ;;  %1728 = vmatprep.subr.bf16.mxu0 %v5440_v59  ;;  %v5556_v52 = vld [vmem:[%s6936_s14 + $0x14] ss:$8 sps:$4 sm:$0xff]  }
 0x109   : > { %v5565_v59 = vld [vmem:[%s6936_s14 + $0x34] ss:$8 sps:$4 sm:$0xff]  }
 0x10b   : > { %961 = vmatpush1.bf16.msra.mxu1 %v5402_v54  ;;  %1729 = vmatpush1.bf16.msra.mxu0 %v5442_v63  ;;  %v5554_v54 = vld [vmem:[%s6936_s14 + $0x10] ss:$8 sps:$4 sm:$0xff]   ;;  %v7144_v63 = vld [vmem:[%s6915_s6 + $0xa4] ss:$8 sps:$4 sm:$0xff]  }
 0x10c   : > { %962 = vmatprep.subr.bf16.mxu1 %v5404_v56  ;;  %1730 = vmatprep.subr.bf16.mxu0 %v5443_v2  ;;  %v7130_v56 = vld [vmem:[%s6915_s6 + $0x94] ss:$8 sps:$4 sm:$0xff]   ;;  %v5569_v2 = vld [vmem:[%s6936_s14 + $0x40] ss:$8 sps:$4 sm:$0xff]  }
 0x10f   : > { %963 = vmatpush1.bf16.msra.mxu1 %v5408_v58  ;;  %1731 = vmatpush1.bf16.msra.mxu0 %v5445_v3  ;;  %v5560_v58 = vld [vmem:[%s6936_s14 + $0x20] ss:$8 sps:$4 sm:$0xff]   ;;  %v5574_v3 = vld [vmem:[%s6936_s14 + $0x54] ss:$8 sps:$4 sm:$0xff]  }
 0x110   : > { %1125 = vmatprep.subr.bf16.mxu1 %v5415_v60  ;;  %1732 = vmatprep.subr.bf16.mxu0 %v5452_v5  ;;  %v5563_v60 = vld [vmem:[%s6936_s14 + $0x30] ss:$8 sps:$4 sm:$0xff]   ;;  %v7154_v5 = vld [vmem:[%s6915_s6 + $0xa0] ss:$8 sps:$4 sm:$0xff]  }
 0x112   : > { %965 = vmatmul.mubr.bf16.vlgmr.msra.gmra.mrb[0].mxu1 %v7008_v61 }
 0x113   : > { %1126 = vmatpush1.bf16.msra.mxu1 %v5413_v62  ;;  %974 = vmatprep.mubr.bf16.mxu1 %v7013_v0  ;;  %v7140_v62 = vld [vmem:[%s6915_s6 + $0x90] ss:$8 sps:$4 sm:$0xff]  }
 0x114   : > { %1127 = vmatprep.subr.bf16.mxu1 %v5427_v1  ;;  %1733 = vmatpush1.bf16.msra.mxu0 %v5454_v8  ;;  %v5571_v1 = vld [vmem:[%s6936_s14 + $0x44] ss:$8 sps:$4 sm:$0xff]  }
 0x115   : > { %3560 = vmatprep.subr.bf16.mxu0 %v5553_v49  ;;  %v5580_v8 = vld [vmem:[%s6936_s14 + $0x64] ss:$8 sps:$4 sm:$0xff]   ;;  %v5619_v49 = vld [vmem:[%s6936_s14 + $0xf4] ss:$8 sps:$4 sm:$0xff]  }
 0x117   : > { %1128 = vmatpush1.bf16.msra.mxu1 %v5425_v4  ;;  %1735 = vmatmul.mubr.bf16.vlgmr.msra.gmra.mrb[0].mxu0 %v7008_v61  ;;  %v5572_v4 = vld [vmem:[%s6936_s14 + $0x50] ss:$8 sps:$4 sm:$0xff]  }
 0x118   : > { %1129 = vmatprep.subr.bf16.mxu1 %v5439_v6  ;;  %1744 = vmatprep.mubr.bf16.mxu0 %v7013_v0  ;;  %v7158_v6 = vld [vmem:[%s6915_s6 + $0xb4] ss:$8 sps:$4 sm:$0xff]  }
 0x119   : > { %3561 = vmatpush1.bf16.msra.mxu0 %v5551_v50  ;;  %v5617_v50 = vld [vmem:[%s6936_s14 + $0xf0] ss:$8 sps:$4 sm:$0xff]  }
 0x11a   : > { %975 = vmatmul.mubr.bf16.gmra.mrb[4].mxu1 %v7024_v7  ;;  %3562 = vmatprep.subr.bf16.mxu0 %v5556_v52  ;;  %v5532_v52 = vld [vmem:[%s6930_s9 + $0x2c] ss:$16 sps:$4 sm:$0xff]  }
 0x11b   : > { %984 = vmatprep.mubr.bf16.mxu1 %v7028_v9  ;;  %1130 = vmatpush1.bf16.msra.mxu1 %v5437_v10  ;;  %v5578_v10 = vld [vmem:[%s6936_s14 + $0x60] ss:$8 sps:$4 sm:$0xff]  }
 0x11c   : > { %1131 = vmatprep.subr.bf16.mxu1 %v5451_v11  ;;  %v5583_v11 = vld [vmem:[%s6936_s14 + $0x74] ss:$8 sps:$4 sm:$0xff]  }
 0x11d   : > { %3563 = vmatpush1.bf16.msra.mxu0 %v5554_v54  ;;  %v5535_v54 = vld [vmem:[%s6930_s9 + $0x4c] ss:$16 sps:$4 sm:$0xff]  }
 0x11e   : > { %3564 = vmatprep.subr.bf16.mxu0 %v5562_v57  ;;  %v5538_v57 = vld [vmem:[%s6930_s9 + $0x6c] ss:$16 sps:$4 sm:$0xff]  }
 0x11f   : > { %1132 = vmatpush1.bf16.msra.mxu1 %v5449_v12  ;;  %1745 = vmatmul.mubr.bf16.gmra.mrb[4].mxu0 %v7024_v7  ;;  %v5581_v12 = vld [vmem:[%s6936_s14 + $0x70] ss:$8 sps:$4 sm:$0xff]  }
 0x120   : > { %1133 = vmatprep.subr.bf16.mxu1 %v5460_v13  ;;  %1754 = vmatprep.mubr.bf16.mxu0 %v7028_v9  ;;  %v7168_v13 = vld [vmem:[%s6915_s6 + $0xb0] ss:$8 sps:$4 sm:$0xff]  }
 0x121   : > { %3565 = vmatpush1.bf16.msra.mxu0 %v5560_v58  ;;  %v5539_v58 = vld [vmem:[%s6930_s9 + $0x88] ss:$16 sps:$4 sm:$0xff]  }
 0x122   : > { %985 = vmatmul.mubr.bf16.gmra.mrb[8].mxu1 %v7038_v14  ;;  %3566 = vmatprep.subr.bf16.mxu0 %v5565_v59  ;;  %v5544_v59 = vld [vmem:[%s6930_s9 + $0xac] ss:$16 sps:$4 sm:$0xff]  }
 0x123   : > { %994 = vmatprep.mubr.bf16.mxu1 %v7042_v15  ;;  %1134 = vmatpush1.bf16.msra.mxu1 %v5458_v16  ;;  %v7172_v16 = vld [vmem:[%s6915_s6 + $0xc4] ss:$8 sps:$4 sm:$0xff]  }
 0x124   : > { %1135 = vmatprep.subr.bf16.mxu1 %v5466_v17  ;;  %v5589_v17 = vld [vmem:[%s6936_s14 + $0x84] ss:$8 sps:$4 sm:$0xff]  }
 0x125   : > { %3567 = vmatpush1.bf16.msra.mxu0 %v5563_v60  ;;  %v5545_v60 = vld [vmem:[%s6930_s9 + $0xc8] ss:$16 sps:$4 sm:$0xff]  }
 0x126   : > { %3568 = vmatprep.subr.bf16.mxu0 %v5571_v1  ;;  %v5550_v1 = vld [vmem:[%s6930_s9 + $0xec] ss:$16 sps:$4 sm:$0xff]  }
 0x127   : > { %1136 = vmatpush1.bf16.msra.mxu1 %v5464_v18  ;;  %1755 = vmatmul.mubr.bf16.gmra.mrb[8].mxu0 %v7038_v14  ;;  %v5587_v18 = vld [vmem:[%s6936_s14 + $0x80] ss:$8 sps:$4 sm:$0xff]  }
 0x128   : > { %1137 = vmatprep.subr.bf16.mxu1 %v5472_v19  ;;  %1764 = vmatprep.mubr.bf16.mxu0 %v7042_v15  ;;  %v5592_v19 = vld [vmem:[%s6936_s14 + $0x94] ss:$8 sps:$4 sm:$0xff]  }
 0x129   : > { %3569 = vmatpush1.bf16.msra.mxu0 %v5569_v2  ;;  %v5557_v2 = vld [vmem:[%s6930_s9 + $0x108] ss:$16 sps:$4 sm:$0xff]  }
 0x12a   : > { %995 = vmatmul.mubr.bf16.gmra.mrb[12].mxu1 %v7052_v20  ;;  %3570 = vmatprep.subr.bf16.mxu0 %v5574_v3  ;;  %v5568_v3 = vld [vmem:[%s6930_s9 + $0x12c] ss:$16 sps:$4 sm:$0xff]  }
 0x12b   : > { %1004 = vmatprep.mubr.bf16.mxu1 %v7056_v21  ;;  %1138 = vmatpush1.bf16.msra.mxu1 %v5470_v22  ;;  %v5590_v22 = vld [vmem:[%s6936_s14 + $0x90] ss:$8 sps:$4 sm:$0xff]  }
 0x12c   : > { %1139 = vmatprep.subr.bf16.mxu1 %v5478_v23  ;;  %v7182_v23 = vld [vmem:[%s6915_s6 + $0xc0] ss:$8 sps:$4 sm:$0xff]  }
 0x12d   : > { %3571 = vmatpush1.bf16.msra.mxu0 %v5572_v4  ;;  %v5575_v4 = vld [vmem:[%s6930_s9 + $0x148] ss:$16 sps:$4 sm:$0xff]  }
 0x12e   : > { %3572 = vmatprep.subr.bf16.mxu0 %v5580_v8  ;;  %v5586_v8 = vld [vmem:[%s6930_s9 + $0x16c] ss:$16 sps:$4 sm:$0xff]  }
 0x12f   : > { %1140 = vmatpush1.bf16.msra.mxu1 %v5476_v24  ;;  %1765 = vmatmul.mubr.bf16.gmra.mrb[12].mxu0 %v7052_v20  ;;  %v7186_v24 = vld [vmem:[%s6915_s6 + $0xd4] ss:$8 sps:$4 sm:$0xff]  }
 0x130   : > { %1141 = vmatprep.subr.bf16.mxu1 %v5484_v25  ;;  %1774 = vmatprep.mubr.bf16.mxu0 %v7056_v21  ;;  %v5598_v25 = vld [vmem:[%s6936_s14 + $0xa4] ss:$8 sps:$4 sm:$0xff]  }
 0x131   : > { %3573 = vmatpush1.bf16.msra.mxu0 %v5578_v10  ;;  %v5593_v10 = vld [vmem:[%s6930_s9 + $0x188] ss:$16 sps:$4 sm:$0xff]  }
 0x132   : > { %1005 = vmatmul.mubr.bf16.gmra.mrb[16].mxu1 %v7065_v26  ;;  %3574 = vmatprep.subr.bf16.mxu0 %v5583_v11  ;;  %v5604_v11 = vld [vmem:[%s6930_s9 + $0x1ac] ss:$16 sps:$4 sm:$0xff]  }
 0x133   : > { %1014 = vmatprep.mubr.bf16.mxu1 %v7068_v27  ;;  %1142 = vmatpush1.bf16.msra.mxu1 %v5482_v28  ;;  %v5596_v28 = vld [vmem:[%s6936_s14 + $0xa0] ss:$8 sps:$4 sm:$0xff]  }
 0x134   : > { %1143 = vmatprep.subr.bf16.mxu1 %v5490_v29  ;;  %v5601_v29 = vld [vmem:[%s6936_s14 + $0xb4] ss:$8 sps:$4 sm:$0xff]  }
 0x135   : > { %3575 = vmatpush1.bf16.msra.mxu0 %v5581_v12  ;;  %v5602_v12 = vld [vmem:[%s6930_s9 + $0x1a8] ss:$16 sps:$4 sm:$0xff]  }
 0x136   : > { %3576 = vmatprep.subr.bf16.mxu0 %v5589_v17  ;;  %v5622_v17 = vld [vmem:[%s6930_s9 + $0x1ec] ss:$16 sps:$4 sm:$0xff]  }
 0x137   : > { %1144 = vmatpush1.bf16.msra.mxu1 %v5488_v30  ;;  %1775 = vmatmul.mubr.bf16.gmra.mrb[16].mxu0 %v7065_v26  ;;  %v7195_v30 = vld [vmem:[%s6915_s6 + $0xd0] ss:$8 sps:$4 sm:$0xff]  }
 0x138   : > { %1145 = vmatprep.subr.bf16.mxu1 %v5496_v31  ;;  %1784 = vmatprep.mubr.bf16.mxu0 %v7068_v27  ;;  %v5599_v31 = vld [vmem:[%s6936_s14 + $0xb0] ss:$8 sps:$4 sm:$0xff]  }
 0x139   : > { %3577 = vmatpush1.bf16.msra.mxu0 %v5587_v18  ;;  %v5620_v18 = vld [vmem:[%s6930_s9 + $0x1e8] ss:$16 sps:$4 sm:$0xff]  }
 0x13a   : > { %1015 = vmatmul.mubr.bf16.gmra.mrb[20].mxu1 %v7079_v32  ;;  %3578 = vmatprep.subr.bf16.mxu0 %v5592_v19 }
 0x13b   : > { %1024 = vmatprep.mubr.bf16.mxu1 %v7082_v34  ;;  %1146 = vmatpush1.bf16.msra.mxu1 %v5494_v35  ;;  %v7200_v35 = vld [vmem:[%s6915_s6 + $0xe4] ss:$8 sps:$4 sm:$0xff]  }
 0x13c   : > { %1147 = vmatprep.subr.bf16.mxu1 %v5502_v36  ;;  %v5607_v36 = vld [vmem:[%s6936_s14 + $0xc4] ss:$8 sps:$4 sm:$0xff]  }
 0x13d   : > { %3579 = vmatpush1.bf16.msra.mxu0 %v5590_v22 }
 0x13e   : > { %3580 = vmatprep.subr.bf16.mxu0 %v5598_v25 }
 0x13f   : > { %1148 = vmatpush1.bf16.msra.mxu1 %v5500_v37  ;;  %1785 = vmatmul.mubr.bf16.gmra.mrb[20].mxu0 %v7079_v32  ;;  %v5605_v37 = vld [vmem:[%s6936_s14 + $0xc0] ss:$8 sps:$4 sm:$0xff]  }
 0x140   : > { %1149 = vmatprep.subr.bf16.mxu1 %v5508_v38  ;;  %1794 = vmatprep.mubr.bf16.mxu0 %v7082_v34  ;;  %v5610_v38 = vld [vmem:[%s6936_s14 + $0xd4] ss:$8 sps:$4 sm:$0xff]  }
 0x141   : > { %3581 = vmatpush1.bf16.msra.mxu0 %v5596_v28 }
 0x142   : > { %1025 = vmatmul.mubr.bf16.gmra.mrb[24].mxu1 %v7093_v39  ;;  %3582 = vmatprep.subr.bf16.mxu0 %v5601_v29 }
 0x143   : > { %1034 = vmatprep.mubr.bf16.mxu1 %v7096_v40  ;;  %1150 = vmatpush1.bf16.msra.mxu1 %v5506_v41  ;;  %v7209_v41 = vld [vmem:[%s6915_s6 + $0xe0] ss:$8 sps:$4 sm:$0xff]  }
 0x144   : > { %1151 = vmatprep.subr.bf16.mxu1 %v5514_v42  ;;  %v5608_v42 = vld [vmem:[%s6936_s14 + $0xd0] ss:$8 sps:$4 sm:$0xff]  }
 0x145   : > { %3583 = vmatpush1.bf16.msra.mxu0 %v5599_v31 }
 0x146   : > { %3584 = vmatprep.subr.bf16.mxu0 %v5607_v36 }
 0x147   : > { %1152 = vmatpush1.bf16.msra.mxu1 %v5512_v43  ;;  %1795 = vmatmul.mubr.bf16.gmra.mrb[24].mxu0 %v7093_v39  ;;  %v7214_v43 = vld [vmem:[%s6915_s6 + $0xf4] ss:$8 sps:$4 sm:$0xff]  }
 0x148   : > { %1153 = vmatprep.subr.bf16.mxu1 %v5520_v44  ;;  %1804 = vmatprep.mubr.bf16.mxu0 %v7096_v40  ;;  %v5616_v44 = vld [vmem:[%s6936_s14 + $0xe4] ss:$8 sps:$4 sm:$0xff]  }
 0x149   : > { %3585 = vmatpush1.bf16.msra.mxu0 %v5605_v37 }
 0x14a   : > { %1035 = vmatmul.mubr.bf16.gmra.mrb[28].mxu1 %v7107_v45  ;;  %3586 = vmatprep.subr.bf16.mxu0 %v5610_v38 }
 0x14b   : > { %1044 = vmatprep.mubr.bf16.mxu1 %v7110_v46  ;;  %1154 = vmatpush1.bf16.msra.mxu1 %v5518_v47  ;;  %v5614_v47 = vld [vmem:[%s6936_s14 + $0xe0] ss:$8 sps:$4 sm:$0xff]  }
 0x14c   : > { %1155 = vmatprep.subr.bf16.mxu1 %v5526_v48  ;;  %v7222_v48 = vld [vmem:[%s6915_s6 + $0xf0] ss:$8 sps:$4 sm:$0xff]  }
 0x14d   : > { %3587 = vmatpush1.bf16.msra.mxu0 %v5608_v42 }
 0x14e   : > { %3588 = vmatprep.subr.bf16.mxu0 %v5616_v44 }
 0x14f   : > { %1156 = vmatpush1.bf16.msra.mxu1 %v5524_v51  ;;  %1805 = vmatmul.mubr.bf16.gmra.mrb[28].mxu0 %v7107_v45  ;;  %v5527_v51 = vld [vmem:[%s6930_s9 + $0x8] ss:$16 sps:$4 sm:$0xff]  }
 0x150   : > { %1895 = vmatprep.subr.bf16.mxu1 %v5529_v53  ;;  %1814 = vmatprep.mubr.bf16.mxu0 %v7110_v46  ;;  %v5530_v53 = vld [vmem:[%s6930_s9 + $0x28] ss:$16 sps:$4 sm:$0xff]  }
 0x151   : > { %3589 = vmatpush1.bf16.msra.mxu0 %v5614_v47 }
 0x152   : > { %1045 = vmatmul.mubr.bf16.gmra.mrb[32].mxu1 %v7126_v55  ;;  %3590 = vmatprep.subr.bf16.mxu0 %v5619_v49 }
 0x153   : > { %1054 = vmatprep.mubr.bf16.mxu1 %v7130_v56 }
 0x155   : > { %3591 = vmatpush1.bf16.msra.mxu0 %v5617_v50 }
 0x157   : > { %1815 = vmatmul.mubr.bf16.gmra.mrb[32].mxu0 %v7126_v55 }
 0x158   : > { %1824 = vmatprep.mubr.bf16.mxu0 %v7130_v56 }
 0x15a   : > { %1055 = vmatmul.mubr.bf16.gmra.mrb[36].mxu1 %v7140_v62 }
 0x15b   : > { %1064 = vmatprep.mubr.bf16.mxu1 %v7144_v63 }
 0x15f   : > { %1825 = vmatmul.mubr.bf16.gmra.mrb[36].mxu0 %v7140_v62 }
 0x160   : > { %1834 = vmatprep.mubr.bf16.mxu0 %v7144_v63 }
 0x162   : > { %1065 = vmatmul.mubr.bf16.gmra.mrb[40].mxu1 %v7154_v5 }
 0x163   : > { %1074 = vmatprep.mubr.bf16.mxu1 %v7158_v6 }
 0x167   : > { %1835 = vmatmul.mubr.bf16.gmra.mrb[40].mxu0 %v7154_v5 }
 0x168   : > { %1844 = vmatprep.mubr.bf16.mxu0 %v7158_v6 }
 0x16a   : > { %1075 = vmatmul.mubr.bf16.gmra.mrb[44].mxu1 %v7168_v13 }
 0x16b   : > { %1084 = vmatprep.mubr.bf16.mxu1 %v7172_v16 }
 0x16f   : > { %1845 = vmatmul.mubr.bf16.gmra.mrb[44].mxu0 %v7168_v13 }
 0x170   : > { %1854 = vmatprep.mubr.bf16.mxu0 %v7172_v16 }
 0x172   : > { %1085 = vmatmul.mubr.bf16.gmra.mrb[48].mxu1 %v7182_v23 }
 0x173   : > { %1094 = vmatprep.mubr.bf16.mxu1 %v7186_v24 }
 0x177   : > { %1855 = vmatmul.mubr.bf16.gmra.mrb[48].mxu0 %v7182_v23 }
 0x178   : > { %1864 = vmatprep.mubr.bf16.mxu0 %v7186_v24 }
 0x17a   : > { %1095 = vmatmul.mubr.bf16.gmra.mrb[52].mxu1 %v7195_v30 }
 0x17b   : > { %1104 = vmatprep.mubr.bf16.mxu1 %v7200_v35 }
 0x17f   : > { %1865 = vmatmul.mubr.bf16.gmra.mrb[52].mxu0 %v7195_v30 }
 0x180   : > { %1874 = vmatprep.mubr.bf16.mxu0 %v7200_v35 }
 0x182   : > { %1105 = vmatmul.mubr.bf16.gmra.mrb[56].mxu1 %v7209_v41 }
 0x183   : > { %1114 = vmatprep.mubr.bf16.mxu1 %v7214_v43 }
 0x187   : > { %1875 = vmatmul.mubr.bf16.gmra.mrb[56].mxu0 %v7209_v41 }
 0x188   : > { %1884 = vmatprep.mubr.bf16.mxu0 %v7214_v43 }
 0x18a   : > { %1115 = vmatmul.mubr.bf16.gmra.mrb[60].mxu1 %v7222_v48 }
 0x18b   : > { %1157 = vmatprep.mubr.bf16.mxu1 %v6976_v33  ;;  %v5533_v33 = vld [vmem:[%s6930_s9 + $0x48] ss:$16 sps:$4 sm:$0xff]  }
 0x18f   : > { %1885 = vmatmul.mubr.bf16.gmra.mrb[60].mxu0 %v7222_v48 }
 0x192   : > { %1158 = vmatmul.mubr.bf16.vlgmr.msra.gmra.mrb[64].mxu1 %v7008_v61  ;;  %v5536_v61 = vld [vmem:[%s6930_s9 + $0x68] ss:$16 sps:$4 sm:$0xff]  }
 0x193   : > { %1896 = vmatpush1.bf16.msra.mxu1 %v5527_v51  ;;  %1167 = vmatprep.mubr.bf16.mxu1 %v7013_v0  ;;  %v5541_v0 = vld [vmem:[%s6930_s9 + $0x8c] ss:$16 sps:$4 sm:$0xff]  }
 0x194   : > { %1897 = vmatprep.subr.bf16.mxu1 %v5532_v52 }
 0x197   : > { %1898 = vmatpush1.bf16.msra.mxu1 %v5530_v53 }
 0x198   : > { %1899 = vmatprep.subr.bf16.mxu1 %v5535_v54 }
 0x19a   : > { %1168 = vmatmul.mubr.bf16.gmra.mrb[68].mxu1 %v7024_v7  ;;  %v5542_v7 = vld [vmem:[%s6930_s9 + $0xa8] ss:$16 sps:$4 sm:$0xff]  }
 0x19b   : > { %1177 = vmatprep.mubr.bf16.mxu1 %v7028_v9  ;;  %1900 = vmatpush1.bf16.msra.mxu1 %v5533_v33  ;;  %v5547_v9 = vld [vmem:[%s6930_s9 + $0xcc] ss:$16 sps:$4 sm:$0xff]  }
 0x19c   : > { %1901 = vmatprep.subr.bf16.mxu1 %v5538_v57 }
 0x19f   : > { %1902 = vmatpush1.bf16.msra.mxu1 %v5536_v61 }
 0x1a0   : > { %1903 = vmatprep.subr.bf16.mxu1 %v5541_v0 }
 0x1a2   : > { %1178 = vmatmul.mubr.bf16.gmra.mrb[72].mxu1 %v7038_v14  ;;  %v5548_v14 = vld [vmem:[%s6930_s9 + $0xe8] ss:$16 sps:$4 sm:$0xff]  }
 0x1a3   : > { %1187 = vmatprep.mubr.bf16.mxu1 %v7042_v15  ;;  %1904 = vmatpush1.bf16.msra.mxu1 %v5539_v58  ;;  %v5559_v15 = vld [vmem:[%s6930_s9 + $0x10c] ss:$16 sps:$4 sm:$0xff]  }
 0x1a4   : > { %1905 = vmatprep.subr.bf16.mxu1 %v5544_v59 }
 0x1a7   : > { %1906 = vmatpush1.bf16.msra.mxu1 %v5542_v7 }
 0x1a8   : > { %1907 = vmatprep.subr.bf16.mxu1 %v5547_v9 }
 0x1aa   : > { %1188 = vmatmul.mubr.bf16.gmra.mrb[76].mxu1 %v7052_v20  ;;  %v5566_v20 = vld [vmem:[%s6930_s9 + $0x128] ss:$16 sps:$4 sm:$0xff]  }
 0x1ab   : > { %1197 = vmatprep.mubr.bf16.mxu1 %v7056_v21  ;;  %1908 = vmatpush1.bf16.msra.mxu1 %v5545_v60  ;;  %v5577_v21 = vld [vmem:[%s6930_s9 + $0x14c] ss:$16 sps:$4 sm:$0xff]  }
 0x1ac   : > { %1909 = vmatprep.subr.bf16.mxu1 %v5550_v1 }
 0x1af   : > { %1910 = vmatpush1.bf16.msra.mxu1 %v5548_v14 }
 0x1b0   : > { %1911 = vmatprep.subr.bf16.mxu1 %v5559_v15 }
 0x1b2   : > { %1198 = vmatmul.mubr.bf16.gmra.mrb[80].mxu1 %v7065_v26  ;;  %v5584_v26 = vld [vmem:[%s6930_s9 + $0x168] ss:$16 sps:$4 sm:$0xff]  }
 0x1b3   : > { %1207 = vmatprep.mubr.bf16.mxu1 %v7068_v27  ;;  %1912 = vmatpush1.bf16.msra.mxu1 %v5557_v2  ;;  %v5595_v27 = vld [vmem:[%s6930_s9 + $0x18c] ss:$16 sps:$4 sm:$0xff]  }
 0x1b4   : > { %1913 = vmatprep.subr.bf16.mxu1 %v5568_v3 }
 0x1b7   : > { %1914 = vmatpush1.bf16.msra.mxu1 %v5566_v20 }
 0x1b8   : > { %1915 = vmatprep.subr.bf16.mxu1 %v5577_v21 }
 0x1ba   : > { %1208 = vmatmul.mubr.bf16.gmra.mrb[84].mxu1 %v7079_v32  ;;  %v5613_v32 = vld [vmem:[%s6930_s9 + $0x1cc] ss:$16 sps:$4 sm:$0xff]  }
 0x1bb   : > { %1217 = vmatprep.mubr.bf16.mxu1 %v7082_v34  ;;  %1916 = vmatpush1.bf16.msra.mxu1 %v5575_v4  ;;  %v5611_v34 = vld [vmem:[%s6930_s9 + $0x1c8] ss:$16 sps:$4 sm:$0xff]  }
 0x1bc   : > { %1917 = vmatprep.subr.bf16.mxu1 %v5586_v8 }
 0x1bf   : > { %1918 = vmatpush1.bf16.msra.mxu1 %v5584_v26 }
 0x1c0   : > { %1919 = vmatprep.subr.bf16.mxu1 %v5595_v27 }
 0x1c2   : > { %1218 = vmatmul.mubr.bf16.gmra.mrb[88].mxu1 %v7093_v39 }
 0x1c3   : > { %1227 = vmatprep.mubr.bf16.mxu1 %v7096_v40  ;;  %1920 = vmatpush1.bf16.msra.mxu1 %v5593_v10 }
 0x1c4   : > { %1921 = vmatprep.subr.bf16.mxu1 %v5604_v11 }
 0x1c7   : > { %1922 = vmatpush1.bf16.msra.mxu1 %v5602_v12 }
 0x1c8   : > { %1923 = vmatprep.subr.bf16.mxu1 %v5613_v32 }
 0x1ca   : > { %1228 = vmatmul.mubr.bf16.gmra.mrb[92].mxu1 %v7107_v45 }
 0x1cb   : > { %1237 = vmatprep.mubr.bf16.mxu1 %v7110_v46  ;;  %1924 = vmatpush1.bf16.msra.mxu1 %v5611_v34 }
 0x1cc   : > { %1925 = vmatprep.subr.bf16.mxu1 %v5622_v17 }
 0x1cf   : > { %1926 = vmatpush1.bf16.msra.mxu1 %v5620_v18 }
 0x1d2   : > { %1238 = vmatmul.mubr.bf16.gmra.mrb[96].mxu1 %v7126_v55 }
 0x1d3   : > { %1247 = vmatprep.mubr.bf16.mxu1 %v7130_v56 }
 0x1da   : > { %1248 = vmatmul.mubr.bf16.gmra.mrb[100].mxu1 %v7140_v62 }
 0x1db   : > { %1257 = vmatprep.mubr.bf16.mxu1 %v7144_v63 }
 0x1e2   : > { %1258 = vmatmul.mubr.bf16.gmra.mrb[104].mxu1 %v7154_v5 }
 0x1e3   : > { %1267 = vmatprep.mubr.bf16.mxu1 %v7158_v6 }
 0x1e5   : > { %v7285_v39 = vpop.f32.mrb[0].mxu1 }
 0x1e6   : > { %v4851_v40 = vmul.f32 -1.442695, %v7285_v39  ;;  %v7288_v45 = vpop.f32.mrb[1].mxu1 }
 0x1e7   : > { %v4852_v46 = vmul.f32 -1.442695, %v7288_v45  ;;  %v7291_v19 = vpop.f32.mrb[2].mxu1 }
 0x1e8   : > { %5671 = vpow2.f32 %v4851_v40  ;;  %v4855_v55 = vmul.f32 -1.442695, %v7291_v19  ;;  %v7294_v56 = vpop.f32.mrb[3].mxu1 }
 0x1e9   : > { %5673 = vpow2.f32 %v4852_v46  ;;  %v4856_v62 = vmul.f32 -1.442695, %v7294_v56 }
 0x1ea   : > { %5675 = vpow2.f32 %v4855_v55  ;;  %1268 = vmatmul.mubr.bf16.gmra.mrb[108].mxu1 %v7168_v13  ;;  %v7310_v31 = vpop.f32.mrb[0].mxu0 }
 0x1eb   : > { %5677 = vpow2.f32 %v4856_v62  ;;  %1277 = vmatprep.mubr.bf16.mxu1 %v7172_v16  ;;  %v7313_v16 = vpop.f32.mrb[1].mxu0 }
 0x1ec   : > { %v7316_v37 = vpop.f32.mrb[2].mxu0 }
 0x1ed   : > { %v7299_v63 = vpop.f32.mrb[4].mxu1  ;;  %v7319_v44 = vpop.f32.mrb[3].mxu0 }
 0x1ee   : > { %v4859_v5 = vmul.f32 -1.442695, %v7299_v63  ;;  %v7302_v6 = vpop.f32.mrb[5].mxu1 }
 0x1ef   : > { %v4860_v22 = vmul.f32 -1.442695, %v7302_v6  ;;  %v7305_v25 = vpop.f32.mrb[6].mxu1 }
 0x1f0   : > { %5679 = vpow2.f32 %v4859_v5  ;;  %v4863_v28 = vmul.f32 -1.442695, %v7305_v25  ;;  %v7308_v29 = vpop.f32.mrb[7].mxu1 }
 0x1f1   : > { %5681 = vpow2.f32 %v4860_v22  ;;  %v4864_v13 = vmul.f32 -1.442695, %v7308_v29 }
 0x1f2   : > { %v5672_v36 = vpop.eup %5671  ;;  %5683 = vpow2.f32 %v4863_v28  ;;  %1278 = vmatmul.mubr.bf16.gmra.mrb[112].mxu1 %v7182_v23  ;;  %v7332_v0 = vpop.f32.mrb[4].mxu0 }
 0x1f3   : > { %v5674_v38 = vpop.eup %5673  ;;  %v2472_v42 = vadd.f32 1.0, %v5672_v36  ;;  %5685 = vpow2.f32 %v4864_v13  ;;  %1287 = vmatprep.mubr.bf16.mxu1 %v7186_v24  ;;  %v7335_v59 = vpop.f32.mrb[5].mxu0 }
 0x1f4   : > { %v5676_v47 = vpop.eup %5675  ;;  %v2473_v49 = vadd.f32 1.0, %v5674_v38  ;;  %v7338_v9 = vpop.f32.mrb[6].mxu0 }
 0x1f5   : > { %v5678_v50 = vpop.eup %5677  ;;  %5687 = vrcp.f32 %v2472_v42  ;;  %v2476_v51 = vadd.f32 1.0, %v5676_v47  ;;  %v7321_v52 = vpop.f32.mrb[8].mxu1 }
 0x1f6   : > { %5689 = vrcp.f32 %v2473_v49  ;;  %v2477_v53 = vadd.f32 1.0, %v5678_v50  ;;  %v4867_v23 = vmul.f32 -1.442695, %v7321_v52  ;;  %v7324_v54 = vpop.f32.mrb[9].mxu1  ;;  %v7341_v14 = vpop.f32.mrb[7].mxu0 }
 0x1f7   : > { %5691 = vrcp.f32 %v2476_v51  ;;  %v4868_v33 = vmul.f32 -1.442695, %v7324_v54  ;;  %v7327_v57 = vpop.f32.mrb[10].mxu1 }
 0x1f8   : > { %5693 = vrcp.f32 %v2477_v53  ;;  %v4871_v24 = vmul.f32 -1.442695, %v7327_v57  ;;  %v7330_v61 = vpop.f32.mrb[11].mxu1 }
 0x1f9   : > { %5695 = vpow2.f32 %v4867_v23  ;;  %v4872_v58 = vmul.f32 -1.442695, %v7330_v61 }
 0x1fa   : > { %v5680_v7 = vpop.eup %5679  ;;  %5697 = vpow2.f32 %v4868_v33  ;;  %1288 = vmatmul.mubr.bf16.gmra.mrb[116].mxu1 %v7195_v30  ;;  %v7355_v34 = vpop.f32.mrb[8].mxu0 }
 0x1fb   : > { %v5682_v60 = vpop.eup %5681  ;;  %v2480_v1 = vadd.f32 1.0, %v5680_v7  ;;  %5699 = vpow2.f32 %v4871_v24  ;;  %1297 = vmatprep.mubr.bf16.mxu1 %v7200_v35  ;;  %v7359_v46 = vpop.f32.mrb[9].mxu0 }
 0x1fc   : > { %v5684_v15 = vpop.eup %5683  ;;  %v2481_v2 = vadd.f32 1.0, %v5682_v60  ;;  %5701 = vpow2.f32 %v4872_v58  ;;  %v7364_v5 = vpop.f32.mrb[10].mxu0 }
 0x1fd   : > { %v5686_v3 = vpop.eup %5685  ;;  %5703 = vrcp.f32 %v2480_v1  ;;  %v2484_v20 = vadd.f32 1.0, %v5684_v15  ;;  %v7343_v21 = vpop.f32.mrb[12].mxu1 }
 0x1fe   : > { %5705 = vrcp.f32 %v2481_v2  ;;  %v2485_v4 = vadd.f32 1.0, %v5686_v3  ;;  %v4875_v30 = vmul.f32 -1.442695, %v7343_v21  ;;  %v7346_v8 = vpop.f32.mrb[13].mxu1  ;;  %v7369_v13 = vpop.f32.mrb[11].mxu0 }
 0x1ff   : > { %v5688_v26 = vpop.eup %5687  ;;  %5707 = vrcp.f32 %v2484_v20  ;;  %v4876_v35 = vmul.f32 -1.442695, %v7346_v8  ;;  %v7349_v27 = vpop.f32.mrb[14].mxu1 }
 0x200   : > { %v5690_v10 = vpop.eup %5689  ;;  %v2856_v11 = vmul.f32 %v5688_v26, %v7285_v39  ;;  %5709 = vrcp.f32 %v2485_v4  ;;  %v4879_v12 = vmul.f32 -1.442695, %v7349_v27  ;;  %v7353_v32 = vpop.f32.mrb[15].mxu1 }
 0x201   : > { %v5692_v17 = vpop.eup %5691  ;;  %v2857_v18 = vmul.f32 %v5690_v10, %v7288_v45  ;;  %5711 = vpow2.f32 %v4875_v30  ;;  %v4880_v40 = vmul.f32 -1.442695, %v7353_v32  ;;  %v6183_v10 = vld [vmem:[%s6915_s6 + $0x4] ss:$8 sps:$4 sm:$0xff]  }
 0x202   : > { %v5694_v55 = vpop.eup %5693  ;;  %v2860_v62 = vmul.f32 %v5692_v17, %v7291_v19  ;;  %5713 = vpow2.f32 %v4876_v35  ;;  %v2984_v39 = vmul.f32 %v2856_v11, %v7310_v31  ;;  %1298 = vmatmul.mubr.bf16.gmra.mrb[120].mxu1 %v7209_v41  ;;  %v7385_v60 = vpop.f32.mrb[12].mxu0 }
 0x203   : > { %v5696_v22 = vpop.eup %5695  ;;  %v2861_v28 = vmul.f32 %v5694_v55, %v7294_v56  ;;  %5715 = vpow2.f32 %v4879_v12  ;;  %v2985_v45 = vmul.f32 %v2857_v18, %v7313_v16  ;;  %1307 = vmatprep.mubr.bf16.mxu1 %v7214_v43  ;;  %v7389_v3 = vpop.f32.mrb[13].mxu0  ;;  %v5623_v12 = vld [vmem:[%s6936_s14 + $0x100] ss:$8 sps:$4 sm:$0xff]  }
 0x204   : > { %v5698_v36 = vpop.eup %5697  ;;  %v2488_v38 = vadd.f32 1.0, %v5696_v22  ;;  %5717 = vpow2.f32 %v4880_v40  ;;  %v2988_v19 = vmul.f32 %v2860_v62, %v7316_v37  ;;  %v7394_v30 = vpop.f32.mrb[14].mxu0 }
 0x205   : > { %v5700_v31 = vpop.eup %5699  ;;  %v2489_v42 = vadd.f32 1.0, %v5698_v36  ;;  %v2989_v41 = vmul.f32 %v2861_v28, %v7319_v44  ;;  %v7373_v47 = vpop.f32.mrb[16].mxu1 }
 0x206   : > { %v5702_v49 = vpop.eup %5701  ;;  %5719 = vrcp.f32 %v2488_v38  ;;  %v2492_v56 = vadd.f32 1.0, %v5700_v31  ;;  %v3112_v50 = vpack.c.bf16 %v2988_v19, %v2984_v39  ;;  %v4883_v16 = vmul.f32 -1.442695, %v7373_v47  ;;  %v7376_v43 = vpop.f32.mrb[17].mxu1 }
 0x207   : > { %v5704_v51 = vpop.eup %5703  ;;  %5721 = vrcp.f32 %v2489_v42  ;;  %v2493_v53 = vadd.f32 1.0, %v5702_v49  ;;  %v3113_v23 = vpack.c.bf16 %v2989_v41, %v2985_v45  ;;  %v4884_v37 = vmul.f32 -1.442695, %v7376_v43  ;;  %v7379_v33 = vpop.f32.mrb[18].mxu1 }
 0x208   : > { %v5706_v24 = vpop.eup %5705  ;;  %v2864_v44 = vmul.f32 %v5704_v51, %v7299_v63  ;;  %5723 = vrcp.f32 %v2492_v56  ;;  %v4887_v58 = vmul.f32 -1.442695, %v7379_v33  ;;  %v7383_v7 = vpop.f32.mrb[19].mxu1 }
 0x209   : > { %v5708_v1 = vpop.eup %5707  ;;  %v2865_v15 = vmul.f32 %v5706_v24, %v7302_v6  ;;  %5725 = vrcp.f32 %v2493_v53  ;;  %v4888_v2 = vmul.f32 -1.442695, %v7383_v7  ;;  %3592 = vmatprep.mubr.bf16.mxu0 %v3113_v23  ;;  %v7399_v11 = vpop.f32.mrb[15].mxu0  ;;  %v6184_v53 = vld [vmem:[%s6915_s6] ss:$8 sps:$4 sm:$0xff]  }
 0x20a   : > { %v5710_v63 = vpop.eup %5709  ;;  %v2868_v20 = vmul.f32 %v5708_v1, %v7305_v25  ;;  %5727 = vpow2.f32 %v4883_v16  ;;  %v2992_v4 = vmul.f32 %v2864_v44, %v7332_v0  ;;  %1308 = vmatmul.mubr.bf16.gmra.mrb[124].mxu1 %v7222_v48  ;;  %3593 = vmatmul.mubr.bf16.vlgmr.msra.gmra.mrb[64].mxu0 %v3112_v50  ;;  %v5625_v25 = vld [vmem:[%s6936_s14 + $0x104] ss:$8 sps:$4 sm:$0xff]   ;;  %v7416_v42 = vpop.f32.mrb[16].mxu0  ;;  %v6185_v44 = vld [vmem:[%s6915_s6 + $0x14] ss:$8 sps:$4 sm:$0xff]  }
 0x20b   : > { %v5712_v6 = vpop.eup %5711  ;;  %v2869_v26 = vmul.f32 %v5710_v63, %v7308_v29  ;;  %5729 = vpow2.f32 %v4884_v37  ;;  %v2993_v35 = vmul.f32 %v2865_v15, %v7335_v59  ;;  %1927 = vmatprep.mubr.bf16.mxu1 %v6183_v10  ;;  %3753 = vmatprep.subr.bf16.mxu0 %v5625_v25  ;;  %v7420_v50 = vpop.f32.mrb[17].mxu0  ;;  %v5628_v63 = vld [vmem:[%s6936_s14 + $0x114] ss:$8 sps:$4 sm:$0xff]  }
 0x20c   : > { %v5714_v17 = vpop.eup %5713  ;;  %v2496_v18 = vadd.f32 1.0, %v5712_v6  ;;  %5731 = vpow2.f32 %v4887_v58  ;;  %v2996_v48 = vmul.f32 %v2868_v20, %v7338_v9  ;;  %3754 = vmatpush1.bf16.msra.mxu0 %v5623_v12  ;;  %v7424_v23 = vpop.f32.mrb[18].mxu0 }
 0x20d   : > { %v5716_v0 = vpop.eup %5715  ;;  %v2497_v40 = vadd.f32 1.0, %v5714_v17  ;;  %5733 = vpow2.f32 %v4888_v2  ;;  %v2997_v55 = vmul.f32 %v2869_v26, %v7341_v14  ;;  %v7405_v29 = vpop.f32.mrb[20].mxu1  ;;  %v5626_v2 = vld [vmem:[%s6936_s14 + $0x110] ss:$8 sps:$4 sm:$0xff]   ;;  %3755 = vmatprep.subr.bf16.mxu0 %v5628_v63 }
 0x20e   : > { %v5718_v59 = vpop.eup %5717  ;;  %5735 = vrcp.f32 %v2496_v18  ;;  %v2500_v62 = vadd.f32 1.0, %v5716_v0  ;;  %v3116_v39 = vpack.c.bf16 %v2996_v48, %v2992_v4  ;;  %v4891_v22 = vmul.f32 -1.442695, %v7405_v29  ;;  %v7408_v28 = vpop.f32.mrb[21].mxu1 }
 0x20f   : > { %5737 = vrcp.f32 %v2497_v40  ;;  %v2501_v45 = vadd.f32 1.0, %v5718_v59  ;;  %v3117_v9 = vpack.c.bf16 %v2997_v55, %v2993_v35  ;;  %v4892_v36 = vmul.f32 -1.442695, %v7408_v28  ;;  %v7411_v38 = vpop.f32.mrb[22].mxu1  ;;  %v7429_v58 = vpop.f32.mrb[19].mxu0 }
 0x210   : > { %v5720_v14 = vpop.eup %5719  ;;  %5739 = vrcp.f32 %v2500_v62  ;;  %v4895_v19 = vmul.f32 -1.442695, %v7411_v38  ;;  %v7414_v31 = vpop.f32.mrb[23].mxu1  ;;  %3756 = vmatpush1.bf16.msra.mxu0 %v5626_v2 }
 0x211   : > { %v5722_v41 = vpop.eup %5721  ;;  %v2872_v49 = vmul.f32 %v5720_v14, %v7321_v52  ;;  %5741 = vrcp.f32 %v2501_v45  ;;  %v4896_v56 = vmul.f32 -1.442695, %v7414_v31  ;;  %3602 = vmatprep.mubr.bf16.mxu0 %v3117_v9 }
 0x212   : > { %v5724_v16 = vpop.eup %5723  ;;  %v2873_v51 = vmul.f32 %v5722_v41, %v7324_v54  ;;  %5743 = vpow2.f32 %v4891_v22  ;;  %1928 = vmatmul.mubr.bf16.vlgmr.msra.gmra.mrb[128].mxu1 %v6184_v53  ;;  %3603 = vmatmul.mubr.bf16.gmra.mrb[68].mxu0 %v3116_v39  ;;  %v7447_v40 = vpop.f32.mrb[20].mxu0  ;;  %v5629_v53 = vld [vmem:[%s6936_s14 + $0x120] ss:$8 sps:$4 sm:$0xff]  }
 0x213   : > { %v5726_v37 = vpop.eup %5725  ;;  %v2876_v52 = vmul.f32 %v5724_v16, %v7327_v57  ;;  %5745 = vpow2.f32 %v4892_v36  ;;  %v3000_v24 = vmul.f32 %v2872_v49, %v7355_v34  ;;  %1937 = vmatprep.mubr.bf16.mxu1 %v6185_v44  ;;  %v7451_v39 = vpop.f32.mrb[21].mxu0  ;;  %v6186_v36 = vld [vmem:[%s6915_s6 + $0x10] ss:$8 sps:$4 sm:$0xff]   ;;  %v6187_v49 = vld [vmem:[%s6915_s6 + $0x24] ss:$8 sps:$4 sm:$0xff]  }
 0x214   : > { %v5728_v1 = vpop.eup %5727  ;;  %v2877_v54 = vmul.f32 %v5726_v37, %v7330_v61  ;;  %5747 = vpow2.f32 %v4895_v19  ;;  %v3001_v15 = vmul.f32 %v2873_v51, %v7359_v46  ;;  %v7456_v14 = vpop.f32.mrb[22].mxu0  ;;  %v5631_v37 = vld [vmem:[%s6936_s14 + $0x124] ss:$8 sps:$4 sm:$0xff]  }
 0x215   : > { %v5730_v20 = vpop.eup %5729  ;;  %v2504_v4 = vadd.f32 1.0, %v5728_v1  ;;  %5749 = vpow2.f32 %v4896_v56  ;;  %v3004_v57 = vmul.f32 %v2876_v52, %v7364_v5  ;;  %v7436_v6 = vpop.f32.mrb[24].mxu1  ;;  %3757 = vmatprep.subr.bf16.mxu0 %v5631_v37 }
 0x216   : > { %v5732_v34 = vpop.eup %5731  ;;  %v2505_v26 = vadd.f32 1.0, %v5730_v20  ;;  %v3005_v35 = vmul.f32 %v2877_v54, %v7369_v13  ;;  %v7439_v10 = vpop.f32.mrb[25].mxu1  ;;  %v4899_v25 = vmul.f32 -1.442695, %v7436_v6  ;;  %3758 = vmatpush1.bf16.msra.mxu0 %v5629_v53 }
 0x217   : > { %v5734_v61 = vpop.eup %5733  ;;  %5751 = vrcp.f32 %v2504_v4  ;;  %v2508_v12 = vadd.f32 1.0, %v5732_v34  ;;  %v3120_v46 = vpack.c.bf16 %v3004_v57, %v3000_v24  ;;  %v7442_v17 = vpop.f32.mrb[26].mxu1  ;;  %v4900_v0 = vmul.f32 -1.442695, %v7439_v10 }
 0x218   : > { %v5736_v18 = vpop.eup %5735  ;;  %5753 = vrcp.f32 %v2505_v26  ;;  %v2509_v5 = vadd.f32 1.0, %v5734_v61  ;;  %v3121_v48 = vpack.c.bf16 %v3005_v35, %v3001_v15  ;;  %v7445_v13 = vpop.f32.mrb[27].mxu1  ;;  %v4903_v62 = vmul.f32 -1.442695, %v7442_v17 }
 0x219   : > { %v5738_v55 = vpop.eup %5737  ;;  %v2880_v59 = vmul.f32 %v5736_v18, %v7343_v21  ;;  %5755 = vrcp.f32 %v2508_v12  ;;  %v4904_v9 = vmul.f32 -1.442695, %v7445_v13  ;;  %v6188_v18 = vld [vmem:[%s6915_s6 + $0x20] ss:$8 sps:$4 sm:$0xff]  }
 0x21a   : > { %v5740_v22 = vpop.eup %5739  ;;  %v2881_v45 = vmul.f32 %v5738_v55, %v7346_v8  ;;  %5757 = vrcp.f32 %v2509_v5  ;;  %3612 = vmatprep.mubr.bf16.mxu0 %v3121_v48  ;;  %1938 = vmatmul.mubr.bf16.gmra.mrb[132].mxu1 %v6186_v36  ;;  %v7461_v8 = vpop.f32.mrb[23].mxu0  ;;  %v6189_v55 = vld [vmem:[%s6915_s6 + $0x34] ss:$8 sps:$4 sm:$0xff]  }
 0x21b   : > { %v5742_v21 = vpop.eup %5741  ;;  %v2884_v19 = vmul.f32 %v5740_v22, %v7349_v27  ;;  %5759 = vpow2.f32 %v4899_v25  ;;  %v3008_v41 = vmul.f32 %v2880_v59, %v7385_v60  ;;  %3613 = vmatmul.mubr.bf16.gmra.mrb[72].mxu0 %v3120_v46  ;;  %1947 = vmatprep.mubr.bf16.mxu1 %v6187_v49 }
 0x21c   : > { %v5744_v56 = vpop.eup %5743  ;;  %v2885_v16 = vmul.f32 %v5742_v21, %v7353_v32  ;;  %5761 = vpow2.f32 %v4900_v0  ;;  %v3009_v51 = vmul.f32 %v2881_v45, %v7389_v3  ;;  %v5632_v45 = vld [vmem:[%s6936_s14 + $0x130] ss:$8 sps:$4 sm:$0xff]  }
 0x21d   : > { %v5746_v52 = vpop.eup %5745  ;;  %v2512_v24 = vadd.f32 1.0, %v5744_v56  ;;  %5763 = vpow2.f32 %v4903_v62  ;;  %v3012_v27 = vmul.f32 %v2884_v19, %v7394_v30  ;;  %v7468_v44 = vpop.f32.mrb[28].mxu1 }
 0x21e   : > { %v5748_v60 = vpop.eup %5747  ;;  %v2513_v1 = vadd.f32 1.0, %v5746_v52  ;;  %5765 = vpow2.f32 %v4904_v9  ;;  %v3013_v54 = vmul.f32 %v2885_v16, %v7399_v11  ;;  %v7471_v15 = vpop.f32.mrb[29].mxu1  ;;  %v4907_v63 = vmul.f32 -1.442695, %v7468_v44  ;;  %v5634_v9 = vld [vmem:[%s6936_s14 + $0x134] ss:$8 sps:$4 sm:$0xff]  }
 0x21f   : > { %v5750_v32 = vpop.eup %5749  ;;  %5767 = vrcp.f32 %v2512_v24  ;;  %v2516_v3 = vadd.f32 1.0, %v5748_v60  ;;  %v3124_v2 = vpack.c.bf16 %v3012_v27, %v3008_v41  ;;  %v7474_v20 = vpop.f32.mrb[30].mxu1  ;;  %v4908_v57 = vmul.f32 -1.442695, %v7471_v15  ;;  %3759 = vmatprep.subr.bf16.mxu0 %v5634_v9 }
 0x220   : > { %5769 = vrcp.f32 %v2513_v1  ;;  %v2517_v30 = vadd.f32 1.0, %v5750_v32  ;;  %v3125_v4 = vpack.c.bf16 %v3013_v54, %v3009_v51  ;;  %v7477_v34 = vpop.f32.mrb[31].mxu1  ;;  %v7479_v11 = vpop.f32.mrb[24].mxu0  ;;  %v4911_v35 = vmul.f32 -1.442695, %v7474_v20  ;;  %3760 = vmatpush1.bf16.msra.mxu0 %v5632_v45 }
 0x221   : > { %v5752_v26 = vpop.eup %5751  ;;  %5771 = vrcp.f32 %v2516_v3  ;;  %v7482_v61 = vpop.f32.mrb[25].mxu0  ;;  %v4912_v25 = vmul.f32 -1.442695, %v7477_v34 }
 0x222   : > { %v5754_v12 = vpop.eup %5753  ;;  %v2888_v46 = vmul.f32 %v5752_v26, %v7373_v47  ;;  %5773 = vrcp.f32 %v2517_v30  ;;  %3622 = vmatprep.mubr.bf16.mxu0 %v3125_v4  ;;  %1948 = vmatmul.mubr.bf16.gmra.mrb[136].mxu1 %v6188_v18  ;;  %v7487_v5 = vpop.f32.mrb[26].mxu0 }
 0x223   : > { %v5756_v48 = vpop.eup %5755  ;;  %v2889_v0 = vmul.f32 %v5754_v12, %v7376_v43  ;;  %5775 = vpow2.f32 %v4907_v63  ;;  %3623 = vmatmul.mubr.bf16.gmra.mrb[76].mxu0 %v3124_v2  ;;  %1957 = vmatprep.mubr.bf16.mxu1 %v6189_v55  ;;  %v7491_v59 = vpop.f32.mrb[27].mxu0  ;;  %v6190_v63 = vld [vmem:[%s6915_s6 + $0x30] ss:$8 sps:$4 sm:$0xff]   ;;  %v5635_v55 = vld [vmem:[%s6936_s14 + $0x140] ss:$8 sps:$4 sm:$0xff]  }
 0x224   : > { %v5758_v47 = vpop.eup %5757  ;;  %v2892_v62 = vmul.f32 %v5756_v48, %v7379_v33  ;;  %5777 = vpow2.f32 %v4908_v57  ;;  %v3016_v22 = vmul.f32 %v2888_v46, %v7416_v42 }
 0x225   : > { %v5760_v36 = vpop.eup %5759  ;;  %v2893_v21 = vmul.f32 %v5758_v47, %v7383_v7  ;;  %5779 = vpow2.f32 %v4911_v35  ;;  %v3017_v43 = vmul.f32 %v2889_v0, %v7420_v50  ;;  %v7499_v19 = vpop.f32.mrb[32].mxu1  ;;  %v6191_v35 = vld [vmem:[%s6915_s6 + $0x44] ss:$8 sps:$4 sm:$0xff]  }
 0x226   : > { %v5762_v41 = vpop.eup %5761  ;;  %v2520_v49 = vadd.f32 1.0, %v5760_v36  ;;  %5781 = vpow2.f32 %v4912_v25  ;;  %v3020_v56 = vmul.f32 %v2892_v62, %v7424_v23  ;;  %v7502_v16 = vpop.f32.mrb[33].mxu1  ;;  %v4915_v52 = vmul.f32 -1.442695, %v7499_v19  ;;  %v5637_v47 = vld [vmem:[%s6936_s14 + $0x144] ss:$8 sps:$4 sm:$0xff]  }
 0x227   : > { %v5764_v33 = vpop.eup %5763  ;;  %v2521_v42 = vadd.f32 1.0, %v5762_v41  ;;  %v3021_v51 = vmul.f32 %v2893_v21, %v7429_v58  ;;  %v7505_v53 = vpop.f32.mrb[34].mxu1  ;;  %v4916_v58 = vmul.f32 -1.442695, %v7502_v16  ;;  %3761 = vmatprep.subr.bf16.mxu0 %v5637_v47 }
 0x228   : > { %v5766_v7 = vpop.eup %5765  ;;  %5783 = vrcp.f32 %v2520_v49  ;;  %v2524_v50 = vadd.f32 1.0, %v5764_v33  ;;  %v3128_v37 = vpack.c.bf16 %v3020_v56, %v3016_v22  ;;  %v7508_v24 = vpop.f32.mrb[35].mxu1  ;;  %v4919_v2 = vmul.f32 -1.442695, %v7505_v53  ;;  %3762 = vmatpush1.bf16.msra.mxu0 %v5635_v55 }
 0x229   : > { %v7510_v23 = vpop.f32.mrb[28].mxu0  ;;  %v5768_v27 = vpop.eup %5767  ;;  %5785 = vrcp.f32 %v2521_v42  ;;  %v2525_v60 = vadd.f32 1.0, %v5766_v7  ;;  %v3129_v1 = vpack.c.bf16 %v3021_v51, %v3017_v43  ;;  %v4920_v26 = vmul.f32 -1.442695, %v7508_v24 }
 0x22a   : > { %v7513_v54 = vpop.f32.mrb[29].mxu0  ;;  %v5770_v32 = vpop.eup %5769  ;;  %v2896_v3 = vmul.f32 %v5768_v27, %v7405_v29  ;;  %5787 = vrcp.f32 %v2524_v50  ;;  %1958 = vmatmul.mubr.bf16.gmra.mrb[140].mxu1 %v6190_v63  ;;  %v6192_v50 = vld [vmem:[%s6915_s6 + $0x40] ss:$8 sps:$4 sm:$0xff]  }
 0x22b   : > { %v7518_v30 = vpop.f32.mrb[30].mxu0  ;;  %v5772_v4 = vpop.eup %5771  ;;  %v2897_v57 = vmul.f32 %v5770_v32, %v7408_v28  ;;  %5789 = vrcp.f32 %v2525_v60  ;;  %3632 = vmatprep.mubr.bf16.mxu0 %v3129_v1  ;;  %1967 = vmatprep.mubr.bf16.mxu1 %v6191_v35  ;;  %v6193_v1 = vld [vmem:[%s6915_s6 + $0x54] ss:$8 sps:$4 sm:$0xff]  }
 0x22c   : > { %v7523_v12 = vpop.f32.mrb[31].mxu0  ;;  %v5774_v29 = vpop.eup %5773  ;;  %v2900_v46 = vmul.f32 %v5772_v4, %v7411_v38  ;;  %5791 = vpow2.f32 %v4915_v52  ;;  %v3024_v25 = vmul.f32 %v2896_v3, %v7447_v40  ;;  %3633 = vmatmul.mubr.bf16.gmra.mrb[80].mxu0 %v3128_v37 }
 0x22d   : > { %v5776_v18 = vpop.eup %5775  ;;  %v2901_v28 = vmul.f32 %v5774_v29, %v7414_v31  ;;  %5793 = vpow2.f32 %v4916_v58  ;;  %v3025_v48 = vmul.f32 %v2897_v57, %v7451_v39  ;;  %v7529_v0 = vpop.f32.mrb[36].mxu1  ;;  %v5638_v57 = vld [vmem:[%s6936_s14 + $0x150] ss:$8 sps:$4 sm:$0xff]  }
 0x22e   : > { %v5778_v62 = vpop.eup %5777  ;;  %v2528_v22 = vadd.f32 1.0, %v5776_v18  ;;  %5795 = vpow2.f32 %v4919_v2  ;;  %v3028_v45 = vmul.f32 %v2900_v46, %v7456_v14  ;;  %v7534_v38 = vpop.f32.mrb[37].mxu1  ;;  %v4923_v41 = vmul.f32 -1.442695, %v7529_v0 }
 0x22f   : > { %v5780_v9 = vpop.eup %5779  ;;  %v2529_v40 = vadd.f32 1.0, %v5778_v62  ;;  %5797 = vpow2.f32 %v4920_v26  ;;  %v3029_v36 = vmul.f32 %v2901_v28, %v7461_v8  ;;  %v7537_v31 = vpop.f32.mrb[38].mxu1  ;;  %v4924_v8 = vmul.f32 -1.442695, %v7534_v38  ;;  %v5640_v26 = vld [vmem:[%s6936_s14 + $0x154] ss:$8 sps:$4 sm:$0xff]  }
 0x230   : > { %v5782_v39 = vpop.eup %5781  ;;  %5799 = vrcp.f32 %v2528_v22  ;;  %v2532_v21 = vadd.f32 1.0, %v5780_v9  ;;  %v3132_v43 = vpack.c.bf16 %v3028_v45, %v3024_v25  ;;  %v7540_v49 = vpop.f32.mrb[39].mxu1  ;;  %v4927_v7 = vmul.f32 -1.442695, %v7537_v31  ;;  %3763 = vmatprep.subr.bf16.mxu0 %v5640_v26 }
 0x231   : > { %v7542_v14 = vpop.f32.mrb[32].mxu0  ;;  %5801 = vrcp.f32 %v2529_v40  ;;  %v2533_v56 = vadd.f32 1.0, %v5782_v39  ;;  %v3133_v33 = vpack.c.bf16 %v3029_v36, %v3025_v48  ;;  %v4928_v60 = vmul.f32 -1.442695, %v7540_v49  ;;  %3764 = vmatpush1.bf16.msra.mxu0 %v5638_v57 }
 0x232   : > { %v7545_v42 = vpop.f32.mrb[33].mxu0  ;;  %v5784_v51 = vpop.eup %5783  ;;  %5803 = vrcp.f32 %v2532_v21  ;;  %1968 = vmatmul.mubr.bf16.gmra.mrb[144].mxu1 %v6192_v50  ;;  %v6194_v21 = vld [vmem:[%s6915_s6 + $0x50] ss:$8 sps:$4 sm:$0xff]  }
 0x233   : > { %v7549_v37 = vpop.f32.mrb[34].mxu0  ;;  %v5786_v52 = vpop.eup %5785  ;;  %v2904_v27 = vmul.f32 %v5784_v51, %v7436_v6  ;;  %5805 = vrcp.f32 %v2533_v56  ;;  %3642 = vmatprep.mubr.bf16.mxu0 %v3133_v33  ;;  %1977 = vmatprep.mubr.bf16.mxu1 %v6193_v1  ;;  %v5641_v1 = vld [vmem:[%s6936_s14 + $0x160] ss:$8 sps:$4 sm:$0xff]  }
 0x234   : > { %v7554_v58 = vpop.f32.mrb[35].mxu0  ;;  %v5788_v32 = vpop.eup %5787  ;;  %v2905_v3 = vmul.f32 %v5786_v52, %v7439_v10  ;;  %5807 = vpow2.f32 %v4923_v41  ;;  %3643 = vmatmul.mubr.bf16.gmra.mrb[84].mxu0 %v3132_v43 }
 0x235   : > { %v5790_v2 = vpop.eup %5789  ;;  %v2908_v63 = vmul.f32 %v5788_v32, %v7442_v17  ;;  %5809 = vpow2.f32 %v4924_v8  ;;  %v3032_v6 = vmul.f32 %v2904_v27, %v7479_v11  ;;  %v7559_v4 = vpop.f32.mrb[40].mxu1  ;;  %v6195_v8 = vld [vmem:[%s6915_s6 + $0x64] ss:$8 sps:$4 sm:$0xff]  }
 0x236   : > { %v5792_v35 = vpop.eup %5791  ;;  %v2909_v29 = vmul.f32 %v5790_v2, %v7445_v13  ;;  %5811 = vpow2.f32 %v4927_v7  ;;  %v3033_v46 = vmul.f32 %v2905_v3, %v7482_v61  ;;  %v4931_v10 = vmul.f32 -1.442695, %v7559_v4  ;;  %v7566_v25 = vpop.f32.mrb[41].mxu1  ;;  %v5643_v32 = vld [vmem:[%s6936_s14 + $0x164] ss:$8 sps:$4 sm:$0xff]  }
 0x237   : > { %v5794_v18 = vpop.eup %5793  ;;  %v2536_v28 = vadd.f32 1.0, %v5792_v35  ;;  %5813 = vpow2.f32 %v4928_v60  ;;  %v3036_v17 = vmul.f32 %v2908_v63, %v7487_v5  ;;  %v7569_v11 = vpop.f32.mrb[42].mxu1  ;;  %v4932_v5 = vmul.f32 -1.442695, %v7566_v25  ;;  %3765 = vmatprep.subr.bf16.mxu0 %v5643_v32 }
 0x238   : > { %v5796_v48 = vpop.eup %5795  ;;  %v2537_v55 = vadd.f32 1.0, %v5794_v18  ;;  %v3037_v47 = vmul.f32 %v2909_v29, %v7491_v59  ;;  %5815 = vpow2.f32 %v4931_v10  ;;  %v7572_v13 = vpop.f32.mrb[43].mxu1  ;;  %v4935_v39 = vmul.f32 -1.442695, %v7569_v11  ;;  %3766 = vmatpush1.bf16.msra.mxu0 %v5641_v1 }
 0x239   : > { %v7574_v61 = vpop.f32.mrb[36].mxu0  ;;  %v5798_v62 = vpop.eup %5797  ;;  %5817 = vrcp.f32 %v2536_v28  ;;  %v2540_v22 = vadd.f32 1.0, %v5796_v48  ;;  %v3136_v45 = vpack.c.bf16 %v3036_v17, %v3032_v6  ;;  %v4936_v33 = vmul.f32 -1.442695, %v7572_v13 }
 0x23a   : > { %v7577_v9 = vpop.f32.mrb[37].mxu0  ;;  %v5800_v40 = vpop.eup %5799  ;;  %5819 = vrcp.f32 %v2537_v55  ;;  %v2541_v36 = vadd.f32 1.0, %v5798_v62  ;;  %v3137_v59 = vpack.c.bf16 %v3037_v47, %v3033_v46  ;;  %1978 = vmatmul.mubr.bf16.gmra.mrb[148].mxu1 %v6194_v21 }
 0x23b   : > { %v7581_v43 = vpop.f32.mrb[38].mxu0  ;;  %v5802_v41 = vpop.eup %5801  ;;  %v2912_v56 = vmul.f32 %v5800_v40, %v7468_v44  ;;  %5821 = vrcp.f32 %v2540_v22  ;;  %1987 = vmatprep.mubr.bf16.mxu1 %v6195_v8  ;;  %v6197_v40 = vld [vmem:[%s6915_s6 + $0x74] ss:$8 sps:$4 sm:$0xff]  }
 0x23c   : > { %v7586_v51 = vpop.f32.mrb[39].mxu0  ;;  %v5804_v7 = vpop.eup %5803  ;;  %v2913_v50 = vmul.f32 %v5802_v41, %v7471_v15  ;;  %5823 = vrcp.f32 %v2541_v36  ;;  %3652 = vmatprep.mubr.bf16.mxu0 %v3137_v59 }
 0x23d   : > { %v5806_v52 = vpop.eup %5805  ;;  %v2916_v27 = vmul.f32 %v5804_v7, %v7474_v20  ;;  %5825 = vpow2.f32 %v4932_v5  ;;  %v3040_v44 = vmul.f32 %v2912_v56, %v7510_v23  ;;  %3653 = vmatmul.mubr.bf16.gmra.mrb[88].mxu0 %v3136_v45  ;;  %v7591_v60 = vpop.f32.mrb[44].mxu1 }
 0x23e   : > { %v5808_v3 = vpop.eup %5807  ;;  %v2917_v2 = vmul.f32 %v5806_v52, %v7477_v34  ;;  %5827 = vpow2.f32 %v4935_v39  ;;  %v3041_v63 = vmul.f32 %v2913_v50, %v7513_v54  ;;  %v4939_v15 = vmul.f32 -1.442695, %v7591_v60  ;;  %v7598_v6 = vpop.f32.mrb[45].mxu1 }
 0x23f   : > { %v5810_v57 = vpop.eup %5809  ;;  %v2544_v20 = vadd.f32 1.0, %v5808_v3  ;;  %5829 = vpow2.f32 %v4936_v33  ;;  %v3044_v23 = vmul.f32 %v2916_v27, %v7518_v30  ;;  %v7601_v26 = vpop.f32.mrb[46].mxu1  ;;  %v4940_v47 = vmul.f32 -1.442695, %v7598_v6  ;;  %v5644_v27 = vld [vmem:[%s6936_s14 + $0x170] ss:$8 sps:$4 sm:$0xff]  }
 0x240   : > { %v5812_v35 = vpop.eup %5811  ;;  %v2545_v29 = vadd.f32 1.0, %v5810_v57  ;;  %v3045_v34 = vmul.f32 %v2917_v2, %v7523_v12  ;;  %5831 = vpow2.f32 %v4939_v15  ;;  %v7604_v46 = vpop.f32.mrb[47].mxu1  ;;  %v6196_v12 = vld [vmem:[%s6915_s6 + $0x60] ss:$8 sps:$4 sm:$0xff]   ;;  %v4943_v5 = vmul.f32 -1.442695, %v7601_v26 }
 0x241   : > { %v7606_v54 = vpop.f32.mrb[40].mxu0  ;;  %v5814_v10 = vpop.eup %5813  ;;  %5833 = vrcp.f32 %v2544_v20  ;;  %v2548_v18 = vadd.f32 1.0, %v5812_v35  ;;  %v3140_v28 = vpack.c.bf16 %v3044_v23, %v3040_v44  ;;  %v4944_v21 = vmul.f32 -1.442695, %v7604_v46  ;;  %v5646_v3 = vld [vmem:[%s6936_s14 + $0x174] ss:$8 sps:$4 sm:$0xff]  }
 0x242   : > { %v7608_v30 = vpop.f32.mrb[41].mxu0  ;;  %v5816_v17 = vpop.eup %5815  ;;  %5835 = vrcp.f32 %v2545_v29  ;;  %v2549_v48 = vadd.f32 1.0, %v5814_v10  ;;  %v3141_v55 = vpack.c.bf16 %v3045_v34, %v3041_v63  ;;  %1988 = vmatmul.mubr.bf16.gmra.mrb[152].mxu1 %v6196_v12  ;;  %3767 = vmatprep.subr.bf16.mxu0 %v5646_v3 }
 0x243   : > { %v7612_v62 = vpop.f32.mrb[42].mxu0  ;;  %v5818_v22 = vpop.eup %5817  ;;  %5837 = vrcp.f32 %v2548_v18  ;;  %v2552_v45 = vadd.f32 1.0, %v5816_v17  ;;  %1997 = vmatprep.mubr.bf16.mxu1 %v6197_v40  ;;  %3768 = vmatpush1.bf16.msra.mxu0 %v5644_v27 }
 0x244   : > { %v7616_v36 = vpop.f32.mrb[43].mxu0  ;;  %v5820_v59 = vpop.eup %5819  ;;  %v2920_v39 = vmul.f32 %v5818_v22, %v7499_v19  ;;  %5839 = vrcp.f32 %v2549_v48  ;;  %3662 = vmatprep.mubr.bf16.mxu0 %v3141_v55  ;;  %v6199_v48 = vld [vmem:[%s6915_s6 + $0x84] ss:$8 sps:$4 sm:$0xff]  }
 0x245   : > { %v5822_v41 = vpop.eup %5821  ;;  %v2921_v56 = vmul.f32 %v5820_v59, %v7502_v16  ;;  %5841 = vrcp.f32 %v2552_v45  ;;  %3663 = vmatmul.mubr.bf16.gmra.mrb[92].mxu0 %v3140_v28  ;;  %v7621_v33 = vpop.f32.mrb[48].mxu1 }
 0x246   : > { %v5824_v8 = vpop.eup %5823  ;;  %v2924_v7 = vmul.f32 %v5822_v41, %v7505_v53  ;;  %5843 = vpow2.f32 %v4940_v47  ;;  %v3048_v50 = vmul.f32 %v2920_v39, %v7542_v14  ;;  %v4947_v19 = vmul.f32 -1.442695, %v7621_v33  ;;  %v7626_v52 = vpop.f32.mrb[49].mxu1 }
 0x247   : > { %v5826_v44 = vpop.eup %5825  ;;  %v2925_v1 = vmul.f32 %v5824_v8, %v7508_v24  ;;  %5845 = vpow2.f32 %v4943_v5  ;;  %v3049_v16 = vmul.f32 %v2921_v56, %v7545_v42  ;;  %v7631_v32 = vpop.f32.mrb[50].mxu1  ;;  %v4948_v34 = vmul.f32 -1.442695, %v7626_v52  ;;  %v5647_v56 = vld [vmem:[%s6936_s14 + $0x180] ss:$8 sps:$4 sm:$0xff]  }
 0x248   : > { %v5828_v2 = vpop.eup %5827  ;;  %v2553_v63 = vadd.f32 1.0, %v5826_v44  ;;  %5847 = vpow2.f32 %v4944_v21  ;;  %v3052_v53 = vmul.f32 %v2924_v7, %v7549_v37  ;;  %v7635_v14 = vpop.f32.mrb[51].mxu1  ;;  %v6198_v37 = vld [vmem:[%s6915_s6 + $0x70] ss:$8 sps:$4 sm:$0xff]   ;;  %v4951_v17 = vmul.f32 -1.442695, %v7631_v32 }
 0x249   : > { %v7637_v15 = vpop.f32.mrb[44].mxu0  ;;  %v5830_v57 = vpop.eup %5829  ;;  %v2556_v20 = vadd.f32 1.0, %v5828_v2  ;;  %v3053_v24 = vmul.f32 %v2925_v1, %v7554_v58  ;;  %5849 = vpow2.f32 %v4947_v19  ;;  %v4952_v22 = vmul.f32 -1.442695, %v7635_v14 }
 0x24a   : > { %v7640_v23 = vpop.f32.mrb[45].mxu0  ;;  %v5832_v42 = vpop.eup %5831  ;;  %5851 = vrcp.f32 %v2553_v63  ;;  %v2557_v35 = vadd.f32 1.0, %v5830_v57  ;;  %v3144_v29 = vpack.c.bf16 %v3052_v53, %v3048_v50  ;;  %1998 = vmatmul.mubr.bf16.gmra.mrb[156].mxu1 %v6198_v37  ;;  %v6200_v57 = vld [vmem:[%s6915_s6 + $0x80] ss:$8 sps:$4 sm:$0xff]  }
 0x24b   : > { %v7644_v10 = vpop.f32.mrb[46].mxu0  ;;  %v5834_v18 = vpop.eup %5833  ;;  %5853 = vrcp.f32 %v2556_v20  ;;  %v2560_v28 = vadd.f32 1.0, %v5832_v42  ;;  %v3145_v58 = vpack.c.bf16 %v3053_v24, %v3049_v16  ;;  %2007 = vmatprep.mubr.bf16.mxu1 %v6199_v48  ;;  %v5652_v24 = vld [vmem:[%s6936_s14 + $0x194] ss:$8 sps:$4 sm:$0xff]  }
 0x24c   : > { %v7648_v55 = vpop.f32.mrb[47].mxu0  ;;  %v5836_v47 = vpop.eup %5835  ;;  %v2928_v12 = vmul.f32 %v5834_v18, %v7529_v0  ;;  %5855 = vrcp.f32 %v2557_v35  ;;  %v5650_v18 = vld [vmem:[%s6936_s14 + $0x190] ss:$8 sps:$4 sm:$0xff]  }
 0x24d   : > { %v5838_v45 = vpop.eup %5837  ;;  %v2929_v5 = vmul.f32 %v5836_v47, %v7534_v38  ;;  %5857 = vrcp.f32 %v2560_v28  ;;  %3672 = vmatprep.mubr.bf16.mxu0 %v3145_v58  ;;  %v7653_v40 = vpop.f32.mrb[52].mxu1 }
 0x24e   : > { %v5840_v59 = vpop.eup %5839  ;;  %v2932_v39 = vmul.f32 %v5838_v45, %v7537_v31  ;;  %5859 = vpow2.f32 %v4948_v34  ;;  %v3056_v21 = vmul.f32 %v2928_v12, %v7574_v61  ;;  %3673 = vmatmul.mubr.bf16.gmra.mrb[96].mxu0 %v3144_v29  ;;  %v4955_v0 = vmul.f32 -1.442695, %v7653_v40  ;;  %v7658_v41 = vpop.f32.mrb[53].mxu1  ;;  %v5649_v31 = vld [vmem:[%s6936_s14 + $0x184] ss:$8 sps:$4 sm:$0xff]  }
 0x24f   : > { %v5842_v8 = vpop.eup %5841  ;;  %v2933_v38 = vmul.f32 %v5840_v59, %v7540_v49  ;;  %5861 = vpow2.f32 %v4951_v17  ;;  %v3057_v7 = vmul.f32 %v2929_v5, %v7577_v9  ;;  %v4956_v50 = vmul.f32 -1.442695, %v7658_v41  ;;  %v7664_v19 = vpop.f32.mrb[54].mxu1  ;;  %3769 = vmatprep.subr.bf16.mxu0 %v5649_v31  ;;  %v6201_v34 = vld [vmem:[%s6915_s6 + $0x94] ss:$8 sps:$4 sm:$0xff]  }
 0x250   : > { %v5844_v27 = vpop.eup %5843  ;;  %v2936_v61 = vmul.f32 %v5842_v8, %v7559_v4  ;;  %5863 = vpow2.f32 %v4952_v22  ;;  %v3060_v44 = vmul.f32 %v2932_v39, %v7581_v43  ;;  %v7669_v1 = vpop.f32.mrb[55].mxu1  ;;  %3770 = vmatpush1.bf16.msra.mxu0 %v5647_v56  ;;  %v4959_v29 = vmul.f32 -1.442695, %v7664_v19 }
 0x251   : > { %v7671_v16 = vpop.f32.mrb[48].mxu0  ;;  %v5846_v49 = vpop.eup %5845  ;;  %v2561_v3 = vadd.f32 1.0, %v5844_v27  ;;  %v3061_v9 = vmul.f32 %v2933_v38, %v7586_v51  ;;  %5865 = vpow2.f32 %v4955_v0  ;;  %v4960_v58 = vmul.f32 -1.442695, %v7669_v1  ;;  %3771 = vmatprep.subr.bf16.mxu0 %v5652_v24 }
 0x252   : > { %v7674_v2 = vpop.f32.mrb[49].mxu0  ;;  %v5848_v63 = vpop.eup %5847  ;;  %v2564_v4 = vadd.f32 1.0, %v5846_v49  ;;  %v3148_v53 = vpack.c.bf16 %v3060_v44, %v3056_v21  ;;  %5867 = vpow2.f32 %v4956_v50  ;;  %v7677_v43 = vmul.f32 %v2936_v61, %v7606_v54  ;;  %2008 = vmatmul.mubr.bf16.gmra.mrb[160].mxu1 %v6200_v57  ;;  %v6202_v44 = vld [vmem:[%s6915_s6 + $0x90] ss:$8 sps:$4 sm:$0xff]  }
 0x253   : > { %v7680_v20 = vpop.f32.mrb[50].mxu0  ;;  %v5850_v51 = vpop.eup %5849  ;;  %5869 = vrcp.f32 %v2561_v3  ;;  %v2565_v42 = vadd.f32 1.0, %v5848_v63  ;;  %v3149_v35 = vpack.c.bf16 %v3061_v9, %v3057_v7  ;;  %2017 = vmatprep.mubr.bf16.mxu1 %v6201_v34  ;;  %v5653_v3 = vld [vmem:[%s6936_s14 + $0x1a0] ss:$8 sps:$4 sm:$0xff]   ;;  %v5655_v9 = vld [vmem:[%s6936_s14 + $0x1a4] ss:$8 sps:$4 sm:$0xff]  }
 0x254   : > { %v7685_v37 = vpop.f32.mrb[51].mxu0  ;;  %v5852_v28 = vpop.eup %5851  ;;  %5871 = vrcp.f32 %v2564_v4  ;;  %v2568_v54 = vadd.f32 1.0, %v5850_v51  ;;  %3772 = vmatpush1.bf16.msra.mxu0 %v5650_v18 }
 0x255   : > { %v5854_v17 = vpop.eup %5853  ;;  %v2937_v48 = vmul.f32 %v5852_v28, %v7566_v25  ;;  %5873 = vrcp.f32 %v2565_v42  ;;  %3682 = vmatprep.mubr.bf16.mxu0 %v3149_v35  ;;  %v7690_v47 = vpop.f32.mrb[56].mxu1  ;;  %3773 = vmatprep.subr.bf16.mxu0 %v5655_v9 }
 0x256   : > { %v5856_v12 = vpop.eup %5855  ;;  %v2940_v22 = vmul.f32 %v5854_v17, %v7569_v11  ;;  %5875 = vrcp.f32 %v2568_v54  ;;  %3683 = vmatmul.mubr.bf16.gmra.mrb[100].mxu0 %v3148_v53  ;;  %v4963_v45 = vmul.f32 -1.442695, %v7690_v47  ;;  %v7694_v5 = vpop.f32.mrb[57].mxu1  ;;  %v6203_v53 = vld [vmem:[%s6915_s6 + $0xa4] ss:$8 sps:$4 sm:$0xff]  }
 0x257   : > { %v5858_v59 = vpop.eup %5857  ;;  %v2941_v39 = vmul.f32 %v5856_v12, %v7572_v13  ;;  %5877 = vpow2.f32 %v4959_v29  ;;  %v3065_v21 = vmul.f32 %v2937_v48, %v7608_v30  ;;  %v4964_v25 = vmul.f32 -1.442695, %v7694_v5  ;;  %v7699_v0 = vpop.f32.mrb[58].mxu1 }
 0x258   : > { %v5860_v56 = vpop.eup %5859  ;;  %v2944_v11 = vmul.f32 %v5858_v59, %v7591_v60  ;;  %5879 = vpow2.f32 %v4960_v58  ;;  %v3068_v8 = vmul.f32 %v2940_v22, %v7612_v62  ;;  %v7703_v38 = vpop.f32.mrb[59].mxu1  ;;  %3774 = vmatpush1.bf16.msra.mxu0 %v5653_v3  ;;  %v5658_v22 = vld [vmem:[%s6936_s14 + $0x1b4] ss:$8 sps:$4 sm:$0xff]  }
 0x259   : > { %v7705_v13 = vpop.f32.mrb[52].mxu0  ;;  %v5862_v7 = vpop.eup %5861  ;;  %v2569_v30 = vadd.f32 1.0, %v5860_v56  ;;  %v3069_v50 = vmul.f32 %v2941_v39, %v7616_v36  ;;  %5881 = vpow2.f32 %v4963_v45  ;;  %v4968_v35 = vmul.f32 -1.442695, %v7703_v38  ;;  %3775 = vmatprep.subr.bf16.mxu0 %v5658_v22  ;;  %v5662_v22 = vld [vmem:[%s6936_s14 + $0x1d0] ss:$8 sps:$4 sm:$0xff]  }
 0x25a   : > { %v7708_v31 = vpop.f32.mrb[53].mxu0  ;;  %v5864_v27 = vpop.eup %5863  ;;  %v2572_v61 = vadd.f32 1.0, %v5862_v7  ;;  %v3152_v60 = vpack.c.bf16 %v3068_v8, %v7677_v43  ;;  %5883 = vpow2.f32 %v4964_v25  ;;  %v7712_v62 = vmul.f32 %v2944_v11, %v7637_v15  ;;  %2018 = vmatmul.mubr.bf16.gmra.mrb[164].mxu1 %v6202_v44  ;;  %v5656_v25 = vld [vmem:[%s6936_s14 + $0x1b0] ss:$8 sps:$4 sm:$0xff]  }
 0x25b   : > { %v7715_v49 = vpop.f32.mrb[54].mxu0  ;;  %v5866_v63 = vpop.eup %5865  ;;  %5885 = vrcp.f32 %v2569_v30  ;;  %v2573_v36 = vadd.f32 1.0, %v5864_v27  ;;  %v3153_v4 = vpack.c.bf16 %v3069_v50, %v3065_v21  ;;  %2027 = vmatprep.mubr.bf16.mxu1 %v6203_v53  ;;  %v4967_v15 = vmul.f32 -1.442695, %v7699_v0  ;;  %v6204_v30 = vld [vmem:[%s6915_s6 + $0xa0] ss:$8 sps:$4 sm:$0xff]  }
 0x25c   : > { %v7720_v57 = vpop.f32.mrb[55].mxu0  ;;  %v5868_v24 = vpop.eup %5867  ;;  %5887 = vrcp.f32 %v2572_v61  ;;  %v2576_v43 = vadd.f32 1.0, %v5866_v63  ;;  %3776 = vmatpush1.bf16.msra.mxu0 %v5656_v25 }
 0x25d   : > { %v5870_v51 = vpop.eup %5869  ;;  %5889 = vrcp.f32 %v2573_v36  ;;  %v2577_v42 = vadd.f32 1.0, %v5868_v24  ;;  %3692 = vmatprep.mubr.bf16.mxu0 %v3153_v4  ;;  %v7724_v29 = vpop.f32.mrb[60].mxu1  ;;  %v5659_v4 = vld [vmem:[%s6936_s14 + $0x1c0] ss:$8 sps:$4 sm:$0xff]  }
 0x25e   : > { %v5872_v34 = vpop.eup %5871  ;;  %v2945_v18 = vmul.f32 %v5870_v51, %v7598_v6  ;;  %5891 = vrcp.f32 %v2576_v43  ;;  %3693 = vmatmul.mubr.bf16.gmra.mrb[104].mxu0 %v3152_v60  ;;  %v4971_v28 = vmul.f32 -1.442695, %v7724_v29  ;;  %v7728_v54 = vpop.f32.mrb[61].mxu1  ;;  %v6205_v60 = vld [vmem:[%s6915_s6 + $0xb4] ss:$8 sps:$4 sm:$0xff]  }
 0x25f   : > { %v5874_v58 = vpop.eup %5873  ;;  %v2948_v17 = vmul.f32 %v5872_v34, %v7601_v26  ;;  %5893 = vrcp.f32 %v2577_v42  ;;  %v4972_v48 = vmul.f32 -1.442695, %v7728_v54  ;;  %v7732_v12 = vpop.f32.mrb[62].mxu1 }
 0x260   : > { %v5876_v45 = vpop.eup %5875  ;;  %v2949_v59 = vmul.f32 %v5874_v58, %v7604_v46  ;;  %5895 = vpow2.f32 %v4967_v15  ;;  %v3073_v6 = vmul.f32 %v2945_v18, %v7640_v23  ;;  %v7737_v39 = vpop.f32.mrb[63].mxu1  ;;  %v4975_v36 = vmul.f32 -1.442695, %v7732_v12  ;;  %v5664_v18 = vld [vmem:[%s6936_s14 + $0x1d4] ss:$8 sps:$4 sm:$0xff]  }
 0x261   : > { %v7739_v21 = vpop.f32.mrb[56].mxu0  ;;  %v5878_v56 = vpop.eup %5877  ;;  %v2952_v26 = vmul.f32 %v5876_v45, %v7621_v33  ;;  %5897 = vpow2.f32 %v4968_v35  ;;  %v3076_v11 = vmul.f32 %v2948_v17, %v7644_v10  ;;  %v4976_v24 = vmul.f32 -1.442695, %v7737_v39 }
 0x262   : > { %v7744_v8 = vpop.f32.mrb[57].mxu0  ;;  %v5880_v46 = vpop.eup %5879  ;;  %v2580_v7 = vadd.f32 1.0, %v5878_v56  ;;  %v3077_v23 = vmul.f32 %v2949_v59, %v7648_v55  ;;  %5899 = vpow2.f32 %v4971_v28  ;;  %2028 = vmatmul.mubr.bf16.gmra.mrb[168].mxu1 %v6204_v30  ;;  %v5661_v55 = vld [vmem:[%s6936_s14 + $0x1c4] ss:$8 sps:$4 sm:$0xff]   ;;  %v6206_v56 = vld [vmem:[%s6915_s6 + $0xb0] ss:$8 sps:$4 sm:$0xff]  }
 0x263   : > { %v7748_v50 = vpop.f32.mrb[58].mxu0  ;;  %v5882_v33 = vpop.eup %5881  ;;  %v2581_v27 = vadd.f32 1.0, %v5880_v46  ;;  %v3156_v10 = vpack.c.bf16 %v3076_v11, %v7712_v62  ;;  %5901 = vpow2.f32 %v4972_v48  ;;  %v7752_v61 = vmul.f32 %v2952_v26, %v7671_v16  ;;  %2037 = vmatprep.mubr.bf16.mxu1 %v6205_v60  ;;  %3777 = vmatprep.subr.bf16.mxu0 %v5661_v55  ;;  %v5667_v30 = vld [vmem:[%s6936_s14 + $0x1e4] ss:$8 sps:$4 sm:$0xff]  }
 0x264   : > { %v7755_v44 = vpop.f32.mrb[59].mxu0  ;;  %v5884_v3 = vpop.eup %5883  ;;  %5903 = vrcp.f32 %v2580_v7  ;;  %v2584_v9 = vadd.f32 1.0, %v5882_v33  ;;  %v3157_v63 = vpack.c.bf16 %v3077_v23, %v3073_v6  ;;  %3778 = vmatpush1.bf16.msra.mxu0 %v5659_v4  ;;  %v6207_v7 = vld [vmem:[%s6915_s6 + $0xc4] ss:$8 sps:$4 sm:$0xff]   ;;  %v5670_v4 = vld [vmem:[%s6936_s14 + $0x1f4] ss:$8 sps:$4 sm:$0xff]  }
 0x265   : > { %v5886_v53 = vpop.eup %5885  ;;  %5905 = vrcp.f32 %v2581_v27  ;;  %v2585_v62 = vadd.f32 1.0, %v5884_v3  ;;  %v7761_v16 = vpop.f32.mrb[64].mxu1  ;;  %3779 = vmatprep.subr.bf16.mxu0 %v5664_v18 }
 0x266   : > { %v5888_v43 = vpop.eup %5887  ;;  %v2953_v15 = vmul.f32 %v5886_v53, %v7626_v52  ;;  %5907 = vrcp.f32 %v2584_v9  ;;  %3702 = vmatprep.mubr.bf16.mxu0 %v3157_v63  ;;  %v7764_v51 = vpop.f32.mrb[65].mxu1 }
 0x267   : > { %v5890_v42 = vpop.eup %5889  ;;  %v2956_v35 = vmul.f32 %v5888_v43, %v7631_v32  ;;  %5909 = vrcp.f32 %v2585_v62  ;;  %3703 = vmatmul.mubr.bf16.gmra.mrb[108].mxu0 %v3156_v10  ;;  %v7767_v34 = vpop.f32.mrb[66].mxu1  ;;  %v5665_v10 = vld [vmem:[%s6936_s14 + $0x1e0] ss:$8 sps:$4 sm:$0xff]   ;;  %v5668_v43 = vld [vmem:[%s6936_s14 + $0x1f0] ss:$8 sps:$4 sm:$0xff]  }
 0x268   : > { %v5892_v28 = vpop.eup %5891  ;;  %v2957_v58 = vmul.f32 %v5890_v42, %v7635_v14  ;;  %5911 = vpow2.f32 %v4975_v36  ;;  %v3081_v52 = vmul.f32 %v2953_v15, %v7674_v2  ;;  %v7772_v17 = vpop.f32.mrb[67].mxu1  ;;  %3780 = vmatpush1.bf16.msra.mxu0 %v5662_v22 }
 0x269   : > { %v7774_v48 = vpop.f32.mrb[60].mxu0  ;;  %v5894_v45 = vpop.eup %5893  ;;  %v2960_v32 = vmul.f32 %v5892_v28, %v7653_v40  ;;  %5913 = vpow2.f32 %v4976_v24  ;;  %v3084_v59 = vmul.f32 %v2956_v35, %v7680_v20  ;;  %3781 = vmatprep.subr.bf16.mxu0 %v5667_v30 }
 0x26a   : > { %v7779_v6 = vpop.f32.mrb[61].mxu0  ;;  %v5896_v14 = vpop.eup %5895  ;;  %v2961_v25 = vmul.f32 %v5894_v45, %v7658_v41  ;;  %v3085_v2 = vmul.f32 %v2957_v58, %v7685_v37  ;;  %2038 = vmatmul.mubr.bf16.gmra.mrb[172].mxu1 %v6206_v56  ;;  %v6208_v58 = vld [vmem:[%s6915_s6 + $0xc0] ss:$8 sps:$4 sm:$0xff]  }
 0x26b   : > { %v7784_v26 = vpop.f32.mrb[62].mxu0  ;;  %v5898_v40 = vpop.eup %5897  ;;  %v2588_v11 = vadd.f32 1.0, %v5896_v14  ;;  %v3160_v46 = vpack.c.bf16 %v3084_v59, %v7752_v61  ;;  %v3088_v20 = vmul.f32 %v2960_v32, %v7705_v13  ;;  %2047 = vmatprep.mubr.bf16.mxu1 %v6207_v7  ;;  %v6209_v32 = vld [vmem:[%s6915_s6 + $0xd4] ss:$8 sps:$4 sm:$0xff]   ;;  %v6210_v7 = vld [vmem:[%s6915_s6 + $0xd0] ss:$8 sps:$4 sm:$0xff]  }
 0x26c   : > { %v7789_v23 = vpop.f32.mrb[63].mxu0  ;;  %v5900_v41 = vpop.eup %5899  ;;  %v2589_v33 = vadd.f32 1.0, %v5898_v40  ;;  %v3161_v37 = vpack.c.bf16 %v3085_v2, %v3081_v52  ;;  %v3089_v27 = vmul.f32 %v2961_v25, %v7708_v31  ;;  %3782 = vmatpush1.bf16.msra.mxu0 %v5665_v10 }
 0x26d   : > { %v5902_v60 = vpop.eup %5901  ;;  %5915 = vrcp.f32 %v2588_v11  ;;  %v2592_v55 = vadd.f32 1.0, %v5900_v41  ;;  %v7794_v3 = vpop.f32.mrb[68].mxu1  ;;  %3783 = vmatprep.subr.bf16.mxu0 %v5670_v4 }
 0x26e   : > { %v5904_v61 = vpop.eup %5903  ;;  %5917 = vrcp.f32 %v2589_v33  ;;  %v2593_v13 = vadd.f32 1.0, %v5902_v60  ;;  %3712 = vmatprep.mubr.bf16.mxu0 %v3161_v37  ;;  %v7796_v9 = vpop.f32.mrb[69].mxu1  ;;  %v6211_v33 = vld [vmem:[%s6915_s6 + $0xe4] ss:$8 sps:$4 sm:$0xff]  }
 0x26f   : > { %v5906_v63 = vpop.eup %5905  ;;  %v2964_v36 = vmul.f32 %v5904_v61, %v7664_v19  ;;  %5919 = vrcp.f32 %v2592_v55  ;;  %3713 = vmatmul.mubr.bf16.gmra.mrb[112].mxu0 %v3160_v46  ;;  %v7799_v31 = vpop.f32.mrb[70].mxu1 }
 0x270   : > { %v5908_v53 = vpop.eup %5907  ;;  %v2965_v62 = vmul.f32 %v5906_v63, %v7669_v1  ;;  %5921 = vrcp.f32 %v2593_v13  ;;  %v7803_v24 = vpop.f32.mrb[71].mxu1  ;;  %3784 = vmatpush1.bf16.msra.mxu0 %v5668_v43  ;;  %v6213_v63 = vld [vmem:[%s6915_s6 + $0xf4] ss:$8 sps:$4 sm:$0xff]  }
 0x271   : > { %v5910_v15 = vpop.eup %5909  ;;  %v2968_v42 = vmul.f32 %v5908_v53, %v7690_v47  ;;  %v3092_v35 = vmul.f32 %v2964_v36, %v7715_v49 }
 0x272   : > { %v5912_v19 = vpop.eup %5911  ;;  %v2969_v18 = vmul.f32 %v5910_v15, %v7694_v5  ;;  %v3093_v28 = vmul.f32 %v2965_v62, %v7720_v57  ;;  %2048 = vmatmul.mubr.bf16.gmra.mrb[176].mxu1 %v6208_v58 }
 0x273   : > { %v5914_v1 = vpop.eup %5913  ;;  %v2596_v52 = vadd.f32 1.0, %v5912_v19  ;;  %v3164_v22 = vpack.c.bf16 %v3092_v35, %v3088_v20  ;;  %v3096_v45 = vmul.f32 %v2968_v42, %v7739_v21  ;;  %2057 = vmatprep.mubr.bf16.mxu1 %v6209_v32 }
 0x274   : > { %v2597_v59 = vadd.f32 1.0, %v5914_v1  ;;  %v3165_v47 = vpack.c.bf16 %v3093_v28, %v3089_v27  ;;  %v3097_v49 = vmul.f32 %v2969_v18, %v7744_v8 }
 0x275   : > { %5923 = vrcp.f32 %v2596_v52  ;;  %v7814_v14 = vpop.f32.mrb[72].mxu1 }
 0x276   : > { %5925 = vrcp.f32 %v2597_v59  ;;  %3722 = vmatprep.mubr.bf16.mxu0 %v3165_v47  ;;  %v7816_v5 = vpop.f32.mrb[73].mxu1 }
 0x277   : > { %v5916_v57 = vpop.eup %5915  ;;  %3723 = vmatmul.mubr.bf16.gmra.mrb[116].mxu0 %v3164_v22  ;;  %v7818_v25 = vpop.f32.mrb[74].mxu1 }
 0x278   : > { %v5918_v21 = vpop.eup %5917  ;;  %v2972_v2 = vmul.f32 %v5916_v57, %v7699_v0  ;;  %v7821_v56 = vpop.f32.mrb[75].mxu1 }
 0x279   : > { %v5920_v40 = vpop.eup %5919  ;;  %v2973_v8 = vmul.f32 %v5918_v21, %v7703_v38 }
 0x27a   : > { %v5922_v11 = vpop.eup %5921  ;;  %v2976_v46 = vmul.f32 %v5920_v40, %v7724_v29  ;;  %v3100_v20 = vmul.f32 %v2972_v2, %v7748_v50  ;;  %2058 = vmatmul.mubr.bf16.gmra.mrb[180].mxu1 %v6210_v7 }
 0x27b   : > { %v2977_v30 = vmul.f32 %v5922_v11, %v7728_v54  ;;  %v3101_v41 = vmul.f32 %v2973_v8, %v7755_v44  ;;  %2067 = vmatprep.mubr.bf16.mxu1 %v6211_v33  ;;  %v4854_v33 = vmul.f32 -1.442695, %v7764_v51 }
 0x27c   : > { %v3168_v0 = vpack.c.bf16 %v3100_v20, %v3096_v45  ;;  %v3104_v37 = vmul.f32 %v2976_v46, %v7774_v48 }
 0x27d   : > { %v3169_v27 = vpack.c.bf16 %v3101_v41, %v3097_v49  ;;  %v3105_v38 = vmul.f32 %v2977_v30, %v7779_v6  ;;  %v7832_v10 = vpop.f32.mrb[76].mxu1  ;;  %v6212_v6 = vld [vmem:[%s6915_s6 + $0xe0] ss:$8 sps:$4 sm:$0xff]   ;;  %v4853_v30 = vmul.f32 -1.442695, %v7761_v16 }
 0x27e   : > { %v7834_v29 = vpop.f32.mrb[77].mxu1 }
 0x27f   : > { %v5924_v50 = vpop.eup %5923  ;;  %3732 = vmatprep.mubr.bf16.mxu0 %v3169_v27  ;;  %v7836_v60 = vpop.f32.mrb[78].mxu1  ;;  %5927 = vpow2.f32 %v4853_v30  ;;  %v4858_v27 = vmul.f32 -1.442695, %v7772_v17 }
 0x280   : > { %v5926_v54 = vpop.eup %5925  ;;  %v2980_v44 = vmul.f32 %v5924_v50, %v7732_v12  ;;  %3733 = vmatmul.mubr.bf16.gmra.mrb[120].mxu0 %v3168_v0  ;;  %v7839_v55 = vpop.f32.mrb[79].mxu1  ;;  %5929 = vpow2.f32 %v4854_v33 }
 0x281   : > { %v2981_v48 = vmul.f32 %v5926_v54, %v7737_v39  ;;  %v6214_v39 = vld [vmem:[%s6915_s6 + $0xf0] ss:$8 sps:$4 sm:$0xff]  }
 0x282   : > { %v3108_v61 = vmul.f32 %v2980_v44, %v7784_v26  ;;  %2068 = vmatmul.mubr.bf16.gmra.mrb[184].mxu1 %v6212_v6  ;;  %v4862_v44 = vmul.f32 -1.442695, %v7796_v9  ;;  %v4865_v6 = vmul.f32 -1.442695, %v7799_v31 }
 0x283   : > { %v3109_v13 = vmul.f32 %v2981_v48, %v7789_v23  ;;  %2077 = vmatprep.mubr.bf16.mxu1 %v6213_v63 }
 0x284   : > { %v3172_v36 = vpack.c.bf16 %v3108_v61, %v3104_v37  ;;  %v4857_v37 = vmul.f32 -1.442695, %v7767_v34 }
 0x285   : > { %v3173_v4 = vpack.c.bf16 %v3109_v13, %v3105_v38  ;;  %v7846_v53 = vpop.f32.mrb[80].mxu1  ;;  %v4861_v38 = vmul.f32 -1.442695, %v7794_v3  ;;  %v4866_v13 = vmul.f32 -1.442695, %v7803_v24 }
 0x286   : > { %v7848_v62 = vpop.f32.mrb[81].mxu1  ;;  %5931 = vpow2.f32 %v4857_v37  ;;  %v4870_v37 = vmul.f32 -1.442695, %v7816_v5 }
 0x287   : > { %3742 = vmatprep.mubr.bf16.mxu0 %v3173_v4  ;;  %v7850_v12 = vpop.f32.mrb[82].mxu1  ;;  %5933 = vpow2.f32 %v4858_v27 }
 0x288   : > { %3743 = vmatmul.mubr.bf16.gmra.mrb[124].mxu0 %v3172_v36  ;;  %v7852_v43 = vpop.f32.mrb[83].mxu1  ;;  %5935 = vpow2.f32 %v4861_v38  ;;  %v4869_v36 = vmul.f32 -1.442695, %v7814_v14 }
 0x289   : > { %5937 = vpow2.f32 %v4862_v44  ;;  %v5928_v63 = vpop.eup %5927 }
 0x28a   : > { %2078 = vmatmul.mubr.bf16.gmra.mrb[188].mxu1 %v6214_v39  ;;  %v5930_v39 = vpop.eup %5929  ;;  %5939 = vpow2.f32 %v4865_v6  ;;  %v2474_v38 = vadd.f32 1.0, %v5928_v63 }
 0x28b   : > { %5941 = vpow2.f32 %v4866_v13 }
 0x28c   : > { %5943 = vpow2.f32 %v4869_v36  ;;  %v4877_v36 = vmul.f32 -1.442695, %v7832_v10 }
 0x28d   : > { %v7855_v26 = vpop.f32.mrb[84].mxu1  ;;  %5945 = vpow2.f32 %v4870_v37 }
 0x28e   : > { %v7857_v15 = vpop.f32.mrb[85].mxu1  ;;  %5947 = vrcp.f32 %v2474_v38 }
 0x28f   : > { %v7859_v23 = vpop.f32.mrb[86].mxu1 }
 0x290   : > { %v7861_v42 = vpop.f32.mrb[87].mxu1  ;;  %v5932_v33 = vpop.eup %5931 }
 0x295   : > { %v7863_v35 = vpop.f32.mrb[88].mxu1 }
 0x296   : > { %v7865_v19 = vpop.f32.mrb[89].mxu1 }
 0x297   : > { %v7867_v18 = vpop.f32.mrb[90].mxu1 }
 0x298   : > { %v7869_v28 = vpop.f32.mrb[91].mxu1 }
 0x29d   : > { %v7871_v58 = vpop.f32.mrb[92].mxu1 }
 0x29e   : > { %v7873_v1 = vpop.f32.mrb[93].mxu1 }
 0x29f   : > { %v7875_v52 = vpop.f32.mrb[94].mxu1 }
 0x2a0   : > { %v7877_v22 = vpop.f32.mrb[95].mxu1 }
 0x2a5   : > { %v7879_v45 = vpop.f32.mrb[96].mxu1 }
 0x2a6   : > { %v7881_v32 = vpop.f32.mrb[97].mxu1 }
 0x2a7   : > { %v7883_v59 = vpop.f32.mrb[98].mxu1 }
 0x2a8   : > { %v7885_v47 = vpop.f32.mrb[99].mxu1 }
 0x2ad   : > { %v7887_v49 = vpop.f32.mrb[100].mxu1 }
 0x2ae   : > { %v7889_v57 = vpop.f32.mrb[101].mxu1 }
 0x2af   : > { %v7891_v21 = vpop.f32.mrb[102].mxu1 }
 0x2b0   : > { %v7893_v2 = vpop.f32.mrb[103].mxu1 }
 0x2b5   : > { %v7895_v40 = vpop.f32.mrb[104].mxu1 }
 0x2b6   : > { %8581 = vst [vmem:[#allocation31_spill] sm:$0xff] %v7895_v40  ;;  %v7897_v8 = vpop.f32.mrb[105].mxu1 }
 0x2b7   : > { %8582 = vst [vmem:[#allocation32_spill] sm:$0xff] %v7897_v8  ;;  %v7899_v11 = vpop.f32.mrb[106].mxu1 }
 0x2b8   : > { %8583 = vst [vmem:[#allocation33_spill] sm:$0xff] %v7899_v11  ;;  %v7901_v46 = vpop.f32.mrb[107].mxu1 }
 0x2b9   : > { %8584 = vst [vmem:[#allocation34_spill] sm:$0xff] %v7901_v46  ;;  %v4893_v46 = vmul.f32 -1.442695, %v7855_v26 }
 0x2bd   : > { %v7903_v20 = vpop.f32.mrb[108].mxu1 }
 0x2be   : > { %8585 = vst [vmem:[#allocation35_spill] sm:$0xff] %v7903_v20  ;;  %v7905_v7 = vpop.f32.mrb[109].mxu1 }
 0x2bf   : > { %8586 = vst [vmem:[#allocation36_spill] sm:$0xff] %v7905_v7  ;;  %v7908_v41 = vpop.f32.mrb[110].mxu1 }
 0x2c0   : > { %8587 = vst [vmem:[#allocation37_spill] sm:$0xff] %v7908_v41  ;;  %v7911_v0 = vpop.f32.mrb[111].mxu1 }
 0x2c1   : > { %8588 = vst [vmem:[#allocation38_spill] sm:$0xff] %v7911_v0 }
 0x2c5   : > { %v7916_v50 = vpop.f32.mrb[112].mxu1 }
 0x2c6   : > { %8589 = vst [vmem:[#allocation39_spill] sm:$0xff] %v7916_v50  ;;  %v7918_v54 = vpop.f32.mrb[113].mxu1 }
 0x2c7   : > { %8590 = vst [vmem:[#allocation40_spill] sm:$0xff] %v7918_v54  ;;  %v7921_v48 = vpop.f32.mrb[114].mxu1  ;;  %v2478_v54 = vadd.f32 1.0, %v5932_v33 }
 0x2c8   : > { %8591 = vst [vmem:[#allocation41_spill] sm:$0xff] %v7921_v48  ;;  %v7923_v61 = vpop.f32.mrb[115].mxu1  ;;  %v5934_v48 = vpop.eup %5933 }
 0x2c9   : > { %8592 = vst [vmem:[#allocation42_spill] sm:$0xff] %v7923_v61  ;;  %v2475_v61 = vadd.f32 1.0, %v5930_v39  ;;  %v5936_v50 = vpop.eup %5935  ;;  %v2479_v0 = vadd.f32 1.0, %v5934_v48 }
 0x2ca   : > { %v5938_v6 = vpop.eup %5937  ;;  %v2482_v13 = vadd.f32 1.0, %v5936_v50 }
 0x2cb   : > { %5949 = vrcp.f32 %v2475_v61  ;;  %v2483_v33 = vadd.f32 1.0, %v5938_v6  ;;  %v5940_v38 = vpop.eup %5939  ;;  %v4878_v61 = vmul.f32 -1.442695, %v7834_v29 }
 0x2cc   : > { %5951 = vrcp.f32 %v2478_v54  ;;  %v5942_v48 = vpop.eup %5941  ;;  %v4881_v54 = vmul.f32 -1.442695, %v7836_v60 }
 0x2cd   : > { %v7928_v4 = vpop.f32.mrb[116].mxu1  ;;  %v5944_v50 = vpop.eup %5943 }
 0x2ce   : > { %8593 = vst [vmem:[#allocation43_spill] sm:$0xff] %v7928_v4  ;;  %v7930_v30 = vpop.f32.mrb[117].mxu1  ;;  %v4873_v4 = vmul.f32 -1.442695, %v7818_v25 }
 0x2cf   : > { %8594 = vst [vmem:[#allocation44_spill] sm:$0xff] %v7930_v30  ;;  %v7933_v27 = vpop.f32.mrb[118].mxu1  ;;  %v4874_v30 = vmul.f32 -1.442695, %v7821_v56 }
 0x2d0   : > { %8595 = vst [vmem:[#allocation45_spill] sm:$0xff] %v7933_v27  ;;  %v7935_v44 = vpop.f32.mrb[119].mxu1  ;;  %5953 = vpow2.f32 %v4873_v4  ;;  %v4882_v4 = vmul.f32 -1.442695, %v7839_v55 }
 0x2d1   : > { %8596 = vst [vmem:[#allocation46_spill] sm:$0xff] %v7935_v44  ;;  %5955 = vpow2.f32 %v4874_v30 }
 0x2d2   : > { %5957 = vrcp.f32 %v2479_v0 }
 0x2d3   : > { %5959 = vrcp.f32 %v2482_v13  ;;  %v4885_v13 = vmul.f32 -1.442695, %v7846_v53 }
 0x2d4   : > { %5961 = vpow2.f32 %v4877_v36 }
 0x2d5   : > { %v7939_v41 = vpop.f32.mrb[120].mxu1  ;;  %5963 = vrcp.f32 %v2483_v33 }
 0x2d6   : > { %8597 = vst [vmem:[#allocation47_spill] sm:$0xff] %v7939_v41  ;;  %v7941_v63 = vpop.f32.mrb[121].mxu1  ;;  %v5946_v41 = vpop.eup %5945  ;;  %5965 = vpow2.f32 %v4878_v61  ;;  %v4886_v61 = vmul.f32 -1.442695, %v7848_v62 }
 0x2d7   : > { %8598 = vst [vmem:[#allocation48_spill] sm:$0xff] %v7941_v63  ;;  %v7944_v39 = vpop.f32.mrb[122].mxu1  ;;  %v2486_v63 = vadd.f32 1.0, %v5940_v38  ;;  %v5948_v6 = vpop.eup %5947  ;;  %5967 = vpow2.f32 %v4881_v54  ;;  %v2491_v33 = vadd.f32 1.0, %v5946_v41  ;;  %v4889_v54 = vmul.f32 -1.442695, %v7850_v12 }
 0x2d8   : > { %8599 = vst [vmem:[#allocation49_spill] sm:$0xff] %v7944_v39  ;;  %v7946_v37 = vpop.f32.mrb[123].mxu1  ;;  %v2487_v39 = vadd.f32 1.0, %v5942_v48  ;;  %v5950_v44 = vpop.eup %5949  ;;  %5969 = vpow2.f32 %v4882_v4  ;;  %v4890_v4 = vmul.f32 -1.442695, %v7852_v43 }
 0x2d9   : > { %8600 = vst [vmem:[#allocation50_spill] sm:$0xff] %v7946_v37  ;;  %v2490_v37 = vadd.f32 1.0, %v5944_v50  ;;  %v5952_v36 = vpop.eup %5951  ;;  %5971 = vrcp.f32 %v2486_v63 }
 0x2da   : > { %v5954_v48 = vpop.eup %5953  ;;  %5973 = vrcp.f32 %v2487_v39 }
 0x2db   : > { %5975 = vrcp.f32 %v2490_v37  ;;  %v2494_v63 = vadd.f32 1.0, %v5954_v48  ;;  %v2862_v37 = vmul.f32 %v5952_v36, %v7767_v34  ;;  %v4897_v34 = vmul.f32 -1.442695, %v7859_v23 }
 0x2dc   : > { %5977 = vpow2.f32 %v4885_v13 }
 0x2dd   : > { %v7951_v30 = vpop.f32.mrb[124].mxu1  ;;  %5979 = vrcp.f32 %v2491_v33 }
 0x2de   : > { %8601 = vst [vmem:[#allocation51_spill] sm:$0xff] %v7951_v30  ;;  %v7953_v0 = vpop.f32.mrb[125].mxu1  ;;  %v5956_v30 = vpop.eup %5955  ;;  %5981 = vpow2.f32 %v4886_v61 }
 0x2df   : > { %8602 = vst [vmem:[#allocation52_spill] sm:$0xff] %v7953_v0  ;;  %v7956_v27 = vpop.f32.mrb[126].mxu1  ;;  %v5958_v50 = vpop.eup %5957  ;;  %v2495_v7 = vadd.f32 1.0, %v5956_v30  ;;  %5983 = vpow2.f32 %v4889_v54 }
 0x2e0   : > { %8603 = vst [vmem:[#allocation53_spill] sm:$0xff] %v7956_v27  ;;  %v7958_v38 = vpop.f32.mrb[127].mxu1  ;;  %v5960_v0 = vpop.eup %5959  ;;  %v2858_v27 = vmul.f32 %v5948_v6, %v7761_v16  ;;  %v2863_v40 = vmul.f32 %v5958_v50, %v7772_v17  ;;  %5985 = vpow2.f32 %v4890_v4  ;;  %v4894_v16 = vmul.f32 -1.442695, %v7857_v15 }
 0x2e1   : > { %8604 = vst [vmem:[#allocation54_spill] sm:$0xff] %v7958_v38  ;;  %v5962_v41 = vpop.eup %5961  ;;  %v2859_v38 = vmul.f32 %v5950_v44, %v7764_v51  ;;  %5987 = vrcp.f32 %v2494_v63 }
 0x2e2   : > { %v5964_v20 = vpop.eup %5963  ;;  %v2498_v44 = vadd.f32 1.0, %v5962_v41  ;;  %5989 = vrcp.f32 %v2495_v7  ;;  %v4898_v7 = vmul.f32 -1.442695, %v7861_v42 }
 0x2e3   : > { %v5966_v8 = vpop.eup %5965  ;;  %5991 = vpow2.f32 %v4893_v46 }
 0x2e4   : > { %v5968_v51 = vpop.eup %5967  ;;  %v2499_v54 = vadd.f32 1.0, %v5966_v8  ;;  %5993 = vpow2.f32 %v4894_v16 }
 0x2e5   : > { %v1929_v39 = vpop.f32.mrb[128].mxu1  ;;  %v5970_v61 = vpop.eup %5969  ;;  %v2502_v50 = vadd.f32 1.0, %v5968_v51  ;;  %5995 = vrcp.f32 %v2498_v44 }
 0x2e6   : > { %v2986_v13 = vmul.f32 %v2858_v27, %v1929_v39  ;;  %v1931_v11 = vpop.f32.mrb[129].mxu1  ;;  %v5972_v27 = vpop.eup %5971  ;;  %v2503_v63 = vadd.f32 1.0, %v5970_v61  ;;  %5997 = vpow2.f32 %v4897_v34  ;;  %v4905_v61 = vmul.f32 -1.442695, %v7867_v18 }
 0x2e7   : > { %v2987_v6 = vmul.f32 %v2859_v38, %v1931_v11  ;;  %v1933_v33 = vpop.f32.mrb[130].mxu1  ;;  %v5974_v17 = vpop.eup %5973  ;;  %v2866_v38 = vmul.f32 %v5960_v0, %v7794_v3  ;;  %v2870_v46 = vmul.f32 %v5972_v27, %v7799_v31  ;;  %5999 = vrcp.f32 %v2499_v54 }
 0x2e8   : > { %v2990_v30 = vmul.f32 %v2862_v37, %v1933_v33  ;;  %v1935_v48 = vpop.f32.mrb[131].mxu1  ;;  %v5976_v11 = vpop.eup %5975  ;;  %v2867_v37 = vmul.f32 %v5964_v20, %v7796_v9  ;;  %v2871_v0 = vmul.f32 %v5974_v17, %v7803_v24  ;;  %6001 = vrcp.f32 %v2502_v50 }
 0x2e9   : > { %v2991_v36 = vmul.f32 %v2863_v40, %v1935_v48  ;;  %v5978_v41 = vpop.eup %5977  ;;  %v4902_v9 = vmul.f32 -1.442695, %v7865_v19  ;;  %6003 = vrcp.f32 %v2503_v63 }
 0x2ea   : > { %v3114_v39 = vpack.c.bf16 %v2990_v30, %v2986_v13  ;;  %v5980_v8 = vpop.eup %5979  ;;  %v4901_v13 = vmul.f32 -1.442695, %v7863_v35  ;;  %v2506_v44 = vadd.f32 1.0, %v5978_v41  ;;  %6005 = vpow2.f32 %v4898_v7 }
 0x2eb   : > { %v3115_v4 = vpack.c.bf16 %v2991_v36, %v2987_v6  ;;  %v5982_v3 = vpop.eup %5981  ;;  %v2875_v41 = vmul.f32 %v5980_v8, %v7816_v5 }
 0x2ec   : > { %v5984_v51 = vpop.eup %5983  ;;  %v2507_v27 = vadd.f32 1.0, %v5982_v3  ;;  %6007 = vpow2.f32 %v4901_v13  ;;  %v4909_v13 = vmul.f32 -1.442695, %v7871_v58 }
 0x2ed   : > { %v1939_v40 = vpop.f32.mrb[132].mxu1  ;;  %3785 = vmatprep.mubr.bf16.mxu0 %v3115_v4  ;;  %v5986_v31 = vpop.eup %5985  ;;  %6009 = vpow2.f32 %v4902_v9  ;;  %v2874_v4 = vmul.f32 %v5976_v11, %v7814_v14 }
 0x2ee   : > { %v2994_v16 = vmul.f32 %v2866_v38, %v1939_v40  ;;  %v1941_v6 = vpop.f32.mrb[133].mxu1  ;;  %3786 = vmatmul.mubr.bf16.vlgmr.msra.gmra.mrb[64].mxu0 %v3114_v39  ;;  %v5988_v36 = vpop.eup %5987  ;;  %v2510_v39 = vadd.f32 1.0, %v5984_v51  ;;  %6011 = vrcp.f32 %v2506_v44  ;;  %v2511_v38 = vadd.f32 1.0, %v5986_v31 }
 0x2ef   : > { %v2995_v20 = vmul.f32 %v2867_v37, %v1941_v6  ;;  %v1943_v33 = vpop.f32.mrb[134].mxu1  ;;  %v5990_v24 = vpop.eup %5989  ;;  %6013 = vpow2.f32 %v4905_v61  ;;  %v4906_v37 = vmul.f32 -1.442695, %v7869_v28 }
 0x2f0   : > { %v2998_v30 = vmul.f32 %v2870_v46, %v1943_v33  ;;  %v1945_v48 = vpop.f32.mrb[135].mxu1  ;;  %v5992_v50 = vpop.eup %5991  ;;  %v2878_v46 = vmul.f32 %v5988_v36, %v7818_v25  ;;  %6015 = vrcp.f32 %v2507_v27  ;;  %v2879_v11 = vmul.f32 %v5990_v24, %v7821_v56 }
 0x2f1   : > { %v2999_v34 = vmul.f32 %v2871_v0, %v1945_v48  ;;  %v5994_v63 = vpop.eup %5993  ;;  %6017 = vrcp.f32 %v2510_v39  ;;  %v2514_v3 = vadd.f32 1.0, %v5992_v50  ;;  %v4910_v25 = vmul.f32 -1.442695, %v7873_v1 }
 0x2f2   : > { %v3118_v54 = vpack.c.bf16 %v2998_v30, %v2994_v16  ;;  %v5996_v40 = vpop.eup %5995  ;;  %6019 = vrcp.f32 %v2511_v38  ;;  %v2515_v9 = vadd.f32 1.0, %v5994_v63  ;;  %v4913_v56 = vmul.f32 -1.442695, %v7875_v52 }
 0x2f3   : > { %v3119_v17 = vpack.c.bf16 %v2999_v34, %v2995_v20  ;;  %v5998_v14 = vpop.eup %5997  ;;  %6021 = vpow2.f32 %v4906_v37  ;;  %v2882_v27 = vmul.f32 %v5996_v40, %v7832_v10 }
 0x2f4   : > { %v6000_v0 = vpop.eup %5999  ;;  %v2518_v48 = vadd.f32 1.0, %v5998_v14  ;;  %6023 = vpow2.f32 %v4909_v13 }
 0x2f5   : > { %v1949_v7 = vpop.f32.mrb[136].mxu1  ;;  %3795 = vmatprep.mubr.bf16.mxu0 %v3119_v17  ;;  %v6002_v51 = vpop.eup %6001  ;;  %6025 = vrcp.f32 %v2514_v3  ;;  %v2883_v39 = vmul.f32 %v6000_v0, %v7834_v29  ;;  %v4917_v17 = vmul.f32 -1.442695, %v7879_v45 }
 0x2f6   : > { %v3002_v16 = vmul.f32 %v2874_v4, %v1949_v7  ;;  %v1951_v6 = vpop.f32.mrb[137].mxu1  ;;  %3796 = vmatmul.mubr.bf16.gmra.mrb[68].mxu0 %v3118_v54  ;;  %v6004_v30 = vpop.eup %6003  ;;  %6027 = vrcp.f32 %v2515_v9  ;;  %v4914_v54 = vmul.f32 -1.442695, %v7877_v22  ;;  %v2886_v38 = vmul.f32 %v6002_v51, %v7836_v60 }
 0x2f7   : > { %v3003_v5 = vmul.f32 %v2875_v41, %v1951_v6  ;;  %v1953_v8 = vpop.f32.mrb[138].mxu1  ;;  %v6006_v61 = vpop.eup %6005  ;;  %6029 = vpow2.f32 %v4910_v25  ;;  %v2887_v7 = vmul.f32 %v6004_v30, %v7839_v55  ;;  %v4918_v60 = vmul.f32 -1.442695, %v7881_v32 }
 0x2f8   : > { %v3006_v20 = vmul.f32 %v2878_v46, %v1953_v8  ;;  %v1955_v33 = vpop.f32.mrb[139].mxu1  ;;  %v6008_v36 = vpop.eup %6007  ;;  %6031 = vrcp.f32 %v2518_v48  ;;  %v2519_v63 = vadd.f32 1.0, %v6006_v61  ;;  %v4921_v55 = vmul.f32 -1.442695, %v7883_v59 }
 0x2f9   : > { %v3007_v44 = vmul.f32 %v2879_v11, %v1955_v33  ;;  %v6010_v24 = vpop.eup %6009  ;;  %v2522_v40 = vadd.f32 1.0, %v6008_v36  ;;  %6033 = vpow2.f32 %v4913_v56  ;;  %v4922_v25 = vmul.f32 -1.442695, %v7885_v47 }
 0x2fa   : > { %v3122_v31 = vpack.c.bf16 %v3006_v20, %v3002_v16  ;;  %v6012_v4 = vpop.eup %6011  ;;  %v2523_v16 = vadd.f32 1.0, %v6010_v24  ;;  %6035 = vpow2.f32 %v4914_v54  ;;  %v4925_v48 = vmul.f32 -1.442695, %v7887_v49 }
 0x2fb   : > { %v3123_v34 = vpack.c.bf16 %v3007_v44, %v3003_v5  ;;  %v6014_v10 = vpop.eup %6013  ;;  %6037 = vpow2.f32 %v4917_v17  ;;  %v2890_v51 = vmul.f32 %v6012_v4, %v7846_v53 }
 0x2fc   : > { %v6016_v13 = vpop.eup %6015  ;;  %6039 = vrcp.f32 %v2519_v63  ;;  %v2526_v8 = vadd.f32 1.0, %v6014_v10 }
 0x2fd   : > { %v1959_v50 = vpop.f32.mrb[140].mxu1  ;;  %3805 = vmatprep.mubr.bf16.mxu0 %v3123_v34  ;;  %v6018_v11 = vpop.eup %6017  ;;  %6041 = vrcp.f32 %v2522_v40  ;;  %v2891_v30 = vmul.f32 %v6016_v13, %v7848_v62  ;;  %v4930_v40 = vmul.f32 -1.442695, %v7893_v2 }
 0x2fe   : > { %v3010_v41 = vmul.f32 %v2882_v27, %v1959_v50  ;;  %v1961_v37 = vpop.f32.mrb[141].mxu1  ;;  %3806 = vmatmul.mubr.bf16.gmra.mrb[72].mxu0 %v3122_v31  ;;  %v6020_v5 = vpop.eup %6019  ;;  %6043 = vrcp.f32 %v2523_v16  ;;  %v2894_v56 = vmul.f32 %v6018_v11, %v7850_v12  ;;  %v4926_v50 = vmul.f32 -1.442695, %v7889_v57 }
 0x2ff   : > { %v3011_v46 = vmul.f32 %v2883_v39, %v1961_v37  ;;  %v1963_v29 = vpop.f32.mrb[142].mxu1  ;;  %v6022_v9 = vpop.eup %6021  ;;  %6045 = vpow2.f32 %v4918_v60  ;;  %v2895_v54 = vmul.f32 %v6020_v5, %v7852_v43  ;;  %v4929_v12 = vmul.f32 -1.442695, %v7891_v21 }
 0x300   : > { %v3014_v6 = vmul.f32 %v2886_v38, %v1963_v29  ;;  %v1965_v14 = vpop.f32.mrb[143].mxu1  ;;  %v6024_v33 = vpop.eup %6023  ;;  %6047 = vrcp.f32 %v2526_v8  ;;  %v2527_v34 = vadd.f32 1.0, %v6022_v9 }
 0x301   : > { %v3015_v3 = vmul.f32 %v2887_v7, %v1965_v14  ;;  %v6026_v44 = vpop.eup %6025  ;;  %v2530_v24 = vadd.f32 1.0, %v6024_v33  ;;  %6049 = vpow2.f32 %v4921_v55 }
 0x302   : > { %v3126_v0 = vpack.c.bf16 %v3014_v6, %v3010_v41  ;;  %v6028_v61 = vpop.eup %6027  ;;  %6051 = vpow2.f32 %v4922_v25  ;;  %v2898_v13 = vmul.f32 %v6026_v44, %v7855_v26  ;;  %v8606_v44 = vld [vmem:[#allocation32_spill] sm:$0xff] }
 0x303   : > { %v3127_v20 = vpack.c.bf16 %v3015_v3, %v3011_v46  ;;  %v6030_v53 = vpop.eup %6029  ;;  %6053 = vpow2.f32 %v4925_v48  ;;  %v2899_v14 = vmul.f32 %v6028_v61, %v7857_v15  ;;  %v8607_v61 = vld [vmem:[#allocation33_spill] sm:$0xff] }
 0x304   : > { %v6032_v17 = vpop.eup %6031  ;;  %6055 = vrcp.f32 %v2527_v34  ;;  %v2531_v10 = vadd.f32 1.0, %v6030_v53 }
 0x305   : > { %v1969_v31 = vpop.f32.mrb[144].mxu1  ;;  %3815 = vmatprep.mubr.bf16.mxu0 %v3127_v20  ;;  %v6034_v63 = vpop.eup %6033  ;;  %6057 = vrcp.f32 %v2530_v24  ;;  %v2902_v5 = vmul.f32 %v6032_v17, %v7859_v23  ;;  %v8605_v20 = vld [vmem:[#allocation31_spill] sm:$0xff] }
 0x306   : > { %v3018_v36 = vmul.f32 %v2890_v51, %v1969_v31  ;;  %v1971_v27 = vpop.f32.mrb[145].mxu1  ;;  %3816 = vmatmul.mubr.bf16.gmra.mrb[76].mxu0 %v3126_v0  ;;  %v6036_v37 = vpop.eup %6035  ;;  %v2534_v16 = vadd.f32 1.0, %v6034_v63  ;;  %6059 = vpow2.f32 %v4926_v50  ;;  %v4933_v33 = vmul.f32 -1.442695, %v8605_v20 }
 0x307   : > { %v3019_v39 = vmul.f32 %v2891_v30, %v1971_v27  ;;  %v1973_v62 = vpop.f32.mrb[146].mxu1  ;;  %v6038_v43 = vpop.eup %6037  ;;  %v2535_v11 = vadd.f32 1.0, %v6036_v37  ;;  %6061 = vpow2.f32 %v4929_v12  ;;  %v4934_v30 = vmul.f32 -1.442695, %v8606_v44 }
 0x308   : > { %v3022_v4 = vmul.f32 %v2894_v56, %v1973_v62  ;;  %v1975_v38 = vpop.f32.mrb[147].mxu1  ;;  %v6040_v29 = vpop.eup %6039  ;;  %6063 = vrcp.f32 %v2531_v10  ;;  %v2538_v8 = vadd.f32 1.0, %v6038_v43  ;;  %v4937_v56 = vmul.f32 -1.442695, %v8607_v61 }
 0x309   : > { %v3023_v41 = vmul.f32 %v2895_v54, %v1975_v38  ;;  %v6042_v6 = vpop.eup %6041  ;;  %v2903_v26 = vmul.f32 %v6040_v29, %v7861_v42  ;;  %6065 = vpow2.f32 %v4930_v40  ;;  %v8608_v54 = vld [vmem:[#allocation34_spill] sm:$0xff] }
 0x30a   : > { %v3130_v7 = vpack.c.bf16 %v3022_v4, %v3018_v36  ;;  %v6044_v3 = vpop.eup %6043  ;;  %6067 = vrcp.f32 %v2534_v16  ;;  %v4938_v24 = vmul.f32 -1.442695, %v8608_v54  ;;  %v2906_v17 = vmul.f32 %v6042_v6, %v7863_v35  ;;  %v8610_v6 = vld [vmem:[#allocation36_spill] sm:$0xff] }
 0x30b   : > { %v3131_v46 = vpack.c.bf16 %v3023_v41, %v3019_v39  ;;  %v6046_v55 = vpop.eup %6045  ;;  %6069 = vrcp.f32 %v2535_v11  ;;  %v2907_v38 = vmul.f32 %v6044_v3, %v7865_v19 }
 0x30c   : > { %v6048_v25 = vpop.eup %6047  ;;  %6071 = vrcp.f32 %v2538_v8  ;;  %v2539_v27 = vadd.f32 1.0, %v6046_v55  ;;  %v8611_v55 = vld [vmem:[#allocation37_spill] sm:$0xff] }
 0x30d   : > { %v1979_v60 = vpop.f32.mrb[148].mxu1  ;;  %3825 = vmatprep.mubr.bf16.mxu0 %v3131_v46  ;;  %v6050_v23 = vpop.eup %6049  ;;  %6073 = vpow2.f32 %v4933_v33  ;;  %v2910_v37 = vmul.f32 %v6048_v25, %v7867_v18  ;;  %v8609_v46 = vld [vmem:[#allocation35_spill] sm:$0xff] }
 0x30e   : > { %v3026_v0 = vmul.f32 %v2898_v13, %v1979_v60  ;;  %v1981_v9 = vpop.f32.mrb[149].mxu1  ;;  %3826 = vmatmul.mubr.bf16.gmra.mrb[80].mxu0 %v3130_v7  ;;  %v6052_v36 = vpop.eup %6051  ;;  %v2542_v50 = vadd.f32 1.0, %v6050_v23  ;;  %6075 = vpow2.f32 %v4934_v30  ;;  %v4941_v29 = vmul.f32 -1.442695, %v8609_v46 }
 0x30f   : > { %v3027_v51 = vmul.f32 %v2899_v14, %v1981_v9  ;;  %v1983_v15 = vpop.f32.mrb[150].mxu1  ;;  %v6054_v53 = vpop.eup %6053  ;;  %v2543_v63 = vadd.f32 1.0, %v6052_v36  ;;  %6077 = vpow2.f32 %v4937_v56  ;;  %v4942_v14 = vmul.f32 -1.442695, %v8610_v6 }
 0x310   : > { %v3030_v48 = vmul.f32 %v2902_v5, %v1983_v15  ;;  %v1985_v31 = vpop.f32.mrb[151].mxu1  ;;  %v6056_v62 = vpop.eup %6055  ;;  %6079 = vrcp.f32 %v2539_v27  ;;  %v2546_v10 = vadd.f32 1.0, %v6054_v53  ;;  %v8613_v27 = vld [vmem:[#allocation39_spill] sm:$0xff] }
 0x311   : > { %v3031_v34 = vmul.f32 %v2903_v26, %v1985_v31  ;;  %v6058_v4 = vpop.eup %6057  ;;  %v2911_v35 = vmul.f32 %v6056_v62, %v7869_v28  ;;  %6081 = vpow2.f32 %v4938_v24  ;;  %v4945_v26 = vmul.f32 -1.442695, %v8611_v55  ;;  %v8612_v31 = vld [vmem:[#allocation38_spill] sm:$0xff]  ;;  %v8614_v62 = vld [vmem:[#allocation40_spill] sm:$0xff] }
 0x312   : > { %v3134_v42 = vpack.c.bf16 %v3030_v48, %v3026_v0  ;;  %v6060_v41 = vpop.eup %6059  ;;  %6083 = vrcp.f32 %v2542_v50  ;;  %v2914_v15 = vmul.f32 %v6058_v4, %v7871_v58  ;;  %v4946_v23 = vmul.f32 -1.442695, %v8612_v31 }
 0x313   : > { %v3135_v39 = vpack.c.bf16 %v3031_v34, %v3027_v51  ;;  %v6062_v40 = vpop.eup %6061  ;;  %6085 = vrcp.f32 %v2543_v63  ;;  %v2547_v3 = vadd.f32 1.0, %v6060_v41 }
 0x314   : > { %v6064_v16 = vpop.eup %6063  ;;  %6087 = vrcp.f32 %v2546_v10  ;;  %v2550_v0 = vadd.f32 1.0, %v6062_v40 }
 0x315   : > { %v1989_v12 = vpop.f32.mrb[152].mxu1  ;;  %3835 = vmatprep.mubr.bf16.mxu0 %v3135_v39  ;;  %v6066_v18 = vpop.eup %6065  ;;  %6089 = vpow2.f32 %v4941_v29  ;;  %v2915_v48 = vmul.f32 %v6064_v16, %v7873_v1  ;;  %v4950_v1 = vmul.f32 -1.442695, %v8614_v62 }
 0x316   : > { %v3034_v7 = vmul.f32 %v2906_v17, %v1989_v12  ;;  %v1991_v43 = vpop.f32.mrb[153].mxu1  ;;  %3836 = vmatmul.mubr.bf16.gmra.mrb[84].mxu0 %v3134_v42  ;;  %v6068_v8 = vpop.eup %6067  ;;  %v2551_v25 = vadd.f32 1.0, %v6066_v18  ;;  %6091 = vpow2.f32 %v4942_v14  ;;  %v4949_v42 = vmul.f32 -1.442695, %v8613_v27 }
 0x317   : > { %v3035_v13 = vmul.f32 %v2907_v38, %v1991_v43  ;;  %v1993_v19 = vpop.f32.mrb[154].mxu1  ;;  %v6070_v28 = vpop.eup %6069  ;;  %6093 = vrcp.f32 %v2547_v3  ;;  %v2918_v36 = vmul.f32 %v6068_v8, %v7875_v52 }
 0x318   : > { %v3038_v11 = vmul.f32 %v2910_v37, %v1993_v19  ;;  %v1995_v60 = vpop.f32.mrb[155].mxu1  ;;  %v6072_v51 = vpop.eup %6071  ;;  %6095 = vrcp.f32 %v2550_v0  ;;  %v2919_v39 = vmul.f32 %v6070_v28, %v7877_v22  ;;  %v8615_v22 = vld [vmem:[#allocation41_spill] sm:$0xff]  ;;  %v8617_v0 = vld [vmem:[#allocation43_spill] sm:$0xff] }
 0x319   : > { %v3039_v5 = vmul.f32 %v2911_v35, %v1995_v60  ;;  %v6074_v30 = vpop.eup %6073  ;;  %6097 = vpow2.f32 %v4945_v26  ;;  %v4953_v35 = vmul.f32 -1.442695, %v8615_v22  ;;  %v2922_v19 = vmul.f32 %v6072_v51, %v7879_v45  ;;  %v8616_v60 = vld [vmem:[#allocation42_spill] sm:$0xff]  ;;  %v8618_v51 = vld [vmem:[#allocation44_spill] sm:$0xff] }
 0x31a   : > { %v3138_v9 = vpack.c.bf16 %v3038_v11, %v3034_v7  ;;  %v6076_v34 = vpop.eup %6075  ;;  %6099 = vrcp.f32 %v2551_v25  ;;  %v2554_v38 = vadd.f32 1.0, %v6074_v30  ;;  %v4954_v18 = vmul.f32 -1.442695, %v8616_v60 }
 0x31b   : > { %v3139_v33 = vpack.c.bf16 %v3039_v5, %v3035_v13  ;;  %v6078_v58 = vpop.eup %6077  ;;  %v2555_v41 = vadd.f32 1.0, %v6076_v34  ;;  %6101 = vpow2.f32 %v4946_v23 }
 0x31c   : > { %v6080_v4 = vpop.eup %6079  ;;  %v2558_v7 = vadd.f32 1.0, %v6078_v58  ;;  %6103 = vpow2.f32 %v4949_v42 }
 0x31d   : > { %v1999_v56 = vpop.f32.mrb[156].mxu1  ;;  %3845 = vmatprep.mubr.bf16.mxu0 %v3139_v33  ;;  %v6082_v52 = vpop.eup %6081  ;;  %6105 = vpow2.f32 %v4950_v1  ;;  %v2923_v11 = vmul.f32 %v6080_v4, %v7881_v32  ;;  %v4958_v32 = vmul.f32 -1.442695, %v8618_v51 }
 0x31e   : > { %v3042_v53 = vmul.f32 %v2914_v15, %v1999_v56  ;;  %v2001_v24 = vpop.f32.mrb[157].mxu1  ;;  %3846 = vmatmul.mubr.bf16.gmra.mrb[88].mxu0 %v3138_v9  ;;  %v6084_v10 = vpop.eup %6083  ;;  %6107 = vrcp.f32 %v2554_v38  ;;  %v2559_v16 = vadd.f32 1.0, %v6082_v52  ;;  %v4957_v9 = vmul.f32 -1.442695, %v8617_v0 }
 0x31f   : > { %v3043_v17 = vmul.f32 %v2915_v48, %v2001_v24  ;;  %v2003_v50 = vpop.f32.mrb[158].mxu1  ;;  %v6086_v40 = vpop.eup %6085  ;;  %6109 = vrcp.f32 %v2555_v41  ;;  %v2926_v8 = vmul.f32 %v6084_v10, %v7883_v59  ;;  %v8619_v48 = vld [vmem:[#allocation45_spill] sm:$0xff] }
 0x320   : > { %v3046_v63 = vmul.f32 %v2918_v36, %v2003_v50  ;;  %v2005_v12 = vpop.f32.mrb[159].mxu1  ;;  %v6088_v13 = vpop.eup %6087  ;;  %6111 = vrcp.f32 %v2558_v7  ;;  %v2927_v33 = vmul.f32 %v6086_v40, %v7885_v47  ;;  %v4961_v23 = vmul.f32 -1.442695, %v8619_v48 }
 0x321   : > { %v3047_v37 = vmul.f32 %v2919_v39, %v2005_v12  ;;  %v6090_v14 = vpop.eup %6089  ;;  %6113 = vpow2.f32 %v4953_v35 }
 0x322   : > { %v3142_v43 = vpack.c.bf16 %v3046_v63, %v3042_v53  ;;  %v6092_v5 = vpop.eup %6091  ;;  %6115 = vrcp.f32 %v2559_v16  ;;  %v2562_v53 = vadd.f32 1.0, %v6090_v14  ;;  %v8620_v63 = vld [vmem:[#allocation46_spill] sm:$0xff] }
 0x323   : > { %v3143_v29 = vpack.c.bf16 %v3047_v37, %v3043_v17  ;;  %v6094_v45 = vpop.eup %6093  ;;  %6117 = vpow2.f32 %v4954_v18  ;;  %v2563_v47 = vadd.f32 1.0, %v6092_v5  ;;  %v2930_v17 = vmul.f32 %v6088_v13, %v7887_v49 }
 0x324   : > { %v6096_v30 = vpop.eup %6095  ;;  %6119 = vpow2.f32 %v4957_v9  ;;  %v2931_v38 = vmul.f32 %v6094_v45, %v7889_v57  ;;  %v4962_v12 = vmul.f32 -1.442695, %v8620_v63 }
 0x325   : > { %v2009_v3 = vpop.f32.mrb[160].mxu1  ;;  %3855 = vmatprep.mubr.bf16.mxu0 %v3143_v29  ;;  %v6098_v34 = vpop.eup %6097  ;;  %6121 = vpow2.f32 %v4958_v32  ;;  %v2934_v37 = vmul.f32 %v6096_v30, %v7891_v21  ;;  %v8621_v21 = vld [vmem:[#allocation47_spill] sm:$0xff] }
 0x326   : > { %v3050_v28 = vmul.f32 %v2922_v19, %v2009_v3  ;;  %v2011_v26 = vpop.f32.mrb[161].mxu1  ;;  %3856 = vmatmul.mubr.bf16.gmra.mrb[92].mxu0 %v3142_v43  ;;  %v6100_v42 = vpop.eup %6099  ;;  %v2566_v50 = vadd.f32 1.0, %v6098_v34  ;;  %6123 = vpow2.f32 %v4961_v23  ;;  %v4965_v18 = vmul.f32 -1.442695, %v8621_v21 }
 0x327   : > { %v3051_v15 = vmul.f32 %v2923_v11, %v2011_v26  ;;  %v2013_v25 = vpop.f32.mrb[162].mxu1  ;;  %v6102_v58 = vpop.eup %6101  ;;  %6125 = vrcp.f32 %v2562_v53  ;;  %v2935_v49 = vmul.f32 %v6100_v42, %v7893_v2  ;;  %v8623_v26 = vld [vmem:[#allocation49_spill] sm:$0xff] }
 0x328   : > { %v3054_v56 = vmul.f32 %v2926_v8, %v2013_v25  ;;  %v2015_v59 = vpop.f32.mrb[163].mxu1  ;;  %v6104_v1 = vpop.eup %6103  ;;  %v2567_v10 = vadd.f32 1.0, %v6102_v58  ;;  %6127 = vrcp.f32 %v2563_v47  ;;  %v8622_v8 = vld [vmem:[#allocation48_spill] sm:$0xff]  ;;  %v4969_v45 = vmul.f32 -1.442695, %v8623_v26 }
 0x329   : > { %v3055_v36 = vmul.f32 %v2927_v33, %v2015_v59  ;;  %v6106_v4 = vpop.eup %6105  ;;  %v2570_v35 = vadd.f32 1.0, %v6104_v1  ;;  %6129 = vrcp.f32 %v2566_v50  ;;  %v4966_v9 = vmul.f32 -1.442695, %v8622_v8 }
 0x32a   : > { %v3146_v24 = vpack.c.bf16 %v3054_v56, %v3050_v28  ;;  %v6108_v41 = vpop.eup %6107  ;;  %v2571_v19 = vadd.f32 1.0, %v6106_v4  ;;  %6131 = vpow2.f32 %v4962_v12  ;;  %v8624_v56 = vld [vmem:[#allocation50_spill] sm:$0xff] }
 0x32b   : > { %v3147_v39 = vpack.c.bf16 %v3055_v36, %v3051_v15  ;;  %v6110_v40 = vpop.eup %6109  ;;  %6133 = vrcp.f32 %v2567_v10  ;;  %v2938_v15 = vmul.f32 %v6108_v41, %v8605_v20  ;;  %v4970_v59 = vmul.f32 -1.442695, %v8624_v56  ;;  %v8625_v41 = vld [vmem:[#allocation51_spill] sm:$0xff] }
 0x32c   : > { %v6112_v57 = vpop.eup %6111  ;;  %6135 = vrcp.f32 %v2570_v35  ;;  %v2939_v23 = vmul.f32 %v6110_v40, %v8606_v44 }
 0x32d   : > { %v2019_v52 = vpop.f32.mrb[164].mxu1  ;;  %3865 = vmatprep.mubr.bf16.mxu0 %v3147_v39  ;;  %v6114_v11 = vpop.eup %6113  ;;  %6137 = vrcp.f32 %v2571_v19  ;;  %v2942_v42 = vmul.f32 %v6112_v57, %v8607_v61 }
 0x32e   : > { %v3058_v7 = vmul.f32 %v2930_v17, %v2019_v52  ;;  %v2021_v43 = vpop.f32.mrb[165].mxu1  ;;  %3866 = vmatmul.mubr.bf16.gmra.mrb[96].mxu0 %v3146_v24  ;;  %v6116_v5 = vpop.eup %6115  ;;  %v2574_v25 = vadd.f32 1.0, %v6114_v11  ;;  %6139 = vpow2.f32 %v4965_v18 }
 0x32f   : > { %v3059_v29 = vmul.f32 %v2931_v38, %v2021_v43  ;;  %v2023_v13 = vpop.f32.mrb[166].mxu1  ;;  %v6118_v2 = vpop.eup %6117  ;;  %6141 = vpow2.f32 %v4966_v9  ;;  %v2943_v20 = vmul.f32 %v6116_v5, %v8608_v54  ;;  %v8626_v54 = vld [vmem:[#allocation52_spill] sm:$0xff] }
 0x330   : > { %v3062_v16 = vmul.f32 %v2934_v37, %v2023_v13  ;;  %v2025_v14 = vpop.f32.mrb[167].mxu1  ;;  %v6120_v32 = vpop.eup %6119  ;;  %v2575_v53 = vadd.f32 1.0, %v6118_v2  ;;  %6143 = vpow2.f32 %v4969_v45  ;;  %v4973_v37 = vmul.f32 -1.442695, %v8625_v41 }
 0x331   : > { %v3063_v3 = vmul.f32 %v2935_v49, %v2025_v14  ;;  %v6122_v30 = vpop.eup %6121  ;;  %v2578_v47 = vadd.f32 1.0, %v6120_v32  ;;  %6145 = vrcp.f32 %v2574_v25  ;;  %v4974_v43 = vmul.f32 -1.442695, %v8626_v54 }
 0x332   : > { %v3150_v28 = vpack.c.bf16 %v3062_v16, %v3058_v7  ;;  %v6124_v36 = vpop.eup %6123  ;;  %v2579_v17 = vadd.f32 1.0, %v6122_v30  ;;  %6147 = vpow2.f32 %v4970_v59  ;;  %v8628_v16 = vld [vmem:[#allocation54_spill] sm:$0xff] }
 0x333   : > { %v3151_v33 = vpack.c.bf16 %v3063_v3, %v3059_v29  ;;  %v6126_v44 = vpop.eup %6125  ;;  %v2582_v12 = vadd.f32 1.0, %v6124_v36  ;;  %6149 = vrcp.f32 %v2575_v53  ;;  %v8627_v29 = vld [vmem:[#allocation53_spill] sm:$0xff]  ;;  %v4978_v14 = vmul.f32 -1.442695, %v8628_v16 }
 0x334   : > { %v6128_v38 = vpop.eup %6127  ;;  %6151 = vrcp.f32 %v2578_v47  ;;  %v2946_v35 = vmul.f32 %v6126_v44, %v8609_v46  ;;  %v4977_v13 = vmul.f32 -1.442695, %v8627_v29 }
 0x335   : > { %v2029_v34 = vpop.f32.mrb[168].mxu1  ;;  %3875 = vmatprep.mubr.bf16.mxu0 %v3151_v33  ;;  %v6130_v52 = vpop.eup %6129  ;;  %6153 = vrcp.f32 %v2579_v17  ;;  %v2947_v19 = vmul.f32 %v6128_v38, %v8610_v6 }
 0x336   : > { %v3066_v24 = vmul.f32 %v2938_v15, %v2029_v34  ;;  %v2031_v58 = vpop.f32.mrb[169].mxu1  ;;  %3876 = vmatmul.mubr.bf16.gmra.mrb[100].mxu0 %v3150_v28  ;;  %v6132_v7 = vpop.eup %6131  ;;  %6155 = vrcp.f32 %v2582_v12  ;;  %v2950_v3 = vmul.f32 %v6130_v52, %v8611_v55 }
 0x337   : > { %v3067_v39 = vmul.f32 %v2939_v23, %v2031_v58  ;;  %v2033_v1 = vpop.f32.mrb[170].mxu1  ;;  %v6134_v49 = vpop.eup %6133  ;;  %v2583_v5 = vadd.f32 1.0, %v6132_v7  ;;  %6157 = vpow2.f32 %v4973_v37 }
 0x338   : > { %v3070_v50 = vmul.f32 %v2942_v42, %v2033_v1  ;;  %v2035_v4 = vpop.f32.mrb[171].mxu1  ;;  %v6136_v57 = vpop.eup %6135  ;;  %v2951_v2 = vmul.f32 %v6134_v49, %v8612_v31  ;;  %6159 = vpow2.f32 %v4974_v43 }
 0x339   : > { %v3071_v61 = vmul.f32 %v2943_v20, %v2035_v4  ;;  %v6138_v18 = vpop.eup %6137  ;;  %6161 = vpow2.f32 %v4977_v13  ;;  %v2954_v53 = vmul.f32 %v6136_v57, %v8613_v27 }
 0x33a   : > { %v3154_v10 = vpack.c.bf16 %v3070_v50, %v3066_v24  ;;  %v6140_v46 = vpop.eup %6139  ;;  %6163 = vpow2.f32 %v4978_v14  ;;  %v2955_v58 = vmul.f32 %v6138_v18, %v8614_v62 }
 0x33b   : > { %v3155_v40 = vpack.c.bf16 %v3071_v61, %v3067_v39  ;;  %v6142_v6 = vpop.eup %6141  ;;  %6165 = vrcp.f32 %v2583_v5  ;;  %v2586_v34 = vadd.f32 1.0, %v6140_v46 }
 0x33c   : > { %v6144_v25 = vpop.eup %6143  ;;  %v2587_v31 = vadd.f32 1.0, %v6142_v6 }
 0x33d   : > { %v2039_v11 = vpop.f32.mrb[172].mxu1  ;;  %3885 = vmatprep.mubr.bf16.mxu0 %v3155_v40  ;;  %v6146_v23 = vpop.eup %6145  ;;  %v2590_v20 = vadd.f32 1.0, %v6144_v25  ;;  %6167 = vrcp.f32 %v2586_v34 }
 0x33e   : > { %v3074_v9 = vmul.f32 %v2946_v35, %v2039_v11  ;;  %v2041_v28 = vpop.f32.mrb[173].mxu1  ;;  %3886 = vmatmul.mubr.bf16.gmra.mrb[104].mxu0 %v3154_v10  ;;  %v6148_v59 = vpop.eup %6147  ;;  %v2958_v1 = vmul.f32 %v6146_v23, %v8615_v22  ;;  %6169 = vrcp.f32 %v2587_v31 }
 0x33f   : > { %v3075_v45 = vmul.f32 %v2947_v19, %v2041_v28  ;;  %v2043_v33 = vpop.f32.mrb[174].mxu1  ;;  %v6150_v42 = vpop.eup %6149  ;;  %v2591_v44 = vadd.f32 1.0, %v6148_v59  ;;  %6171 = vrcp.f32 %v2590_v20 }
 0x340   : > { %v3078_v32 = vmul.f32 %v2950_v3, %v2043_v33  ;;  %v2045_v15 = vpop.f32.mrb[175].mxu1  ;;  %v6152_v24 = vpop.eup %6151  ;;  %v2959_v38 = vmul.f32 %v6150_v42, %v8616_v60 }
 0x341   : > { %v3079_v30 = vmul.f32 %v2951_v2, %v2045_v15  ;;  %v6154_v39 = vpop.eup %6153  ;;  %6173 = vrcp.f32 %v2591_v44  ;;  %v2962_v13 = vmul.f32 %v6152_v24, %v8617_v0 }
 0x342   : > { %v3158_v55 = vpack.c.bf16 %v3078_v32, %v3074_v9  ;;  %v6156_v4 = vpop.eup %6155  ;;  %v2963_v57 = vmul.f32 %v6154_v39, %v8618_v51 }
 0x343   : > { %v3159_v36 = vpack.c.bf16 %v3079_v30, %v3075_v45  ;;  %v6158_v61 = vpop.eup %6157  ;;  %v2966_v11 = vmul.f32 %v6156_v4, %v8619_v48 }
 0x344   : > { %v6160_v37 = vpop.eup %6159  ;;  %v2594_v40 = vadd.f32 1.0, %v6158_v61 }
 0x345   : > { %v2049_v47 = vpop.f32.mrb[176].mxu1  ;;  %3895 = vmatprep.mubr.bf16.mxu0 %v3159_v36  ;;  %v6162_v7 = vpop.eup %6161  ;;  %v2595_v60 = vadd.f32 1.0, %v6160_v37 }
 0x346   : > { %v3082_v17 = vmul.f32 %v2954_v53, %v2049_v47  ;;  %v2051_v50 = vpop.f32.mrb[177].mxu1  ;;  %3896 = vmatmul.mubr.bf16.gmra.mrb[108].mxu0 %v3158_v55  ;;  %v6164_v43 = vpop.eup %6163  ;;  %v2598_v19 = vadd.f32 1.0, %v6162_v7  ;;  %6175 = vrcp.f32 %v2594_v40 }
 0x347   : > { %v3083_v12 = vmul.f32 %v2955_v58, %v2051_v50  ;;  %v2053_v27 = vpop.f32.mrb[178].mxu1  ;;  %v6166_v35 = vpop.eup %6165  ;;  %v2599_v18 = vadd.f32 1.0, %v6164_v43  ;;  %6177 = vrcp.f32 %v2595_v60 }
 0x348   : > { %v3086_v52 = vmul.f32 %v2958_v1, %v2053_v27  ;;  %v2055_v62 = vpop.f32.mrb[179].mxu1  ;;  %v2967_v9 = vmul.f32 %v6166_v35, %v8620_v63  ;;  %v6168_v45 = vpop.eup %6167  ;;  %6179 = vrcp.f32 %v2598_v19 }
 0x349   : > { %v3087_v10 = vmul.f32 %v2959_v38, %v2055_v62  ;;  %v6170_v33 = vpop.eup %6169  ;;  %6181 = vrcp.f32 %v2599_v18  ;;  %v2970_v25 = vmul.f32 %v6168_v45, %v8621_v21 }
 0x34a   : > { %v3162_v22 = vpack.c.bf16 %v3086_v52, %v3082_v17  ;;  %v6172_v32 = vpop.eup %6171  ;;  %v2971_v30 = vmul.f32 %v6170_v33, %v8622_v8 }
 0x34b   : > { %v3163_v49 = vpack.c.bf16 %v3087_v10, %v3083_v12  ;;  %v6174_v15 = vpop.eup %6173  ;;  %v2974_v23 = vmul.f32 %v6172_v32, %v8623_v26 }
 0x34c   : > { %v2975_v34 = vmul.f32 %v6174_v15, %v8624_v56 }
 0x34d   : > { %v2059_v14 = vpop.f32.mrb[180].mxu1  ;;  %3905 = vmatprep.mubr.bf16.mxu0 %v3163_v49 }
 0x34e   : > { %v3090_v3 = vmul.f32 %v2962_v13, %v2059_v14  ;;  %v2061_v5 = vpop.f32.mrb[181].mxu1  ;;  %3906 = vmatmul.mubr.bf16.gmra.mrb[112].mxu0 %v3162_v22 }
 0x34f   : > { %v3091_v28 = vmul.f32 %v2963_v57, %v2061_v5  ;;  %v2063_v46 = vpop.f32.mrb[182].mxu1 }
 0x350   : > { %v3094_v2 = vmul.f32 %v2966_v11, %v2063_v46  ;;  %v2065_v0 = vpop.f32.mrb[183].mxu1  ;;  %v6176_v24 = vpop.eup %6175 }
 0x351   : > { %v3095_v51 = vmul.f32 %v2967_v9, %v2065_v0  ;;  %v6178_v20 = vpop.eup %6177  ;;  %v2978_v1 = vmul.f32 %v6176_v24, %v8625_v41 }
 0x352   : > { %v3166_v6 = vpack.c.bf16 %v3094_v2, %v3090_v3  ;;  %v6180_v21 = vpop.eup %6179  ;;  %v2979_v26 = vmul.f32 %v6178_v20, %v8626_v54 }
 0x353   : > { %v3167_v48 = vpack.c.bf16 %v3095_v51, %v3091_v28  ;;  %v6182_v8 = vpop.eup %6181  ;;  %v2982_v17 = vmul.f32 %v6180_v21, %v8627_v29 }
 0x354   : > { %v2983_v4 = vmul.f32 %v6182_v8, %v8628_v16 }
 0x355   : > { %v2069_v63 = vpop.f32.mrb[184].mxu1  ;;  %3915 = vmatprep.mubr.bf16.mxu0 %v3167_v48 }
 0x356   : > { %v3098_v55 = vmul.f32 %v2970_v25, %v2069_v63  ;;  %v2071_v59 = vpop.f32.mrb[185].mxu1  ;;  %3916 = vmatmul.mubr.bf16.gmra.mrb[116].mxu0 %v3166_v6 }
 0x357   : > { %v3099_v36 = vmul.f32 %v2971_v30, %v2071_v59  ;;  %v2073_v42 = vpop.f32.mrb[186].mxu1 }
 0x358   : > { %v3102_v53 = vmul.f32 %v2974_v23, %v2073_v42  ;;  %v2075_v31 = vpop.f32.mrb[187].mxu1 }
 0x359   : > { %v3103_v58 = vmul.f32 %v2975_v34, %v2075_v31 }
 0x35a   : > { %v3170_v47 = vpack.c.bf16 %v3102_v53, %v3098_v55 }
 0x35b   : > { %v3171_v39 = vpack.c.bf16 %v3103_v58, %v3099_v36 }
 0x35d   : > { %v2079_v44 = vpop.f32.mrb[188].mxu1  ;;  %3925 = vmatprep.mubr.bf16.mxu0 %v3171_v39 }
 0x35e   : > { %v3106_v56 = vmul.f32 %v2978_v1, %v2079_v44  ;;  %v2081_v50 = vpop.f32.mrb[189].mxu1  ;;  %3926 = vmatmul.mubr.bf16.gmra.mrb[120].mxu0 %v3170_v47 }
 0x35f   : > { %v3107_v38 = vmul.f32 %v2979_v26, %v2081_v50  ;;  %v2083_v12 = vpop.f32.mrb[190].mxu1 }
 0x360   : > { %v3110_v27 = vmul.f32 %v2982_v17, %v2083_v12  ;;  %v2085_v61 = vpop.f32.mrb[191].mxu1 }
 0x361   : > { %v3111_v52 = vmul.f32 %v2983_v4, %v2085_v61 }
 0x362   : > { %v3174_v62 = vpack.c.bf16 %v3110_v27, %v3106_v56 }
 0x363   : > { %v3175_v37 = vpack.c.bf16 %v3111_v52, %v3107_v38 }
 0x365   : > { %3935 = vmatprep.mubr.bf16.mxu0 %v3175_v37 }
 0x366   : > { %3936 = vmatmul.mubr.bf16.gmra.mrb[124].mxu0 %v3174_v62 }
 0x3c1   : > { %v8071_v41 = vpop.f32.mrb[64].mxu0 }
 0x3c2   : > { %v8073_v54 = vpop.f32.mrb[65].mxu0  ;;  %3950 = vst [vmem:[#allocation2] sm:$0xff] (!%p5043_p7), %v8071_v41 }
 0x3c3   : > { %v8075_v10 = vpop.f32.mrb[66].mxu0  ;;  %3951 = vst [vmem:[#allocation2 + $0x8] sm:$0xff] (!%p5043_p7), %v8073_v54 }
 0x3c4   : > { %v8077_v29 = vpop.f32.mrb[67].mxu0  ;;  %3952 = vst [vmem:[#allocation2 + $0x10] sm:$0xff] (!%p5043_p7), %v8075_v10 }
 0x3c5   : > { %3953 = vst [vmem:[#allocation2 + $0x18] sm:$0xff] (!%p5043_p7), %v8077_v29 }
 0x3c9   : > { %v8079_v7 = vpop.f32.mrb[68].mxu0 }
 0x3ca   : > { %v8081_v16 = vpop.f32.mrb[69].mxu0  ;;  %3954 = vst [vmem:[#allocation2 + $0x20] sm:$0xff] (!%p5043_p7), %v8079_v7 }
 0x3cb   : > { %v8083_v22 = vpop.f32.mrb[70].mxu0  ;;  %3955 = vst [vmem:[#allocation2 + $0x28] sm:$0xff] (!%p5043_p7), %v8081_v16 }
 0x3cc   : > { %v8085_v43 = vpop.f32.mrb[71].mxu0  ;;  %3956 = vst [vmem:[#allocation2 + $0x30] sm:$0xff] (!%p5043_p7), %v8083_v22 }
 0x3cd   : > { %3957 = vst [vmem:[#allocation2 + $0x38] sm:$0xff] (!%p5043_p7), %v8085_v43 }
 0x3d1   : > { %v8087_v40 = vpop.f32.mrb[72].mxu0 }
 0x3d2   : > { %v8089_v49 = vpop.f32.mrb[73].mxu0  ;;  %3958 = vst [vmem:[#allocation2 + $0x40] sm:$0xff] (!%p5043_p7), %v8087_v40 }
 0x3d3   : > { %v8091_v35 = vpop.f32.mrb[74].mxu0  ;;  %3959 = vst [vmem:[#allocation2 + $0x48] sm:$0xff] (!%p5043_p7), %v8089_v49 }
 0x3d4   : > { %v8093_v13 = vpop.f32.mrb[75].mxu0  ;;  %3960 = vst [vmem:[#allocation2 + $0x50] sm:$0xff] (!%p5043_p7), %v8091_v35 }
 0x3d5   : > { %3961 = vst [vmem:[#allocation2 + $0x58] sm:$0xff] (!%p5043_p7), %v8093_v13 }
 0x3d9   : > { %v8095_v60 = vpop.f32.mrb[76].mxu0 }
 0x3da   : > { %v8097_v57 = vpop.f32.mrb[77].mxu0  ;;  %3962 = vst [vmem:[#allocation2 + $0x60] sm:$0xff] (!%p5043_p7), %v8095_v60 }
 0x3db   : > { %v8099_v19 = vpop.f32.mrb[78].mxu0  ;;  %3963 = vst [vmem:[#allocation2 + $0x68] sm:$0xff] (!%p5043_p7), %v8097_v57 }
 0x3dc   : > { %v8101_v14 = vpop.f32.mrb[79].mxu0  ;;  %3964 = vst [vmem:[#allocation2 + $0x70] sm:$0xff] (!%p5043_p7), %v8099_v19 }
 0x3dd   : > { %3965 = vst [vmem:[#allocation2 + $0x78] sm:$0xff] (!%p5043_p7), %v8101_v14 }
 0x3e1   : > { %v8103_v11 = vpop.f32.mrb[80].mxu0 }
 0x3e2   : > { %v8105_v18 = vpop.f32.mrb[81].mxu0  ;;  %3966 = vst [vmem:[#allocation2 + $0x80] sm:$0xff] (!%p5043_p7), %v8103_v11 }
 0x3e3   : > { %v8107_v3 = vpop.f32.mrb[82].mxu0  ;;  %3967 = vst [vmem:[#allocation2 + $0x88] sm:$0xff] (!%p5043_p7), %v8105_v18 }
 0x3e4   : > { %v8109_v5 = vpop.f32.mrb[83].mxu0  ;;  %3968 = vst [vmem:[#allocation2 + $0x90] sm:$0xff] (!%p5043_p7), %v8107_v3 }
 0x3e5   : > { %3969 = vst [vmem:[#allocation2 + $0x98] sm:$0xff] (!%p5043_p7), %v8109_v5 }
 0x3e9   : > { %v8111_v9 = vpop.f32.mrb[84].mxu0 }
 0x3ea   : > { %v8113_v28 = vpop.f32.mrb[85].mxu0  ;;  %3970 = vst [vmem:[#allocation2 + $0xa0] sm:$0xff] (!%p5043_p7), %v8111_v9 }
 0x3eb   : > { %v8115_v46 = vpop.f32.mrb[86].mxu0  ;;  %3971 = vst [vmem:[#allocation2 + $0xa8] sm:$0xff] (!%p5043_p7), %v8113_v28 }
 0x3ec   : > { %v8117_v2 = vpop.f32.mrb[87].mxu0  ;;  %3972 = vst [vmem:[#allocation2 + $0xb0] sm:$0xff] (!%p5043_p7), %v8115_v46 }
 0x3ed   : > { %3973 = vst [vmem:[#allocation2 + $0xb8] sm:$0xff] (!%p5043_p7), %v8117_v2 }
 0x3f1   : > { %v8119_v0 = vpop.f32.mrb[88].mxu0 }
 0x3f2   : > { %v8121_v45 = vpop.f32.mrb[89].mxu0  ;;  %3974 = vst [vmem:[#allocation2 + $0xc0] sm:$0xff] (!%p5043_p7), %v8119_v0 }
 0x3f3   : > { %v8123_v51 = vpop.f32.mrb[90].mxu0  ;;  %3975 = vst [vmem:[#allocation2 + $0xc8] sm:$0xff] (!%p5043_p7), %v8121_v45 }
 0x3f4   : > { %v8125_v33 = vpop.f32.mrb[91].mxu0  ;;  %3976 = vst [vmem:[#allocation2 + $0xd0] sm:$0xff] (!%p5043_p7), %v8123_v51 }
 0x3f5   : > { %3977 = vst [vmem:[#allocation2 + $0xd8] sm:$0xff] (!%p5043_p7), %v8125_v33 }
 0x3f9   : > { %v8127_v6 = vpop.f32.mrb[92].mxu0 }
 0x3fa   : > { %v8129_v32 = vpop.f32.mrb[93].mxu0  ;;  %3978 = vst [vmem:[#allocation2 + $0xe0] sm:$0xff] (!%p5043_p7), %v8127_v6 }
 0x3fb   : > { %v8131_v48 = vpop.f32.mrb[94].mxu0  ;;  %3979 = vst [vmem:[#allocation2 + $0xe8] sm:$0xff] (!%p5043_p7), %v8129_v32 }
 0x3fc   : > { %v8133_v15 = vpop.f32.mrb[95].mxu0  ;;  %3980 = vst [vmem:[#allocation2 + $0xf0] sm:$0xff] (!%p5043_p7), %v8131_v48 }
 0x3fd   : > { %3981 = vst [vmem:[#allocation2 + $0xf8] sm:$0xff] (!%p5043_p7), %v8133_v15 }
 0x401   : > { %v8135_v25 = vpop.f32.mrb[96].mxu0 }
 0x402   : > { %v8137_v30 = vpop.f32.mrb[97].mxu0  ;;  %3982 = vst [vmem:[#allocation2 + $0x100] sm:$0xff] (!%p5043_p7), %v8135_v25 }
 0x403   : > { %v8139_v63 = vpop.f32.mrb[98].mxu0  ;;  %3983 = vst [vmem:[#allocation2 + $0x108] sm:$0xff] (!%p5043_p7), %v8137_v30 }
 0x404   : > { %v8141_v23 = vpop.f32.mrb[99].mxu0  ;;  %3984 = vst [vmem:[#allocation2 + $0x110] sm:$0xff] (!%p5043_p7), %v8139_v63 }
 0x405   : > { %3985 = vst [vmem:[#allocation2 + $0x118] sm:$0xff] (!%p5043_p7), %v8141_v23 }
 0x409   : > { %v8143_v55 = vpop.f32.mrb[100].mxu0 }
 0x40a   : > { %v8145_v59 = vpop.f32.mrb[101].mxu0  ;;  %3986 = vst [vmem:[#allocation2 + $0x120] sm:$0xff] (!%p5043_p7), %v8143_v55 }
 0x40b   : > { %v8147_v34 = vpop.f32.mrb[102].mxu0  ;;  %3987 = vst [vmem:[#allocation2 + $0x128] sm:$0xff] (!%p5043_p7), %v8145_v59 }
 0x40c   : > { %v8149_v36 = vpop.f32.mrb[103].mxu0  ;;  %3988 = vst [vmem:[#allocation2 + $0x130] sm:$0xff] (!%p5043_p7), %v8147_v34 }
 0x40d   : > { %3989 = vst [vmem:[#allocation2 + $0x138] sm:$0xff] (!%p5043_p7), %v8149_v36 }
 0x411   : > { %v8151_v42 = vpop.f32.mrb[104].mxu0 }
 0x412   : > { %v8153_v53 = vpop.f32.mrb[105].mxu0  ;;  %3990 = vst [vmem:[#allocation2 + $0x140] sm:$0xff] (!%p5043_p7), %v8151_v42 }
 0x413   : > { %v8155_v31 = vpop.f32.mrb[106].mxu0  ;;  %3991 = vst [vmem:[#allocation2 + $0x148] sm:$0xff] (!%p5043_p7), %v8153_v53 }
 0x414   : > { %v8157_v24 = vpop.f32.mrb[107].mxu0  ;;  %3992 = vst [vmem:[#allocation2 + $0x150] sm:$0xff] (!%p5043_p7), %v8155_v31 }
 0x415   : > { %3993 = vst [vmem:[#allocation2 + $0x158] sm:$0xff] (!%p5043_p7), %v8157_v24 }
 0x419   : > { %v8159_v58 = vpop.f32.mrb[108].mxu0 }
 0x41a   : > { %v8161_v20 = vpop.f32.mrb[109].mxu0  ;;  %3994 = vst [vmem:[#allocation2 + $0x160] sm:$0xff] (!%p5043_p7), %v8159_v58 }
 0x41b   : > { %v8163_v47 = vpop.f32.mrb[110].mxu0  ;;  %3995 = vst [vmem:[#allocation2 + $0x168] sm:$0xff] (!%p5043_p7), %v8161_v20 }
 0x41c   : > { %v8165_v21 = vpop.f32.mrb[111].mxu0  ;;  %3996 = vst [vmem:[#allocation2 + $0x170] sm:$0xff] (!%p5043_p7), %v8163_v47 }
 0x41d   : > { %3997 = vst [vmem:[#allocation2 + $0x178] sm:$0xff] (!%p5043_p7), %v8165_v21 }
 0x421   : > { %v8167_v39 = vpop.f32.mrb[112].mxu0 }
 0x422   : > { %v8169_v8 = vpop.f32.mrb[113].mxu0  ;;  %3998 = vst [vmem:[#allocation2 + $0x180] sm:$0xff] (!%p5043_p7), %v8167_v39 }
 0x423   : > { %8629 = vst [vmem:[#allocation31_spill] sm:$0xff] %v8169_v8  ;;  %v8171_v1 = vpop.f32.mrb[114].mxu0  ;;  %3999 = vst [vmem:[#allocation2 + $0x188] sm:$0xff] (!%p5043_p7), %v8169_v8 }
 0x424   : > { %8630 = vst [vmem:[#allocation32_spill] sm:$0xff] %v8171_v1  ;;  %v8173_v26 = vpop.f32.mrb[115].mxu0  ;;  %4000 = vst [vmem:[#allocation2 + $0x190] sm:$0xff] (!%p5043_p7), %v8171_v1 }
 0x425   : > { %8631 = vst [vmem:[#allocation33_spill] sm:$0xff] %v8173_v26  ;;  %4001 = vst [vmem:[#allocation2 + $0x198] sm:$0xff] (!%p5043_p7), %v8173_v26 }
 0x429   : > { %v8175_v44 = vpop.f32.mrb[116].mxu0 }
 0x42a   : > { %8632 = vst [vmem:[#allocation34_spill] sm:$0xff] %v8175_v44  ;;  %v8177_v17 = vpop.f32.mrb[117].mxu0  ;;  %4002 = vst [vmem:[#allocation2 + $0x1a0] sm:$0xff] (!%p5043_p7), %v8175_v44 }
 0x42b   : > { %8633 = vst [vmem:[#allocation35_spill] sm:$0xff] %v8177_v17  ;;  %v8179_v56 = vpop.f32.mrb[118].mxu0  ;;  %4003 = vst [vmem:[#allocation2 + $0x1a8] sm:$0xff] (!%p5043_p7), %v8177_v17 }
 0x42c   : > { %8634 = vst [vmem:[#allocation36_spill] sm:$0xff] %v8179_v56  ;;  %v8181_v50 = vpop.f32.mrb[119].mxu0  ;;  %4004 = vst [vmem:[#allocation2 + $0x1b0] sm:$0xff] (!%p5043_p7), %v8179_v56 }
 0x42d   : > { %8635 = vst [vmem:[#allocation37_spill] sm:$0xff] %v8181_v50  ;;  %4005 = vst [vmem:[#allocation2 + $0x1b8] sm:$0xff] (!%p5043_p7), %v8181_v50 }
 0x431   : > { %v8183_v4 = vpop.f32.mrb[120].mxu0 }
 0x432   : > { %8636 = vst [vmem:[#allocation38_spill] sm:$0xff] %v8183_v4  ;;  %v8185_v38 = vpop.f32.mrb[121].mxu0  ;;  %4006 = vst [vmem:[#allocation2 + $0x1c0] sm:$0xff] (!%p5043_p7), %v8183_v4 }
 0x433   : > { %8637 = vst [vmem:[#allocation39_spill] sm:$0xff] %v8185_v38  ;;  %v8187_v12 = vpop.f32.mrb[122].mxu0  ;;  %4007 = vst [vmem:[#allocation2 + $0x1c8] sm:$0xff] (!%p5043_p7), %v8185_v38 }
 0x434   : > { %8638 = vst [vmem:[#allocation40_spill] sm:$0xff] %v8187_v12  ;;  %v8189_v27 = vpop.f32.mrb[123].mxu0  ;;  %4008 = vst [vmem:[#allocation2 + $0x1d0] sm:$0xff] (!%p5043_p7), %v8187_v12 }
 0x435   : > { %8639 = vst [vmem:[#allocation41_spill] sm:$0xff] %v8189_v27  ;;  %4009 = vst [vmem:[#allocation2 + $0x1d8] sm:$0xff] (!%p5043_p7), %v8189_v27 }
 0x437   : > { %3949 = sbr.rel (%p5043_p7) target bundleno = 1086 (0x43e), region = 56 }
 0x439   : > { %v8191_v61 = vpop.f32.mrb[124].mxu0 }
 0x43a   : > { %8640 = vst [vmem:[#allocation42_spill] sm:$0xff] %v8191_v61  ;;  %v8193_v52 = vpop.f32.mrb[125].mxu0  ;;  %4010 = vst [vmem:[#allocation2 + $0x1e0] sm:$0xff] (!%p5043_p7), %v8191_v61 }
 0x43b   : > { %8641 = vst [vmem:[#allocation43_spill] sm:$0xff] %v8193_v52  ;;  %v8195_v62 = vpop.f32.mrb[126].mxu0  ;;  %4011 = vst [vmem:[#allocation2 + $0x1e8] sm:$0xff] (!%p5043_p7), %v8193_v52 }
 0x43c   : > { %8642 = vst [vmem:[#allocation44_spill] sm:$0xff] %v8195_v62  ;;  %v8197_v37 = vpop.f32.mrb[127].mxu0  ;;  %4012 = vst [vmem:[#allocation2 + $0x1f0] sm:$0xff] (!%p5043_p7), %v8195_v62 }
 0x43d   : > { %8643 = vst [vmem:[#allocation45_spill] sm:$0xff] %v8197_v37  ;;  %4013 = vst [vmem:[#allocation2 + $0x1f8] sm:$0xff] (!%p5043_p7), %v8197_v37 }
 0x43e PF: > { %s8645_s11 = sld [smem:[#allocation19_spill]] }
 0x444   : > { %p5044_p0 = scmp.le.s32.totalorder %s8645_s11, 0 }
 0x445   : > { %v4018_v50 = vld [vmem:[#allocation2] sm:$0xff] (!%p5044_p0)  ;;  %v4019_v4 = vld [vmem:[#allocation2 + $0x8] sm:$0xff] (!%p5044_p0)  ;;  %v4020_v56 = vld [vmem:[#allocation2 + $0x10] sm:$0xff] (!%p5044_p0) }
 0x446   : > { %4017 = sbr.rel (%p5044_p0) target bundleno = 1132 (0x46c), region = 60  ;;  %v4082_v38 = vadd.f32 (!%p5044_p0), %v4018_v50, %v8071_v41  ;;  %v4083_v12 = vadd.f32 (!%p5044_p0), %v4019_v4, %v8073_v54  ;;  %v4084_v27 = vadd.f32 (!%p5044_p0), %v4020_v56, %v8075_v10  ;;  %v4021_v61 = vld [vmem:[#allocation2 + $0x18] sm:$0xff] (!%p5044_p0)  ;;  %v4022_v17 = vld [vmem:[#allocation2 + $0x20] sm:$0xff] (!%p5044_p0)  ;;  %v4023_v52 = vld [vmem:[#allocation2 + $0x28] sm:$0xff] (!%p5044_p0) }
 0x447   : > { %v4085_v62 = vadd.f32 (!%p5044_p0), %v4021_v61, %v8077_v29  ;;  %v4086_v37 = vadd.f32 (!%p5044_p0), %v4022_v17, %v8079_v7  ;;  %v4087_v44 = vadd.f32 (!%p5044_p0), %v4023_v52, %v8081_v16  ;;  %v4024_v26 = vld [vmem:[#allocation2 + $0x30] sm:$0xff] (!%p5044_p0)  ;;  %v4025_v1 = vld [vmem:[#allocation2 + $0x38] sm:$0xff] (!%p5044_p0)  ;;  %v4026_v8 = vld [vmem:[#allocation2 + $0x40] sm:$0xff] (!%p5044_p0) }
 0x448   : > { %4146 = vst [vmem:[#allocation2] sm:$0xff] (!%p5044_p0), %v4082_v38  ;;  %4147 = vst [vmem:[#allocation2 + $0x8] sm:$0xff] (!%p5044_p0), %v4083_v12  ;;  %v4088_v41 = vadd.f32 (!%p5044_p0), %v4024_v26, %v8083_v22  ;;  %v4089_v54 = vadd.f32 (!%p5044_p0), %v4025_v1, %v8085_v43  ;;  %v4090_v10 = vadd.f32 (!%p5044_p0), %v4026_v8, %v8087_v40  ;;  %v4027_v56 = vld [vmem:[#allocation2 + $0x48] sm:$0xff] (!%p5044_p0)  ;;  %v4028_v50 = vld [vmem:[#allocation2 + $0x50] sm:$0xff] (!%p5044_p0) }
 0x449   : > { %4148 = vst [vmem:[#allocation2 + $0x10] sm:$0xff] (!%p5044_p0), %v4084_v27  ;;  %v4029_v4 = vld [vmem:[#allocation2 + $0x58] sm:$0xff] (!%p5044_p0)  ;;  %4149 = vst [vmem:[#allocation2 + $0x18] sm:$0xff] (!%p5044_p0), %v4085_v62  ;;  %v4091_v29 = vadd.f32 (!%p5044_p0), %v4027_v56, %v8089_v49  ;;  %v4092_v7 = vadd.f32 (!%p5044_p0), %v4028_v50, %v8091_v35  ;;  %v4030_v17 = vld [vmem:[#allocation2 + $0x60] sm:$0xff] (!%p5044_p0) }
 0x44a   : > { %4150 = vst [vmem:[#allocation2 + $0x20] sm:$0xff] (!%p5044_p0), %v4086_v37  ;;  %4151 = vst [vmem:[#allocation2 + $0x28] sm:$0xff] (!%p5044_p0), %v4087_v44  ;;  %v4093_v16 = vadd.f32 (!%p5044_p0), %v4029_v4, %v8093_v13  ;;  %v4031_v38 = vld [vmem:[#allocation2 + $0x68] sm:$0xff] (!%p5044_p0)  ;;  %v4032_v12 = vld [vmem:[#allocation2 + $0x70] sm:$0xff] (!%p5044_p0)  ;;  %v4094_v22 = vadd.f32 (!%p5044_p0), %v4030_v17, %v8095_v60 }
 0x44b   : > { %4152 = vst [vmem:[#allocation2 + $0x30] sm:$0xff] (!%p5044_p0), %v4088_v41  ;;  %4153 = vst [vmem:[#allocation2 + $0x38] sm:$0xff] (!%p5044_p0), %v4089_v54  ;;  %v4095_v43 = vadd.f32 (!%p5044_p0), %v4031_v38, %v8097_v57  ;;  %v4096_v40 = vadd.f32 (!%p5044_p0), %v4032_v12, %v8099_v19  ;;  %v4033_v8 = vld [vmem:[#allocation2 + $0x78] sm:$0xff] (!%p5044_p0)  ;;  %v4034_v1 = vld [vmem:[#allocation2 + $0x80] sm:$0xff] (!%p5044_p0) }
 0x44c   : > { %4154 = vst [vmem:[#allocation2 + $0x40] sm:$0xff] (!%p5044_p0), %v4090_v10  ;;  %v4035_v26 = vld [vmem:[#allocation2 + $0x88] sm:$0xff] (!%p5044_p0)  ;;  %4155 = vst [vmem:[#allocation2 + $0x48] sm:$0xff] (!%p5044_p0), %v4091_v29  ;;  %v4097_v49 = vadd.f32 (!%p5044_p0), %v4033_v8, %v8101_v14  ;;  %v4098_v35 = vadd.f32 (!%p5044_p0), %v4034_v1, %v8103_v11  ;;  %v4036_v44 = vld [vmem:[#allocation2 + $0x90] sm:$0xff] (!%p5044_p0) }
 0x44d   : > { %4156 = vst [vmem:[#allocation2 + $0x50] sm:$0xff] %v4092_v7  ;;  %4157 = vst [vmem:[#allocation2 + $0x58] sm:$0xff] %v4093_v16  ;;  %v4099_v13 = vadd.f32 %v4035_v26, %v8105_v18  ;;  %v4037_v27 = vld [vmem:[#allocation2 + $0x98] sm:$0xff]  ;;  %v4038_v61 = vld [vmem:[#allocation2 + $0xa0] sm:$0xff]  ;;  %v4100_v60 = vadd.f32 %v4036_v44, %v8107_v3 }
 0x44e   : > { %4158 = vst [vmem:[#allocation2 + $0x60] sm:$0xff] %v4094_v22  ;;  %4159 = vst [vmem:[#allocation2 + $0x68] sm:$0xff] %v4095_v43  ;;  %v4101_v57 = vadd.f32 %v4037_v27, %v8109_v5  ;;  %v4102_v19 = vadd.f32 %v4038_v61, %v8111_v9  ;;  %v4039_v52 = vld [vmem:[#allocation2 + $0xa8] sm:$0xff]  ;;  %v4040_v62 = vld [vmem:[#allocation2 + $0xb0] sm:$0xff] }
 0x44f   : > { %4160 = vst [vmem:[#allocation2 + $0x70] sm:$0xff] %v4096_v40  ;;  %v4041_v37 = vld [vmem:[#allocation2 + $0xb8] sm:$0xff]  ;;  %4161 = vst [vmem:[#allocation2 + $0x78] sm:$0xff] %v4097_v49  ;;  %v4103_v14 = vadd.f32 %v4039_v52, %v8113_v28  ;;  %v4104_v11 = vadd.f32 %v4040_v62, %v8115_v46  ;;  %v4042_v41 = vld [vmem:[#allocation2 + $0xc0] sm:$0xff] }
 0x450   : > { %4162 = vst [vmem:[#allocation2 + $0x80] sm:$0xff] %v4098_v35  ;;  %4163 = vst [vmem:[#allocation2 + $0x88] sm:$0xff] %v4099_v13  ;;  %v4105_v18 = vadd.f32 %v4041_v37, %v8117_v2  ;;  %v4043_v54 = vld [vmem:[#allocation2 + $0xc8] sm:$0xff]  ;;  %v4044_v10 = vld [vmem:[#allocation2 + $0xd0] sm:$0xff]  ;;  %v4106_v3 = vadd.f32 %v4042_v41, %v8119_v0 }
 0x451   : > { %4164 = vst [vmem:[#allocation2 + $0x90] sm:$0xff] %v4100_v60  ;;  %4165 = vst [vmem:[#allocation2 + $0x98] sm:$0xff] %v4101_v57  ;;  %v4107_v5 = vadd.f32 %v4043_v54, %v8121_v45  ;;  %v4108_v9 = vadd.f32 %v4044_v10, %v8123_v51  ;;  %v4045_v56 = vld [vmem:[#allocation2 + $0xd8] sm:$0xff]  ;;  %v4046_v50 = vld [vmem:[#allocation2 + $0xe0] sm:$0xff] }
 0x452   : > { %4166 = vst [vmem:[#allocation2 + $0xa0] sm:$0xff] %v4102_v19  ;;  %v4047_v4 = vld [vmem:[#allocation2 + $0xe8] sm:$0xff]  ;;  %4167 = vst [vmem:[#allocation2 + $0xa8] sm:$0xff] %v4103_v14  ;;  %v4109_v28 = vadd.f32 %v4045_v56, %v8125_v33  ;;  %v4110_v46 = vadd.f32 %v4046_v50, %v8127_v6  ;;  %v4048_v29 = vld [vmem:[#allocation2 + $0xf0] sm:$0xff] }
 0x453   : > { %4168 = vst [vmem:[#allocation2 + $0xb0] sm:$0xff] %v4104_v11  ;;  %4169 = vst [vmem:[#allocation2 + $0xb8] sm:$0xff] %v4105_v18  ;;  %v4111_v2 = vadd.f32 %v4047_v4, %v8129_v32  ;;  %v4049_v7 = vld [vmem:[#allocation2 + $0xf8] sm:$0xff]  ;;  %v4050_v16 = vld [vmem:[#allocation2 + $0x100] sm:$0xff]  ;;  %v4112_v0 = vadd.f32 %v4048_v29, %v8131_v48 }
 0x454   : > { %4170 = vst [vmem:[#allocation2 + $0xc0] sm:$0xff] %v4106_v3  ;;  %4171 = vst [vmem:[#allocation2 + $0xc8] sm:$0xff] %v4107_v5  ;;  %v4113_v45 = vadd.f32 %v4049_v7, %v8133_v15  ;;  %v4114_v51 = vadd.f32 %v4050_v16, %v8135_v25  ;;  %v4051_v17 = vld [vmem:[#allocation2 + $0x108] sm:$0xff]  ;;  %v4052_v38 = vld [vmem:[#allocation2 + $0x110] sm:$0xff] }
 0x455   : > { %4172 = vst [vmem:[#allocation2 + $0xd0] sm:$0xff] %v4108_v9  ;;  %v4053_v12 = vld [vmem:[#allocation2 + $0x118] sm:$0xff]  ;;  %4173 = vst [vmem:[#allocation2 + $0xd8] sm:$0xff] %v4109_v28  ;;  %v4115_v33 = vadd.f32 %v4051_v17, %v8137_v30  ;;  %v4116_v6 = vadd.f32 %v4052_v38, %v8139_v63  ;;  %v4054_v22 = vld [vmem:[#allocation2 + $0x120] sm:$0xff] }
 0x456   : > { %4174 = vst [vmem:[#allocation2 + $0xe0] sm:$0xff] %v4110_v46  ;;  %4175 = vst [vmem:[#allocation2 + $0xe8] sm:$0xff] %v4111_v2  ;;  %v4117_v32 = vadd.f32 %v4053_v12, %v8141_v23  ;;  %v4055_v43 = vld [vmem:[#allocation2 + $0x128] sm:$0xff]  ;;  %v4056_v40 = vld [vmem:[#allocation2 + $0x130] sm:$0xff]  ;;  %v4118_v48 = vadd.f32 %v4054_v22, %v8143_v55 }
 0x457   : > { %4176 = vst [vmem:[#allocation2 + $0xf0] sm:$0xff] %v4112_v0  ;;  %4177 = vst [vmem:[#allocation2 + $0xf8] sm:$0xff] %v4113_v45  ;;  %v4119_v15 = vadd.f32 %v4055_v43, %v8145_v59  ;;  %v4120_v25 = vadd.f32 %v4056_v40, %v8147_v34  ;;  %v4057_v8 = vld [vmem:[#allocation2 + $0x138] sm:$0xff]  ;;  %v4058_v1 = vld [vmem:[#allocation2 + $0x140] sm:$0xff] }
 0x458   : > { %4178 = vst [vmem:[#allocation2 + $0x100] sm:$0xff] %v4114_v51  ;;  %v4059_v26 = vld [vmem:[#allocation2 + $0x148] sm:$0xff]  ;;  %4179 = vst [vmem:[#allocation2 + $0x108] sm:$0xff] %v4115_v33  ;;  %v4121_v30 = vadd.f32 %v4057_v8, %v8149_v36  ;;  %v4122_v63 = vadd.f32 %v4058_v1, %v8151_v42  ;;  %v4060_v49 = vld [vmem:[#allocation2 + $0x150] sm:$0xff] }
 0x459   : > { %4180 = vst [vmem:[#allocation2 + $0x110] sm:$0xff] %v4116_v6  ;;  %4181 = vst [vmem:[#allocation2 + $0x118] sm:$0xff] %v4117_v32  ;;  %v4123_v23 = vadd.f32 %v4059_v26, %v8153_v53  ;;  %v4061_v35 = vld [vmem:[#allocation2 + $0x158] sm:$0xff]  ;;  %v4062_v13 = vld [vmem:[#allocation2 + $0x160] sm:$0xff]  ;;  %v4124_v55 = vadd.f32 %v4060_v49, %v8155_v31 }
 0x45a   : > { %4182 = vst [vmem:[#allocation2 + $0x120] sm:$0xff] %v4118_v48  ;;  %4183 = vst [vmem:[#allocation2 + $0x128] sm:$0xff] %v4119_v15  ;;  %v4125_v59 = vadd.f32 %v4061_v35, %v8157_v24  ;;  %v4126_v34 = vadd.f32 %v4062_v13, %v8159_v58  ;;  %v4063_v44 = vld [vmem:[#allocation2 + $0x168] sm:$0xff]  ;;  %v4064_v27 = vld [vmem:[#allocation2 + $0x170] sm:$0xff] }
 0x45b   : > { %4184 = vst [vmem:[#allocation2 + $0x130] sm:$0xff] %v4120_v25  ;;  %v4065_v61 = vld [vmem:[#allocation2 + $0x178] sm:$0xff]  ;;  %4185 = vst [vmem:[#allocation2 + $0x138] sm:$0xff] %v4121_v30  ;;  %v4127_v36 = vadd.f32 %v4063_v44, %v8161_v20  ;;  %v4128_v42 = vadd.f32 %v4064_v27, %v8163_v47  ;;  %v4066_v60 = vld [vmem:[#allocation2 + $0x180] sm:$0xff] }
 0x45c   : > { %4186 = vst [vmem:[#allocation2 + $0x140] sm:$0xff] %v4122_v63  ;;  %4187 = vst [vmem:[#allocation2 + $0x148] sm:$0xff] %v4123_v23  ;;  %v4129_v53 = vadd.f32 %v4065_v61, %v8165_v21  ;;  %v4067_v57 = vld [vmem:[#allocation2 + $0x188] sm:$0xff]  ;;  %v4068_v19 = vld [vmem:[#allocation2 + $0x190] sm:$0xff]  ;;  %v4130_v31 = vadd.f32 %v4066_v60, %v8167_v39 }
 0x45d   : > { %4188 = vst [vmem:[#allocation2 + $0x150] sm:$0xff] %v4124_v55  ;;  %4189 = vst [vmem:[#allocation2 + $0x158] sm:$0xff] %v4125_v59  ;;  %v8646_v24 = vld [vmem:[#allocation31_spill] sm:$0xff]  ;;  %v8647_v52 = vld [vmem:[#allocation32_spill] sm:$0xff] }
 0x45e   : > { %4190 = vst [vmem:[#allocation2 + $0x160] sm:$0xff] %v4126_v34  ;;  %v4131_v58 = vadd.f32 %v4067_v57, %v8646_v24  ;;  %v4132_v62 = vadd.f32 %v4068_v19, %v8647_v52  ;;  %v4069_v37 = vld [vmem:[#allocation2 + $0x198] sm:$0xff]  ;;  %v4070_v14 = vld [vmem:[#allocation2 + $0x1a0] sm:$0xff]  ;;  %v4071_v11 = vld [vmem:[#allocation2 + $0x1a8] sm:$0xff] }
 0x45f   : > { %4191 = vst [vmem:[#allocation2 + $0x168] sm:$0xff] %v4127_v36  ;;  %4192 = vst [vmem:[#allocation2 + $0x170] sm:$0xff] %v4128_v42  ;;  %v8648_v20 = vld [vmem:[#allocation33_spill] sm:$0xff]  ;;  %v8649_v21 = vld [vmem:[#allocation34_spill] sm:$0xff] }
 0x460   : > { %4193 = vst [vmem:[#allocation2 + $0x178] sm:$0xff] %v4129_v53  ;;  %v4133_v47 = vadd.f32 %v4069_v37, %v8648_v20  ;;  %v4134_v18 = vadd.f32 %v4070_v14, %v8649_v21  ;;  %v8650_v41 = vld [vmem:[#allocation35_spill] sm:$0xff]  ;;  %v4072_v10 = vld [vmem:[#allocation2 + $0x1b0] sm:$0xff]  ;;  %v4073_v3 = vld [vmem:[#allocation2 + $0x1b8] sm:$0xff] }
 0x461   : > { %v4135_v54 = vadd.f32 %v4071_v11, %v8650_v41  ;;  %v4074_v5 = vld [vmem:[#allocation2 + $0x1c0] sm:$0xff]  ;;  %4194 = vst [vmem:[#allocation2 + $0x180] sm:$0xff] %v4130_v31  ;;  %4195 = vst [vmem:[#allocation2 + $0x188] sm:$0xff] %v4131_v58  ;;  %v8651_v39 = vld [vmem:[#allocation36_spill] sm:$0xff] }
 0x462   : > { %4196 = vst [vmem:[#allocation2 + $0x190] sm:$0xff] %v4132_v62  ;;  %v4136_v9 = vadd.f32 %v4072_v10, %v8651_v39  ;;  %v8652_v56 = vld [vmem:[#allocation37_spill] sm:$0xff]  ;;  %v8653_v4 = vld [vmem:[#allocation38_spill] sm:$0xff]  ;;  %v4075_v46 = vld [vmem:[#allocation2 + $0x1c8] sm:$0xff] }
 0x463   : > { %v4137_v50 = vadd.f32 %v4073_v3, %v8652_v56  ;;  %v4138_v28 = vadd.f32 %v4074_v5, %v8653_v4  ;;  %v4076_v2 = vld [vmem:[#allocation2 + $0x1d0] sm:$0xff]  ;;  %v4077_v29 = vld [vmem:[#allocation2 + $0x1d8] sm:$0xff]  ;;  %4197 = vst [vmem:[#allocation2 + $0x198] sm:$0xff] %v4133_v47  ;;  %4198 = vst [vmem:[#allocation2 + $0x1a0] sm:$0xff] %v4134_v18 }
 0x464   : > { %4199 = vst [vmem:[#allocation2 + $0x1a8] sm:$0xff] %v4135_v54  ;;  %v8654_v7 = vld [vmem:[#allocation39_spill] sm:$0xff]  ;;  %v8655_v0 = vld [vmem:[#allocation40_spill] sm:$0xff]  ;;  %v8656_v51 = vld [vmem:[#allocation41_spill] sm:$0xff] }
 0x465   : > { %v4139_v16 = vadd.f32 %v4075_v46, %v8654_v7  ;;  %v4140_v45 = vadd.f32 %v4076_v2, %v8655_v0  ;;  %v4141_v17 = vadd.f32 %v4077_v29, %v8656_v51  ;;  %v4078_v38 = vld [vmem:[#allocation2 + $0x1e0] sm:$0xff]  ;;  %v4079_v12 = vld [vmem:[#allocation2 + $0x1e8] sm:$0xff]  ;;  %v4080_v33 = vld [vmem:[#allocation2 + $0x1f0] sm:$0xff]  ;;  %4200 = vst [vmem:[#allocation2 + $0x1b0] sm:$0xff] %v4136_v9 }
 0x466   : > { %4201 = vst [vmem:[#allocation2 + $0x1b8] sm:$0xff] %v4137_v50  ;;  %4202 = vst [vmem:[#allocation2 + $0x1c0] sm:$0xff] %v4138_v28  ;;  %v8657_v6 = vld [vmem:[#allocation42_spill] sm:$0xff]  ;;  %v8658_v22 = vld [vmem:[#allocation43_spill] sm:$0xff] }
 0x467   : > { %v4142_v32 = vadd.f32 %v4078_v38, %v8657_v6  ;;  %v4143_v43 = vadd.f32 %v4079_v12, %v8658_v22  ;;  %v8659_v40 = vld [vmem:[#allocation44_spill] sm:$0xff]  ;;  %v4081_v15 = vld [vmem:[#allocation2 + $0x1f8] sm:$0xff]  ;;  %4203 = vst [vmem:[#allocation2 + $0x1c8] sm:$0xff] %v4139_v16  ;;  %4204 = vst [vmem:[#allocation2 + $0x1d0] sm:$0xff] %v4140_v45 }
 0x468   : > { %v4144_v48 = vadd.f32 %v4080_v33, %v8659_v40  ;;  %4205 = vst [vmem:[#allocation2 + $0x1d8] sm:$0xff] %v4141_v17  ;;  %v8660_v25 = vld [vmem:[#allocation45_spill] sm:$0xff] }
 0x469   : > { %v4145_v8 = vadd.f32 %v4081_v15, %v8660_v25  ;;  %4206 = vst [vmem:[#allocation2 + $0x1e0] sm:$0xff] %v4142_v32  ;;  %4207 = vst [vmem:[#allocation2 + $0x1e8] sm:$0xff] %v4143_v43 }
 0x46a   : > { %4208 = vst [vmem:[#allocation2 + $0x1f0] sm:$0xff] %v4144_v48 }
 0x46b   : > { %4209 = vst [vmem:[#allocation2 + $0x1f8] sm:$0xff] %v4145_v8 }
 0x46c PF: > { %s8661_s8 = sld [smem:[#allocation19_spill]] }
 0x472   : > { %p5045_p9 = scmp.ne.s32.totalorder %s8661_s8, 1 }
 0x473   : > { %v4214_v1 = vld [vmem:[#allocation2] sm:$0xff] (!%p5045_p9)  ;;  %v4215_v26 = vld [vmem:[#allocation2 + $0x8] sm:$0xff] (!%p5045_p9)  ;;  %v4216_v30 = vld [vmem:[#allocation2 + $0x10] sm:$0xff] (!%p5045_p9) }
 0x474   : > { %4213 = sbr.rel (%p5045_p9) target bundleno = 1166 (0x48e), region = 64  ;;  %v5089_v63 = vpack.c.bf16 (!%p5045_p9), %v4215_v26, %v4214_v1  ;;  %v4217_v23 = vld [vmem:[#allocation2 + $0x18] sm:$0xff] (!%p5045_p9)  ;;  %v4218_v49 = vld [vmem:[#allocation2 + $0x20] sm:$0xff] (!%p5045_p9)  ;;  %v4219_v35 = vld [vmem:[#allocation2 + $0x28] sm:$0xff] (!%p5045_p9) }
 0x475   : > { %v5090_v13 = vpack.c.bf16 (!%p5045_p9), %v4217_v23, %v4216_v30  ;;  %v5091_v55 = vpack.c.bf16 (!%p5045_p9), %v4219_v35, %v4218_v49  ;;  %v4220_v59 = vld [vmem:[#allocation2 + $0x30] sm:$0xff] (!%p5045_p9)  ;;  %v4221_v34 = vld [vmem:[#allocation2 + $0x38] sm:$0xff] (!%p5045_p9)  ;;  %v4222_v44 = vld [vmem:[#allocation2 + $0x40] sm:$0xff] (!%p5045_p9) }
 0x476   : > { %4470 = vst [vmem:[%s8201_s4] sm:$0xff] (!%p5045_p9), %v5089_v63  ;;  %v5092_v27 = vpack.c.bf16 (!%p5045_p9), %v4221_v34, %v4220_v59  ;;  %v4223_v61 = vld [vmem:[#allocation2 + $0x48] sm:$0xff] (!%p5045_p9)  ;;  %v4224_v36 = vld [vmem:[#allocation2 + $0x50] sm:$0xff] (!%p5045_p9)  ;;  %v4225_v42 = vld [vmem:[#allocation2 + $0x58] sm:$0xff] (!%p5045_p9) }
 0x477   : > { %4471 = vst [vmem:[%s8201_s4 + $0x8] sm:$0xff] (!%p5045_p9), %v5090_v13  ;;  %4472 = vst [vmem:[%s8201_s4 + $0x10] sm:$0xff] (!%p5045_p9), %v5091_v55  ;;  %v5093_v53 = vpack.c.bf16 (!%p5045_p9), %v4223_v61, %v4222_v44  ;;  %v5094_v60 = vpack.c.bf16 (!%p5045_p9), %v4225_v42, %v4224_v36  ;;  %v4226_v57 = vld [vmem:[#allocation2 + $0x60] sm:$0xff] (!%p5045_p9)  ;;  %v4227_v19 = vld [vmem:[#allocation2 + $0x68] sm:$0xff] (!%p5045_p9) }
 0x478   : > { %v4228_v31 = vld [vmem:[#allocation2 + $0x70] sm:$0xff] (!%p5045_p9)  ;;  %4473 = vst [vmem:[%s8201_s4 + $0x18] sm:$0xff] (!%p5045_p9), %v5092_v27  ;;  %v5095_v24 = vpack.c.bf16 (!%p5045_p9), %v4227_v19, %v4226_v57  ;;  %v4229_v58 = vld [vmem:[#allocation2 + $0x78] sm:$0xff] (!%p5045_p9)  ;;  %v4230_v52 = vld [vmem:[#allocation2 + $0x80] sm:$0xff] (!%p5045_p9) }
 0x479   : > { %v4231_v62 = vld [vmem:[#allocation2 + $0x88] sm:$0xff] (!%p5045_p9)  ;;  %4474 = vst [vmem:[%s8201_s4 + $0x20] sm:$0xff] (!%p5045_p9), %v5093_v53  ;;  %4475 = vst [vmem:[%s8201_s4 + $0x28] sm:$0xff] (!%p5045_p9), %v5094_v60  ;;  %v5096_v37 = vpack.c.bf16 (!%p5045_p9), %v4229_v58, %v4228_v31  ;;  %v4232_v11 = vld [vmem:[#allocation2 + $0x90] sm:$0xff] (!%p5045_p9) }
 0x47a   : > { %v5097_v14 = vpack.c.bf16 (!%p5045_p9), %v4231_v62, %v4230_v52  ;;  %v4233_v20 = vld [vmem:[#allocation2 + $0x98] sm:$0xff] (!%p5045_p9)  ;;  %v4234_v47 = vld [vmem:[#allocation2 + $0xa0] sm:$0xff] (!%p5045_p9)  ;;  %4476 = vst [vmem:[%s8201_s4 + $0x30] sm:$0xff] (!%p5045_p9), %v5095_v24  ;;  %v4235_v18 = vld [vmem:[#allocation2 + $0xa8] sm:$0xff] (!%p5045_p9) }
 0x47b   : > { %v5098_v21 = vpack.c.bf16 %v4233_v20, %v4232_v11  ;;  %v4236_v41 = vld [vmem:[#allocation2 + $0xb0] sm:$0xff]  ;;  %v4237_v54 = vld [vmem:[#allocation2 + $0xb8] sm:$0xff]  ;;  %4477 = vst [vmem:[%s8201_s4 + $0x38] sm:$0xff] %v5096_v37  ;;  %v5099_v10 = vpack.c.bf16 %v4235_v18, %v4234_v47  ;;  %v4238_v5 = vld [vmem:[#allocation2 + $0xc0] sm:$0xff] }
 0x47c   : > { %4478 = vst [vmem:[%s8201_s4 + $0x40] sm:$0xff] %v5097_v14  ;;  %v5100_v3 = vpack.c.bf16 %v4237_v54, %v4236_v41  ;;  %v4239_v39 = vld [vmem:[#allocation2 + $0xc8] sm:$0xff]  ;;  %v4240_v9 = vld [vmem:[#allocation2 + $0xd0] sm:$0xff]  ;;  %v4241_v50 = vld [vmem:[#allocation2 + $0xd8] sm:$0xff] }
 0x47d   : > { %4479 = vst [vmem:[%s8201_s4 + $0x48] sm:$0xff] %v5098_v21  ;;  %v5101_v56 = vpack.c.bf16 %v4239_v39, %v4238_v5  ;;  %v4242_v4 = vld [vmem:[#allocation2 + $0xe0] sm:$0xff]  ;;  %v4243_v28 = vld [vmem:[#allocation2 + $0xe8] sm:$0xff]  ;;  %4480 = vst [vmem:[%s8201_s4 + $0x50] sm:$0xff] %v5099_v10  ;;  %v5102_v46 = vpack.c.bf16 %v4241_v50, %v4240_v9 }
 0x47e   : > { %4481 = vst [vmem:[%s8201_s4 + $0x58] sm:$0xff] %v5100_v3  ;;  %v5103_v2 = vpack.c.bf16 %v4243_v28, %v4242_v4  ;;  %v4244_v29 = vld [vmem:[#allocation2 + $0xf0] sm:$0xff]  ;;  %v4245_v7 = vld [vmem:[#allocation2 + $0xf8] sm:$0xff]  ;;  %v4246_v16 = vld [vmem:[#allocation2 + $0x100] sm:$0xff] }
 0x47f   : > { %4482 = vst [vmem:[%s8201_s4 + $0x60] sm:$0xff] %v5101_v56  ;;  %v5104_v0 = vpack.c.bf16 %v4245_v7, %v4244_v29  ;;  %v4247_v45 = vld [vmem:[#allocation2 + $0x108] sm:$0xff]  ;;  %v4248_v51 = vld [vmem:[#allocation2 + $0x110] sm:$0xff]  ;;  %v4249_v17 = vld [vmem:[#allocation2 + $0x118] sm:$0xff] }
 0x480   : > { %4483 = vst [vmem:[%s8201_s4 + $0x68] sm:$0xff] %v5102_v46  ;;  %4484 = vst [vmem:[%s8201_s4 + $0x70] sm:$0xff] %v5103_v2  ;;  %v5105_v38 = vpack.c.bf16 %v4247_v45, %v4246_v16  ;;  %v5106_v12 = vpack.c.bf16 %v4249_v17, %v4248_v51  ;;  %v4250_v33 = vld [vmem:[#allocation2 + $0x120] sm:$0xff]  ;;  %v4251_v6 = vld [vmem:[#allocation2 + $0x128] sm:$0xff] }
 0x481   : > { %v4252_v32 = vld [vmem:[#allocation2 + $0x130] sm:$0xff]  ;;  %4485 = vst [vmem:[%s8201_s4 + $0x78] sm:$0xff] %v5104_v0  ;;  %v5107_v22 = vpack.c.bf16 %v4251_v6, %v4250_v33  ;;  %v4253_v43 = vld [vmem:[#allocation2 + $0x138] sm:$0xff]  ;;  %v4254_v40 = vld [vmem:[#allocation2 + $0x140] sm:$0xff] }
 0x482   : > { %v4255_v48 = vld [vmem:[#allocation2 + $0x148] sm:$0xff]  ;;  %4486 = vst [vmem:[%s8201_s4 + $0x80] sm:$0xff] %v5105_v38  ;;  %4487 = vst [vmem:[%s8201_s4 + $0x88] sm:$0xff] %v5106_v12  ;;  %v5108_v15 = vpack.c.bf16 %v4253_v43, %v4252_v32  ;;  %v4256_v8 = vld [vmem:[#allocation2 + $0x150] sm:$0xff] }
 0x483   : > { %v5109_v25 = vpack.c.bf16 %v4255_v48, %v4254_v40  ;;  %v4257_v1 = vld [vmem:[#allocation2 + $0x158] sm:$0xff]  ;;  %v4258_v26 = vld [vmem:[#allocation2 + $0x160] sm:$0xff]  ;;  %4488 = vst [vmem:[%s8201_s4 + $0x90] sm:$0xff] %v5107_v22  ;;  %v4259_v63 = vld [vmem:[#allocation2 + $0x168] sm:$0xff] }
 0x484   : > { %v5110_v30 = vpack.c.bf16 %v4257_v1, %v4256_v8  ;;  %v4260_v23 = vld [vmem:[#allocation2 + $0x170] sm:$0xff]  ;;  %v4261_v49 = vld [vmem:[#allocation2 + $0x178] sm:$0xff]  ;;  %4489 = vst [vmem:[%s8201_s4 + $0x98] sm:$0xff] %v5108_v15  ;;  %v5111_v35 = vpack.c.bf16 %v4259_v63, %v4258_v26  ;;  %v4262_v55 = vld [vmem:[#allocation2 + $0x180] sm:$0xff] }
 0x485   : > { %4490 = vst [vmem:[%s8201_s4 + $0xa0] sm:$0xff] %v5109_v25  ;;  %v5112_v13 = vpack.c.bf16 %v4261_v49, %v4260_v23  ;;  %v4263_v59 = vld [vmem:[#allocation2 + $0x188] sm:$0xff]  ;;  %v4264_v34 = vld [vmem:[#allocation2 + $0x190] sm:$0xff]  ;;  %v4265_v27 = vld [vmem:[#allocation2 + $0x198] sm:$0xff] }
 0x486   : > { %4491 = vst [vmem:[%s8201_s4 + $0xa8] sm:$0xff] %v5110_v30  ;;  %v5113_v44 = vpack.c.bf16 %v4263_v59, %v4262_v55  ;;  %v4266_v61 = vld [vmem:[#allocation2 + $0x1a0] sm:$0xff]  ;;  %v4267_v36 = vld [vmem:[#allocation2 + $0x1a8] sm:$0xff]  ;;  %4492 = vst [vmem:[%s8201_s4 + $0xb0] sm:$0xff] %v5111_v35  ;;  %v5114_v42 = vpack.c.bf16 %v4265_v27, %v4264_v34 }
 0x487   : > { %4493 = vst [vmem:[%s8201_s4 + $0xb8] sm:$0xff] %v5112_v13  ;;  %v5115_v53 = vpack.c.bf16 %v4267_v36, %v4266_v61  ;;  %v4268_v60 = vld [vmem:[#allocation2 + $0x1b0] sm:$0xff]  ;;  %v4269_v57 = vld [vmem:[#allocation2 + $0x1b8] sm:$0xff]  ;;  %v4270_v19 = vld [vmem:[#allocation2 + $0x1c0] sm:$0xff] }
 0x488   : > { %4494 = vst [vmem:[%s8201_s4 + $0xc0] sm:$0xff] %v5113_v44  ;;  %v5116_v31 = vpack.c.bf16 %v4269_v57, %v4268_v60  ;;  %v4271_v24 = vld [vmem:[#allocation2 + $0x1c8] sm:$0xff]  ;;  %v4272_v58 = vld [vmem:[#allocation2 + $0x1d0] sm:$0xff]  ;;  %v4273_v52 = vld [vmem:[#allocation2 + $0x1d8] sm:$0xff] }
 0x489   : > { %4495 = vst [vmem:[%s8201_s4 + $0xc8] sm:$0xff] %v5114_v42  ;;  %4496 = vst [vmem:[%s8201_s4 + $0xd0] sm:$0xff] %v5115_v53  ;;  %v5117_v62 = vpack.c.bf16 %v4271_v24, %v4270_v19  ;;  %v5118_v37 = vpack.c.bf16 %v4273_v52, %v4272_v58  ;;  %v4274_v14 = vld [vmem:[#allocation2 + $0x1e0] sm:$0xff]  ;;  %v4275_v11 = vld [vmem:[#allocation2 + $0x1e8] sm:$0xff] }
 0x48a   : > { %v4276_v20 = vld [vmem:[#allocation2 + $0x1f0] sm:$0xff]  ;;  %4497 = vst [vmem:[%s8201_s4 + $0xd8] sm:$0xff] %v5116_v31  ;;  %v5119_v47 = vpack.c.bf16 %v4275_v11, %v4274_v14  ;;  %v4277_v21 = vld [vmem:[#allocation2 + $0x1f8] sm:$0xff] }
 0x48b   : > { %4498 = vst [vmem:[%s8201_s4 + $0xe0] sm:$0xff] %v5117_v62  ;;  %4499 = vst [vmem:[%s8201_s4 + $0xe8] sm:$0xff] %v5118_v37  ;;  %v5120_v18 = vpack.c.bf16 %v4277_v21, %v4276_v20 }
 0x48c   : > { %4500 = vst [vmem:[%s8201_s4 + $0xf0] sm:$0xff] %v5119_v47 }
 0x48d   : > { %4501 = vst [vmem:[%s8201_s4 + $0xf8] sm:$0xff] %v5120_v18 }
 0x48e PF: > { %s8662_s17 = sld [smem:[#allocation20_spill]]  ;;  %s8663_s1 = sld [smem:[#allocation59_spill]] }
 0x48f   : > { %s4517_s2 = sshll.u32 %s8201_s4, 4  ;;  %s4503_s18 = scalar_lea.sflag [#allocation5], %s6909_s27  ;;  %s8373_s2 = int_to_ptr.vmem [resolvable:$true] %s4517_s2 }
 0x490   : > { %s6336_s5 = scalar_lea.vmem %s8373_s2, 4096  ;;  %p8664_p4 = scmp.ne.s32.totalorder %s8551_s29, 0 }
 0x491   : > { %p6337_p11 = scmp.ne.s32.totalorder %s8373_s2, %s6336_s5  ;;  %s6505_s15 = smov [#allocation11]  }
 0x492   : > { %s6340_s12 = sshll.u32 %s6505_s15, 4  ;;  %s6341_s12 = int_to_ptr.vmem [resolvable:$false] %s6340_s12 }
 0x493   : > { %p6338_p13 = pnand %p6337_p11, %p8664_p4  ;;  %s6342_s10 = scalar_lea.vmem %s6341_s12, 8192 }
 0x494   : > { %s5122_s23 = sshll.u32 %s8662_s17, 12  ;;  %p6343_p3 = scmp.lt.s32.totalorder %s8373_s2, %s6341_s12 }
 0x495   : > { %s8370_s6 = scalar_lea.hbm %s8663_s1, %s5122_s23  ;;  %p6339_p12 = pneg %p6338_p13 }
 0x496   : > { %p6344_p8 = scmp.lt.s32.totalorder %s6342_s10, %s6336_s5 }
 0x498   : > { %p6345_p2 = por %p6344_p8, %p6343_p3 }
 0x49a   : > { %p6346_p10 = pnand %p6345_p2, %p6339_p12 }
 0x49c   : > { %6349 = shalt.err (!%p6346_p10)
}
 0x49d   : > { %s6350_s7 = scalar_lea.hbm %s8370_s6, 4096  ;;  %s6354_s14 = scalar_lea.hbm %s8663_s1, 8192 }
 0x49e   : > { %p6351_p6 = scmp.ne.s32.totalorder %s8370_s6, %s6350_s7  ;;  %p6355_p7 = scmp.lt.u32.totalorder %s8370_s6, %s8663_s1 }
 0x49f   : > { %p6356_p0 = scmp.lt.u32.totalorder %s6354_s14, %s6350_s7  ;;  %p6358_p11 = scmp.lt.u32.totalorder %s6350_s7, %s8370_s6 }
 0x4a0   : > { %p6352_p5 = pnand %p6351_p6, %p8664_p4 }
 0x4a1   : > { %p6357_p9 = por %p6356_p0, %p6355_p7 }
 0x4a2   : > { %p6353_p1 = pneg %p6352_p5 }
 0x4a3   : > { %p6359_p13 = por %p6358_p11, %p6357_p9 }
 0x4a5   : > { %p6360_p12 = pnand %p6359_p13, %p6353_p1 }
 0x4a7   : > { %6363 = shalt.err (!%p6360_p12)
}
 0x4a8   : > { %s6506_s11 = smov 128   ;;  %s6507_s8 = smov 8  }
 0x4a9   : > { %5195 = dma.vmem_to_hbm [thread:$0]  (%p8664_p4), %s8373_s2, 4096, %s8370_s6, %s4503_s18, %s6506_s11, %s6506_s11, %s6507_s8  }
 0x4aa PF: > { %p5215_p3 = scmp.ge.s32.totalorder %s6494_s28, 2  ;;  %s4532_s17 = sand.u32 1, %s6466_s21  }
 0x4ab   : > { %p8665_p8 = scmp.ne.s32.totalorder %s8552_s24, 0  ;;  %s4533_s23 = scalar_lea.sflag [#allocation5], %s4532_s17 }
 0x4ad   : > { %p5211_p2 = pnand %p5215_p3, %p8665_p8 }
 0x4af   : > { %6437 = dma.done.wait (!%p5211_p2), %s4533_s23, 4096  }
 0x4b0   : > { %6439 = vsyncadd (!%p5211_p2), %s4533_s23, 4294963200  ;;  %s26_s28 = sadd.s32 1, %s6494_s28   ;;  %s8667_s29 = sld [smem:[#allocation17_spill]] }
 0x4b1   : > { %p8404_p10 = scmp.ge.s32.totalorder %s26_s28, 6   ;;  %s8668_s17 = sld [smem:[#allocation30_spill]] }
 0x4b2   : > { %s8669_s27 = sld [smem:[#allocation28_spill]]  ;;  %s8670_s0 = sld [smem:[#allocation18_spill]] }
 0x4b3   : > { %s8671_s23 = sld [smem:[#allocation29_spill]]  ;;  %s8672_s25 = sld [smem:[#allocation21_spill]] }
 0x4b4   : > { %s8673_s6 = sld [smem:[#allocation26_spill]]  ;;  %s8674_s2 = sld [smem:[#allocation27_spill]] }
 0x4b5   : > { %s8675_s15 = smov %s6446_s16  ;;  %s8677_s18 = smov %s6458_s19 }
 0x4b6   : > { %s8676_s16 = smov %s8667_s29  ;;  %s8678_s19 = smov %s6462_s20 }
 0x4b7   : > { %s8680_s21 = smov %s6470_s22  ;;  %s8682_s24 = smov %s6486_s26 }
 0x4b8   : > { %s8679_s20 = smov %s8669_s27  ;;  %s8681_s22 = smov %s8670_s0 }
 0x4b9   :  { %25 = sbr.rel (!%p8404_p10) target bundleno = 20 (0x14), region = 130 }
 0x4ba   : > { %s8683_s26 = smov %s8673_s6  ;;  %s8684_s27 = smov %s8674_s2 }
 0x4c0   :  { %4538 = vsyncpa [#allocation4], 1 }
 0x4c1   :  { %4540 = vsyncpa [#allocation4 + $0x1], 1 }
 0x4c2   :  { %4541 = vsyncpa [#allocation7], 1 }
 0x4c3   :  { %4543 = vsyncpa [#allocation7 + $0x1], 1 }
 0x4c4   :  { %4544 = vsyncpa [#allocation10], 1 }
 0x4c5   :  { %4546 = vsyncpa [#allocation10 + $0x1], 1 }
 0x4c6   :  { %4547 = vsyncpa [#allocation5], 1 }
 0x4c7   :  { %4549 = vsyncpa [#allocation5 + $0x1], 1 }

</bundles_post_ra>
